<compile_context>
chip_gen: v7x
topology: tpu7x:2x2x1
jax: 0.10.0
libtpu: 0.0.40
codegen_flags: <defaults>
</compile_context>

<pallas_src>
import functools

import jax
import jax.numpy as jnp
from jax.experimental import pallas as pl
from jax.experimental.pallas import tpu as pltpu

# ---- small, deterministic problem sizes -------------------------------------
B, H, W = 2, 32, 32          # batch, spatial (real model uses 256x256)
HW = H * W
FEAT = 32                    # stand-in for global_feature_dim (real: 512/2048)
FEAT_CLS = 32                # stand-in feature dim of the ObjectPlaceNet classifier
NUM_CLASSES = 2              # binary real/fake classifier (probs[:, 0] == fake)
NUM_TPARAMS = 4              # prediction_head out dim (include_rotation=False)
_BIG = 1.0e9                 # "different channel" sentinel for the row-warp matrix


# =============================================================================
# Fused kernel: backbones + head + warp + blur + composite + classifier.
# One grid step per batch element.  Everything f32.
# =============================================================================
def _fused_kernel(xcat_ref, xback_ref,
                  w_bb_ref, w_head_ref, gby_ref, gbxt_ref, w_cls_ref, w_fc_ref,
                  xn_ref, qcol_ref, yn_ref, pbig_ref,
                  mexp_ref, ffold_ref, ftile_ref, z5_ref, ccol_ref,
                  comp_ref, logits_ref, pfake_ref, *, h, w):
    f32 = jnp.float32
    xcat = xcat_ref[0]                      # (4, HW) lane-dense, fetched once
    xback = xback_ref[0]                    # (3, HW) lane-dense, fetched once

    # ------- stand-in backbones: packed 1x1 conv + ReLU + GAP, merged head ----
    xstk = jnp.concatenate([xcat, xback], axis=0)                  # (7, HW)
    y_bb = jnp.maximum(
        jnp.dot(w_bb_ref[...], xstk, preferred_element_type=f32), 0.0)  # (2F, HW)
    g = jnp.mean(y_bb, axis=1, keepdims=True)                      # (2F, 1)  GAP
    tlog = jnp.dot(w_head_ref[...], g, preferred_element_type=f32)  # (4, 1)
    tp = 1.0 / (1.0 + jnp.exp(-tlog))                              # sigmoid
    cx = tp[0:1, 0:1] * 2.0 - 1.0
    cy = tp[1:2, 0:1] * 2.0 - 1.0
    inv_s = 1.0 / tp[2:3, 0:1]              # no clamp -> matches PyTorch 1/scale

    # ------- lane-dense -> (4h, w) slab for the warp (selector matmuls) -------
    z4 = z5_ref[0:4 * h, :]                                        # (4h, HW)
    bfull = jnp.dot(mexp_ref[...], xcat, preferred_element_type=f32)     # (4h, HW)
    cat_slab = jnp.dot(bfull * z4, ffold_ref[...],
                       preferred_element_type=f32)                 # (4h, w)

    # ------- affine warp: align_corners=True, zeros padding -------------------
    # wxt[q, j]: bilinear weight of input col q for output col j
    px = ((xn_ref[...] - cx) * inv_s + 1.0) * (0.5 * (w - 1))      # (1, w)
    wxt = jnp.maximum(0.0, 1.0 - jnp.abs(px - qcol_ref[...]))      # (w, w)
    # block-diagonal row weights for all 4 channels at once (toy size only)
    py = ((yn_ref[...] - cy) * inv_s + 1.0) * (0.5 * (h - 1))      # (4h, 1)
    wy_blk = jnp.maximum(0.0, 1.0 - jnp.abs(py - pbig_ref[...]))   # (4h, 4h)
    tcols = jnp.dot(cat_slab, wxt, preferred_element_type=f32)     # (4h, w)
    warped = jnp.dot(wy_blk, tcols, preferred_element_type=f32)    # (4h, w)

    # ------- GaussianBlur(5, 0.5), reflect padding, on the warped mask --------
    mask_s = warped[3 * h:4 * h, :]                                # (h, w)
    mb = jnp.dot(gby_ref[...], mask_s, preferred_element_type=f32)
    mblur_s = jnp.dot(mb, gbxt_ref[...], preferred_element_type=f32)

    # ------- (5h, w) slab -> (5, HW) lane-dense (selector matmuls) ------------
    s5 = jnp.concatenate([warped, mblur_s], axis=0)                # (5h, w)
    u = jnp.dot(s5, ftile_ref[...], preferred_element_type=f32) * z5_ref[...]
    ld5 = jnp.dot(ccol_ref[...], u, preferred_element_type=f32)    # (5, HW)
    fg = ld5[0:3, :]                                               # warped RGB
    mask_ld = ld5[3:4, :]                                          # un-blurred mask
    mblur_ld = ld5[4:5, :]                                         # blurred mask

    # ------- composite: lane-dense blend, single full-width store -------------
    comp = jnp.concatenate(
        [fg * mblur_ld + (1.0 - mblur_ld) * xback, mask_ld], axis=0)  # (4, HW)
    comp_ref[0] = comp

    # ------- classifier stand-in: 1x1 conv + ReLU + GAP + fc + softmax --------
    ycls = jnp.maximum(
        jnp.dot(w_cls_ref[...], comp, preferred_element_type=f32), 0.0)  # (F, HW)
    gcls = jnp.mean(ycls, axis=1, keepdims=True)                   # (F, 1)
    logits = jnp.dot(w_fc_ref[...], gcls, preferred_element_type=f32)  # (C, 1)
    m = jnp.max(logits, axis=0, keepdims=True)
    e = jnp.exp(logits - m)
    probs = e / jnp.sum(e, axis=0, keepdims=True)
    logits_ref[0] = logits
    pfake_ref[0] = probs[0:1, :]                                   # probs[:, 0]


# =============================================================================
# Wrapper: free NCHW reshapes, one pallas_call over the batch grid.
# =============================================================================
_CONST_KEYS = ("w_bb", "w_head", "g_blur_y", "g_blur_xt", "w_cls", "w_fc",
               "xn_row", "q_col", "yn_col", "pbig",
               "m_expand", "f_fold", "f_tile", "z5", "c_collapse")


def object_place_net_fb_composite_forward(img_cat, img_back, p):
    b, cin, h, w = img_cat.shape
    assert cin == 4 and img_back.shape == (b, 3, h, w)
    hw = h * w

    # free, layout-preserving views of the NCHW inputs (each fetched ONCE)
    xcat = img_cat.reshape(b, 4, hw)
    xback = img_back.reshape(b, 3, hw)

    def const_spec(a):
        return pl.BlockSpec(a.shape, lambda i: (0, 0))   # all constants are 2-D

    consts = [p[k] for k in _CONST_KEYS]

    comp, logits3, pfake3 = pl.pallas_call(
        functools.partial(_fused_kernel, h=h, w=w),
        out_shape=(
            jax.ShapeDtypeStruct((b, 4, hw), jnp.float32),        # lane-dense comp
            jax.ShapeDtypeStruct((b, NUM_CLASSES, 1), jnp.float32),
            jax.ShapeDtypeStruct((b, 1, 1), jnp.float32),
        ),
        grid=(b,),
        in_specs=[pl.BlockSpec((1, 4, hw), lambda i: (i, 0, 0)),
                  pl.BlockSpec((1, 3, hw), lambda i: (i, 0, 0))]
                 + [const_spec(a) for a in consts],
        out_specs=(
            pl.BlockSpec((1, 4, hw), lambda i: (i, 0, 0)),
            pl.BlockSpec((1, NUM_CLASSES, 1), lambda i: (i, 0, 0)),
            pl.BlockSpec((1, 1, 1), lambda i: (i, 0, 0)),
        ),
        compiler_params=pltpu.CompilerParams(
            dimension_semantics=("parallel",)),   # v7x megacore shards the batch
    )(xcat, xback, *consts)

    logits = logits3.reshape(b, NUM_CLASSES)
    probs_fake = pfake3.reshape(b)
    img_comp = comp.reshape(b, 4, h, w)          # free reshape back to NCHW
    return logits, probs_fake, img_comp


# =============================================================================
# Parameter / constant construction.
# =============================================================================
def gaussian_kernel1d(ksize=5, sigma=0.5):
    half = (ksize - 1) * 0.5
    x = jnp.linspace(-half, half, ksize)
    pdf = jnp.exp(-0.5 * (x / sigma) ** 2)
    return (pdf / jnp.sum(pdf)).astype(jnp.float32)


def reflect_blur_matrix(n, k1d):
    """Matrix G with (G @ v) == 1-D gaussian blur of v with reflect padding."""
    ksize = int(k1d.shape[0])
    r = ksize // 2
    g = jnp.zeros((n, n), jnp.float32)
    idx = jnp.arange(n)
    for t in range(ksize):
        src = idx + (t - r)
        src = jnp.where(src < 0, -src, src)
        src = jnp.where(src > n - 1, 2 * (n - 1) - src, src)
        g = g.at[idx, src].add(k1d[t])
    return g


def _build_structural_consts(h, w):
    """Grid-invariant coordinate / selector / mask constants (hoisted)."""
    hw = h * w
    jx = jnp.arange(w, dtype=jnp.float32)
    xn_row = (-1.0 + 2.0 * jx / (w - 1)).reshape(1, w)          # x normalized coords
    q_col = jx.reshape(w, 1)                                    # input col indices
    r4 = jnp.arange(4 * h)
    yn_col = (-1.0 + 2.0 * (r4 % h).astype(jnp.float32) / (h - 1)).reshape(4 * h, 1)
    ch4 = (r4 // h).reshape(4 * h, 1)
    cc4 = jnp.arange(4 * h).reshape(1, 4 * h)
    same = ch4 == (cc4 // h)
    pbig = jnp.where(same, (cc4 % h).astype(jnp.float32), _BIG)  # (4h, 4h)
    m_expand = (ch4 == jnp.arange(4).reshape(1, 4)).astype(jnp.float32)  # (4h, 4)
    r5 = jnp.arange(5 * h)
    c_collapse = (jnp.arange(5).reshape(5, 1)
                  == (r5 // h).reshape(1, 5 * h)).astype(jnp.float32)    # (5, 5h)
    lane = jnp.arange(hw)
    f_fold = ((lane % w).reshape(hw, 1)
              == jnp.arange(w).reshape(1, w)).astype(jnp.float32)        # (hw, w)
    f_tile = jnp.transpose(f_fold)                                        # (w, hw)
    z5 = ((lane // w).reshape(1, hw)
          == (r5 % h).reshape(5 * h, 1)).astype(jnp.float32)              # (5h, hw)
    return dict(xn_row=xn_row, q_col=q_col, yn_col=yn_col, pbig=pbig,
                m_expand=m_expand, f_fold=f_fold, f_tile=f_tile, z5=z5,
                c_collapse=c_collapse)


def init_params(key, h, w):
    ks = jax.random.split(key, 5)
    w_cat = 0.1 * jax.random.normal(ks[0], (FEAT, 4), jnp.float32)
    w_back = 0.1 * jax.random.normal(ks[1], (FEAT, 3), jnp.float32)
    w_head = 0.1 * jax.random.normal(ks[2], (NUM_TPARAMS, 2 * FEAT), jnp.float32)
    w_cls = 0.1 * jax.random.normal(ks[3], (FEAT_CLS, 4), jnp.float32)
    w_fc = 0.1 * jax.random.normal(ks[4], (NUM_CLASSES, FEAT_CLS), jnp.float32)

    # packed block-diagonal backbone weight: rows [0,F) use the 4 cat channels,
    # rows [F,2F) use the 3 back channels.
    w_bb = jnp.zeros((2 * FEAT, 7), jnp.float32)
    w_bb = w_bb.at[:FEAT, 0:4].set(w_cat).at[FEAT:, 4:7].set(w_back)

    k1d = gaussian_kernel1d(5, 0.5)
    params = dict(
        w_bb=w_bb,
        w_head=w_head,
        g_blur_y=reflect_blur_matrix(h, k1d),
        g_blur_xt=reflect_blur_matrix(w, k1d).T,
        w_cls=w_cls,
        w_fc=w_fc,
    )
    params.update(_build_structural_consts(h, w))
    return params


# =============================================================================
# Pure-JAX reference (same stand-in model) for a correctness self-check.
# =============================================================================
def _reference_forward(img_cat, img_back, p):
    b, _, h, w = img_cat.shape
    hw = h * w
    xstk = jnp.concatenate([img_cat.reshape(b, 4, hw),
                            img_back.reshape(b, 3, hw)], axis=1)
    y = jax.nn.relu(jnp.einsum('fc,bcl->bfl', p["w_bb"], xstk))
    g = jnp.mean(y, axis=2)                                   # (b, 2F)
    tp = jax.nn.sigmoid(g @ p["w_head"].T)                    # (b, 4)
    cx = tp[:, 0] * 2.0 - 1.0
    cy = tp[:, 1] * 2.0 - 1.0
    s = tp[:, 2]
    jj = jnp.arange(w, dtype=jnp.float32)
    ii = jnp.arange(h, dtype=jnp.float32)
    xn = -1.0 + 2.0 * jj / (w - 1)
    yn = -1.0 + 2.0 * ii / (h - 1)
    px = ((xn[None, :] - cx[:, None]) / s[:, None] + 1.0) * 0.5 * (w - 1)
    py = ((yn[None, :] - cy[:, None]) / s[:, None] + 1.0) * 0.5 * (h - 1)
    wx = jnp.maximum(0.0, 1.0 - jnp.abs(px[:, None, :] - jj[None, :, None]))  # (b,q,j)
    wy = jnp.maximum(0.0, 1.0 - jnp.abs(py[:, None, :] - ii[None, :, None]))  # (b,p,i)
    warped = jnp.einsum('bpi,bcpq,bqj->bcij', wy, img_cat, wx)
    mask = warped[:, 3]
    mblur = jnp.einsum('ip,bpq,qj->bij', p["g_blur_y"], mask, p["g_blur_xt"])
    comp_rgb = warped[:, 0:3] * mblur[:, None] + (1.0 - mblur[:, None]) * img_back
    comp = jnp.concatenate([comp_rgb, mask[:, None]], axis=1)
    yc = jax.nn.relu(jnp.einsum('fc,bcij->bfij', p["w_cls"], comp))
    gc = jnp.mean(yc, axis=(2, 3))
    logits = gc @ p["w_fc"].T
    probs = jax.nn.softmax(logits, axis=1)
    return logits, probs[:, 0], comp


if __name__ == "__main__":
    key = jax.random.PRNGKey(0)
    k_par, k_cat, k_back = jax.random.split(key, 3)
    params = init_params(k_par, H, W)

    img_cat = jax.random.uniform(k_cat, (B, 4, H, W), jnp.float32)    # RGB + mask
    img_back = jax.random.uniform(k_back, (B, 3, H, W), jnp.float32)

    fwd = jax.jit(object_place_net_fb_composite_forward)
    logits, probs_fake, img_comp = fwd(img_cat, img_back, params)
    jax.block_until_ready((logits, probs_fake, img_comp))

    assert logits.shape == (B, NUM_CLASSES)
    assert probs_fake.shape == (B,)
    assert img_comp.shape == (B, 4, H, W)

    ref_logits, ref_pfake, ref_comp = _reference_forward(img_cat, img_back, params)
    assert jnp.allclose(logits, ref_logits, rtol=2e-3, atol=2e-3)
    assert jnp.allclose(probs_fake, ref_pfake, rtol=2e-3, atol=2e-3)
    assert jnp.allclose(img_comp, ref_comp, rtol=2e-3, atol=2e-3)

    print("KERNEL_OK")
</pallas_src>

<mosaic_0001>
module attributes {stable_mosaic.version = 11 : i64} {
  func.func @_fused_kernel(%arg0: i32, %arg1: memref<1x4x1024xf32, #tpu.memory_space<vmem>>, %arg2: memref<1x3x1024xf32, #tpu.memory_space<vmem>>, %arg3: memref<64x7xf32, #tpu.memory_space<vmem>>, %arg4: memref<4x64xf32, #tpu.memory_space<vmem>>, %arg5: memref<32x32xf32, #tpu.memory_space<vmem>>, %arg6: memref<32x32xf32, #tpu.memory_space<vmem>>, %arg7: memref<32x4xf32, #tpu.memory_space<vmem>>, %arg8: memref<2x32xf32, #tpu.memory_space<vmem>>, %arg9: memref<1x32xf32, #tpu.memory_space<vmem>>, %arg10: memref<32x1xf32, #tpu.memory_space<vmem>>, %arg11: memref<128x1xf32, #tpu.memory_space<vmem>>, %arg12: memref<128x128xf32, #tpu.memory_space<vmem>>, %arg13: memref<128x4xf32, #tpu.memory_space<vmem>>, %arg14: memref<1024x32xf32, #tpu.memory_space<vmem>>, %arg15: memref<32x1024xf32, #tpu.memory_space<vmem>>, %arg16: memref<160x1024xf32, #tpu.memory_space<vmem>>, %arg17: memref<5x160xf32, #tpu.memory_space<vmem>>, %arg18: memref<1x4x1024xf32, #tpu.memory_space<vmem>>, %arg19: memref<1x2x1xf32, #tpu.memory_space<vmem>>, %arg20: memref<1x1x1xf32, #tpu.memory_space<vmem>>) attributes {dimension_semantics = [#tpu.dimension_semantics<parallel>], iteration_bounds = array<i64: 2>, scalar_prefetch = 0 : i64, scratch_operands = 0 : i64, tpu.core_type = #tpu.core_type<tc>, window_params = [{transform_indices = @transform_0, window_bounds = array<i64: 1, 4, 1024>}, {transform_indices = @transform_1, window_bounds = array<i64: 1, 3, 1024>}, {pipeline_mode = #tpu.pipeline_mode<synchronous>, transform_indices = @transform_2, window_bounds = array<i64: 64, 7>}, {pipeline_mode = #tpu.pipeline_mode<synchronous>, transform_indices = @transform_3, window_bounds = array<i64: 4, 64>}, {pipeline_mode = #tpu.pipeline_mode<synchronous>, transform_indices = @transform_4, window_bounds = array<i64: 32, 32>}, {pipeline_mode = #tpu.pipeline_mode<synchronous>, transform_indices = @transform_5, window_bounds = array<i64: 32, 32>}, {pipeline_mode = #tpu.pipeline_mode<synchronous>, transform_indices = @transform_6, window_bounds = array<i64: 32, 4>}, {pipeline_mode = #tpu.pipeline_mode<synchronous>, transform_indices = @transform_7, window_bounds = array<i64: 2, 32>}, {pipeline_mode = #tpu.pipeline_mode<synchronous>, transform_indices = @transform_8, window_bounds = array<i64: 1, 32>}, {pipeline_mode = #tpu.pipeline_mode<synchronous>, transform_indices = @transform_9, window_bounds = array<i64: 32, 1>}, {pipeline_mode = #tpu.pipeline_mode<synchronous>, transform_indices = @transform_10, window_bounds = array<i64: 128, 1>}, {pipeline_mode = #tpu.pipeline_mode<synchronous>, transform_indices = @transform_11, window_bounds = array<i64: 128, 128>}, {pipeline_mode = #tpu.pipeline_mode<synchronous>, transform_indices = @transform_12, window_bounds = array<i64: 128, 4>}, {pipeline_mode = #tpu.pipeline_mode<synchronous>, transform_indices = @transform_13, window_bounds = array<i64: 1024, 32>}, {pipeline_mode = #tpu.pipeline_mode<synchronous>, transform_indices = @transform_14, window_bounds = array<i64: 32, 1024>}, {pipeline_mode = #tpu.pipeline_mode<synchronous>, transform_indices = @transform_15, window_bounds = array<i64: 160, 1024>}, {pipeline_mode = #tpu.pipeline_mode<synchronous>, transform_indices = @transform_16, window_bounds = array<i64: 5, 160>}, {transform_indices = @transform_17, window_bounds = array<i64: 1, 4, 1024>}, {transform_indices = @transform_18, window_bounds = array<i64: 1, 2, 1>}, {transform_indices = @transform_19, window_bounds = array<i64: 1, 1, 1>}]} {
    %c0 = arith.constant 0 : index
    %c0_0 = arith.constant 0 : index
    %c0_1 = arith.constant 0 : index
    %0 = vector.load %arg1[%c0, %c0_0, %c0_1] : memref<1x4x1024xf32, #tpu.memory_space<vmem>>, vector<1x4x1024xf32>
    %1 = vector.shape_cast %0 : vector<1x4x1024xf32> to vector<4x1024xf32>
    %c0_2 = arith.constant 0 : index
    %c0_3 = arith.constant 0 : index
    %c0_4 = arith.constant 0 : index
    %2 = vector.load %arg2[%c0_2, %c0_3, %c0_4] : memref<1x3x1024xf32, #tpu.memory_space<vmem>>, vector<1x3x1024xf32>
    %3 = vector.shape_cast %2 : vector<1x3x1024xf32> to vector<3x1024xf32>
    %4 = tpu.concatenate %1, %3 in 0 : vector<4x1024xf32>, vector<3x1024xf32> -> vector<7x1024xf32>
    %c0_5 = arith.constant 0 : index
    %c0_6 = arith.constant 0 : index
    %5 = vector.load %arg3[%c0_5, %c0_6] : memref<64x7xf32, #tpu.memory_space<vmem>>, vector<64x7xf32>
    %cst = arith.constant dense<0.000000e+00> : vector<64x1024xf32>
    %6 = tpu.matmul %5, %4, %cst {dimension_numbers = #tpu.dot_dimension_numbers<[1], [0], [0], [1], [0, 0, 1, 1], [], []>} : vector<64x7xf32>, vector<7x1024xf32>, vector<64x1024xf32> -> vector<64x1024xf32>
    %cst_7 = arith.constant 0.000000e+00 : f32
    %7 = vector.broadcast %cst_7 : f32 to vector<64x1024xf32>
    %8 = arith.maximumf %6, %7 : vector<64x1024xf32>
    %cst_8 = arith.constant dense<0.000000e+00> : vector<64xf32>
    %9 = vector.multi_reduction <add>, %8, %cst_8 [1] : vector<64x1024xf32> to vector<64xf32>
    %10 = vector.shape_cast %9 : vector<64xf32> to vector<64x1xf32>
    %cst_9 = arith.constant 1.024000e+03 : f32
    %11 = vector.broadcast %cst_9 : f32 to vector<64x1xf32>
    %12 = arith.divf %10, %11 : vector<64x1xf32>
    %c0_10 = arith.constant 0 : index
    %c0_11 = arith.constant 0 : index
    %13 = vector.load %arg4[%c0_10, %c0_11] : memref<4x64xf32, #tpu.memory_space<vmem>>, vector<4x64xf32>
    %cst_12 = arith.constant dense<0.000000e+00> : vector<4x1xf32>
    %14 = tpu.matmul %13, %12, %cst_12 {dimension_numbers = #tpu.dot_dimension_numbers<[1], [0], [0], [1], [0, 0, 1, 1], [], []>} : vector<4x64xf32>, vector<64x1xf32>, vector<4x1xf32> -> vector<4x1xf32>
    %cst_13 = arith.constant 0.000000e+00 : f32
    %15 = vector.broadcast %cst_13 : f32 to vector<4x1xf32>
    %16 = arith.subf %15, %14 : vector<4x1xf32>
    %17 = math.exp %16 : vector<4x1xf32>
    %cst_14 = arith.constant 1.000000e+00 : f32
    %18 = vector.broadcast %cst_14 : f32 to vector<4x1xf32>
    %19 = arith.addf %18, %17 : vector<4x1xf32>
    %cst_15 = arith.constant 1.000000e+00 : f32
    %20 = vector.broadcast %cst_15 : f32 to vector<4x1xf32>
    %21 = arith.divf %20, %19 : vector<4x1xf32>
    %22 = vector.extract_strided_slice %21 {offsets = [0, 0], sizes = [1, 1], strides = [1, 1]} : vector<4x1xf32> to vector<1x1xf32>
    %cst_16 = arith.constant 2.000000e+00 : f32
    %23 = vector.broadcast %cst_16 : f32 to vector<1x1xf32>
    %24 = arith.mulf %22, %23 : vector<1x1xf32>
    %cst_17 = arith.constant 1.000000e+00 : f32
    %25 = vector.broadcast %cst_17 : f32 to vector<1x1xf32>
    %26 = arith.subf %24, %25 : vector<1x1xf32>
    %27 = vector.extract_strided_slice %21 {offsets = [1, 0], sizes = [1, 1], strides = [1, 1]} : vector<4x1xf32> to vector<1x1xf32>
    %cst_18 = arith.constant 2.000000e+00 : f32
    %28 = vector.broadcast %cst_18 : f32 to vector<1x1xf32>
    %29 = arith.mulf %27, %28 : vector<1x1xf32>
    %cst_19 = arith.constant 1.000000e+00 : f32
    %30 = vector.broadcast %cst_19 : f32 to vector<1x1xf32>
    %31 = arith.subf %29, %30 : vector<1x1xf32>
    %32 = vector.extract_strided_slice %21 {offsets = [2, 0], sizes = [1, 1], strides = [1, 1]} : vector<4x1xf32> to vector<1x1xf32>
    %cst_20 = arith.constant 1.000000e+00 : f32
    %33 = vector.broadcast %cst_20 : f32 to vector<1x1xf32>
    %34 = arith.divf %33, %32 : vector<1x1xf32>
    %c0_21 = arith.constant 0 : index
    %c0_22 = arith.constant 0 : index
    %35 = vector.load %arg16[%c0_21, %c0_22] : memref<160x1024xf32, #tpu.memory_space<vmem>>, vector<128x1024xf32>
    %c0_23 = arith.constant 0 : index
    %c0_24 = arith.constant 0 : index
    %36 = vector.load %arg13[%c0_23, %c0_24] : memref<128x4xf32, #tpu.memory_space<vmem>>, vector<128x4xf32>
    %cst_25 = arith.constant dense<0.000000e+00> : vector<128x1024xf32>
    %37 = tpu.matmul %36, %1, %cst_25 {dimension_numbers = #tpu.dot_dimension_numbers<[1], [0], [0], [1], [0, 0, 1, 1], [], []>} : vector<128x4xf32>, vector<4x1024xf32>, vector<128x1024xf32> -> vector<128x1024xf32>
    %38 = arith.mulf %37, %35 : vector<128x1024xf32>
    %c0_26 = arith.constant 0 : index
    %c0_27 = arith.constant 0 : index
    %39 = vector.load %arg14[%c0_26, %c0_27] : memref<1024x32xf32, #tpu.memory_space<vmem>>, vector<1024x32xf32>
    %cst_28 = arith.constant dense<0.000000e+00> : vector<128x32xf32>
    %40 = tpu.matmul %38, %39, %cst_28 {dimension_numbers = #tpu.dot_dimension_numbers<[1], [0], [0], [1], [0, 0, 1, 1], [], []>} : vector<128x1024xf32>, vector<1024x32xf32>, vector<128x32xf32> -> vector<128x32xf32>
    %c0_29 = arith.constant 0 : index
    %c0_30 = arith.constant 0 : index
    %41 = vector.load %arg9[%c0_29, %c0_30] : memref<1x32xf32, #tpu.memory_space<vmem>>, vector<1x32xf32>
    %42 = vector.broadcast %26 : vector<1x1xf32> to vector<1x32xf32>
    %43 = arith.subf %41, %42 : vector<1x32xf32>
    %44 = vector.broadcast %34 : vector<1x1xf32> to vector<1x32xf32>
    %45 = arith.mulf %43, %44 : vector<1x32xf32>
    %cst_31 = arith.constant 1.000000e+00 : f32
    %46 = vector.broadcast %cst_31 : f32 to vector<1x32xf32>
    %47 = arith.addf %45, %46 : vector<1x32xf32>
    %cst_32 = arith.constant 1.550000e+01 : f32
    %48 = vector.broadcast %cst_32 : f32 to vector<1x32xf32>
    %49 = arith.mulf %47, %48 : vector<1x32xf32>
    %c0_33 = arith.constant 0 : index
    %c0_34 = arith.constant 0 : index
    %50 = vector.load %arg10[%c0_33, %c0_34] : memref<32x1xf32, #tpu.memory_space<vmem>>, vector<32x1xf32>
    %51 = vector.broadcast %49 : vector<1x32xf32> to vector<32x32xf32>
    %52 = vector.broadcast %50 : vector<32x1xf32> to vector<32x32xf32>
    %53 = arith.subf %51, %52 : vector<32x32xf32>
    %54 = math.absf %53 : vector<32x32xf32>
    %cst_35 = arith.constant 1.000000e+00 : f32
    %55 = vector.broadcast %cst_35 : f32 to vector<32x32xf32>
    %56 = arith.subf %55, %54 : vector<32x32xf32>
    %cst_36 = arith.constant 0.000000e+00 : f32
    %57 = vector.broadcast %cst_36 : f32 to vector<32x32xf32>
    %58 = arith.maximumf %57, %56 : vector<32x32xf32>
    %c0_37 = arith.constant 0 : index
    %c0_38 = arith.constant 0 : index
    %59 = vector.load %arg11[%c0_37, %c0_38] : memref<128x1xf32, #tpu.memory_space<vmem>>, vector<128x1xf32>
    %60 = vector.broadcast %31 : vector<1x1xf32> to vector<128x1xf32>
    %61 = arith.subf %59, %60 : vector<128x1xf32>
    %62 = vector.broadcast %34 : vector<1x1xf32> to vector<128x1xf32>
    %63 = arith.mulf %61, %62 : vector<128x1xf32>
    %cst_39 = arith.constant 1.000000e+00 : f32
    %64 = vector.broadcast %cst_39 : f32 to vector<128x1xf32>
    %65 = arith.addf %63, %64 : vector<128x1xf32>
    %cst_40 = arith.constant 1.550000e+01 : f32
    %66 = vector.broadcast %cst_40 : f32 to vector<128x1xf32>
    %67 = arith.mulf %65, %66 : vector<128x1xf32>
    %c0_41 = arith.constant 0 : index
    %c0_42 = arith.constant 0 : index
    %68 = vector.load %arg12[%c0_41, %c0_42] : memref<128x128xf32, #tpu.memory_space<vmem>>, vector<128x128xf32>
    %69 = vector.broadcast %67 : vector<128x1xf32> to vector<128x128xf32>
    %70 = arith.subf %69, %68 : vector<128x128xf32>
    %71 = math.absf %70 : vector<128x128xf32>
    %cst_43 = arith.constant 1.000000e+00 : f32
    %72 = vector.broadcast %cst_43 : f32 to vector<128x128xf32>
    %73 = arith.subf %72, %71 : vector<128x128xf32>
    %cst_44 = arith.constant 0.000000e+00 : f32
    %74 = vector.broadcast %cst_44 : f32 to vector<128x128xf32>
    %75 = arith.maximumf %74, %73 : vector<128x128xf32>
    %cst_45 = arith.constant dense<0.000000e+00> : vector<128x32xf32>
    %76 = tpu.matmul %40, %58, %cst_45 {dimension_numbers = #tpu.dot_dimension_numbers<[1], [0], [0], [1], [0, 0, 1, 1], [], []>} : vector<128x32xf32>, vector<32x32xf32>, vector<128x32xf32> -> vector<128x32xf32>
    %cst_46 = arith.constant dense<0.000000e+00> : vector<128x32xf32>
    %77 = tpu.matmul %75, %76, %cst_46 {dimension_numbers = #tpu.dot_dimension_numbers<[1], [0], [0], [1], [0, 0, 1, 1], [], []>} : vector<128x128xf32>, vector<128x32xf32>, vector<128x32xf32> -> vector<128x32xf32>
    %78 = vector.extract_strided_slice %77 {offsets = [96, 0], sizes = [32, 32], strides = [1, 1]} : vector<128x32xf32> to vector<32x32xf32>
    %c0_47 = arith.constant 0 : index
    %c0_48 = arith.constant 0 : index
    %79 = vector.load %arg5[%c0_47, %c0_48] : memref<32x32xf32, #tpu.memory_space<vmem>>, vector<32x32xf32>
    %cst_49 = arith.constant dense<0.000000e+00> : vector<32x32xf32>
    %80 = tpu.matmul %79, %78, %cst_49 {dimension_numbers = #tpu.dot_dimension_numbers<[1], [0], [0], [1], [0, 0, 1, 1], [], []>} : vector<32x32xf32>, vector<32x32xf32>, vector<32x32xf32> -> vector<32x32xf32>
    %c0_50 = arith.constant 0 : index
    %c0_51 = arith.constant 0 : index
    %81 = vector.load %arg6[%c0_50, %c0_51] : memref<32x32xf32, #tpu.memory_space<vmem>>, vector<32x32xf32>
    %cst_52 = arith.constant dense<0.000000e+00> : vector<32x32xf32>
    %82 = tpu.matmul %80, %81, %cst_52 {dimension_numbers = #tpu.dot_dimension_numbers<[1], [0], [0], [1], [0, 0, 1, 1], [], []>} : vector<32x32xf32>, vector<32x32xf32>, vector<32x32xf32> -> vector<32x32xf32>
    %83 = tpu.concatenate %77, %82 in 0 : vector<128x32xf32>, vector<32x32xf32> -> vector<160x32xf32>
    %c0_53 = arith.constant 0 : index
    %c0_54 = arith.constant 0 : index
    %84 = vector.load %arg15[%c0_53, %c0_54] : memref<32x1024xf32, #tpu.memory_space<vmem>>, vector<32x1024xf32>
    %cst_55 = arith.constant dense<0.000000e+00> : vector<160x1024xf32>
    %85 = tpu.matmul %83, %84, %cst_55 {dimension_numbers = #tpu.dot_dimension_numbers<[1], [0], [0], [1], [0, 0, 1, 1], [], []>} : vector<160x32xf32>, vector<32x1024xf32>, vector<160x1024xf32> -> vector<160x1024xf32>
    %c0_56 = arith.constant 0 : index
    %c0_57 = arith.constant 0 : index
    %86 = vector.load %arg16[%c0_56, %c0_57] : memref<160x1024xf32, #tpu.memory_space<vmem>>, vector<160x1024xf32>
    %87 = arith.mulf %85, %86 : vector<160x1024xf32>
    %c0_58 = arith.constant 0 : index
    %c0_59 = arith.constant 0 : index
    %88 = vector.load %arg17[%c0_58, %c0_59] : memref<5x160xf32, #tpu.memory_space<vmem>>, vector<5x160xf32>
    %cst_60 = arith.constant dense<0.000000e+00> : vector<5x1024xf32>
    %89 = tpu.matmul %88, %87, %cst_60 {dimension_numbers = #tpu.dot_dimension_numbers<[1], [0], [0], [1], [0, 0, 1, 1], [], []>} : vector<5x160xf32>, vector<160x1024xf32>, vector<5x1024xf32> -> vector<5x1024xf32>
    %90 = vector.extract_strided_slice %89 {offsets = [0, 0], sizes = [3, 1024], strides = [1, 1]} : vector<5x1024xf32> to vector<3x1024xf32>
    %91 = vector.extract_strided_slice %89 {offsets = [3, 0], sizes = [1, 1024], strides = [1, 1]} : vector<5x1024xf32> to vector<1x1024xf32>
    %92 = vector.extract_strided_slice %89 {offsets = [4, 0], sizes = [1, 1024], strides = [1, 1]} : vector<5x1024xf32> to vector<1x1024xf32>
    %93 = vector.broadcast %92 : vector<1x1024xf32> to vector<3x1024xf32>
    %94 = arith.mulf %90, %93 : vector<3x1024xf32>
    %cst_61 = arith.constant 1.000000e+00 : f32
    %95 = vector.broadcast %cst_61 : f32 to vector<1x1024xf32>
    %96 = arith.subf %95, %92 : vector<1x1024xf32>
    %97 = vector.broadcast %96 : vector<1x1024xf32> to vector<3x1024xf32>
    %98 = arith.mulf %97, %3 : vector<3x1024xf32>
    %99 = arith.addf %94, %98 : vector<3x1024xf32>
    %100 = tpu.concatenate %99, %91 in 0 : vector<3x1024xf32>, vector<1x1024xf32> -> vector<4x1024xf32>
    %c0_62 = arith.constant 0 : index
    %c0_63 = arith.constant 0 : index
    %c0_64 = arith.constant 0 : index
    %101 = vector.load %arg18[%c0_62, %c0_63, %c0_64] : memref<1x4x1024xf32, #tpu.memory_space<vmem>>, vector<1x4x1024xf32>
    %102 = vector.shape_cast %101 : vector<1x4x1024xf32> to vector<4x1024xf32>
    %103 = vector.shape_cast %100 : vector<4x1024xf32> to vector<1x4x1024xf32>
    tpu.vector_store %arg18[%c0_62, %c0_63, %c0_64], %103 {strides = array<i32>} : memref<1x4x1024xf32, #tpu.memory_space<vmem>>, vector<1x4x1024xf32>,
    %c0_65 = arith.constant 0 : index
    %c0_66 = arith.constant 0 : index
    %104 = vector.load %arg7[%c0_65, %c0_66] : memref<32x4xf32, #tpu.memory_space<vmem>>, vector<32x4xf32>
    %cst_67 = arith.constant dense<0.000000e+00> : vector<32x1024xf32>
    %105 = tpu.matmul %104, %100, %cst_67 {dimension_numbers = #tpu.dot_dimension_numbers<[1], [0], [0], [1], [0, 0, 1, 1], [], []>} : vector<32x4xf32>, vector<4x1024xf32>, vector<32x1024xf32> -> vector<32x1024xf32>
    %cst_68 = arith.constant 0.000000e+00 : f32
    %106 = vector.broadcast %cst_68 : f32 to vector<32x1024xf32>
    %107 = arith.maximumf %105, %106 : vector<32x1024xf32>
    %cst_69 = arith.constant dense<0.000000e+00> : vector<32xf32>
    %108 = vector.multi_reduction <add>, %107, %cst_69 [1] : vector<32x1024xf32> to vector<32xf32>
    %109 = vector.shape_cast %108 : vector<32xf32> to vector<32x1xf32>
    %cst_70 = arith.constant 1.024000e+03 : f32
    %110 = vector.broadcast %cst_70 : f32 to vector<32x1xf32>
    %111 = arith.divf %109, %110 : vector<32x1xf32>
    %c0_71 = arith.constant 0 : index
    %c0_72 = arith.constant 0 : index
    %112 = vector.load %arg8[%c0_71, %c0_72] : memref<2x32xf32, #tpu.memory_space<vmem>>, vector<2x32xf32>
    %cst_73 = arith.constant dense<0.000000e+00> : vector<2x1xf32>
    %113 = tpu.matmul %112, %111, %cst_73 {dimension_numbers = #tpu.dot_dimension_numbers<[1], [0], [0], [1], [0, 0, 1, 1], [], []>} : vector<2x32xf32>, vector<32x1xf32>, vector<2x1xf32> -> vector<2x1xf32>
    %cst_74 = arith.constant dense<0xFF800000> : vector<1xf32>
    %114 = vector.multi_reduction <maximumf>, %113, %cst_74 [0] : vector<2x1xf32> to vector<1xf32>
    %115 = vector.shape_cast %114 : vector<1xf32> to vector<1x1xf32>
    %116 = vector.broadcast %115 : vector<1x1xf32> to vector<2x1xf32>
    %117 = arith.subf %113, %116 : vector<2x1xf32>
    %118 = math.exp %117 : vector<2x1xf32>
    %cst_75 = arith.constant dense<0.000000e+00> : vector<1xf32>
    %119 = vector.multi_reduction <add>, %118, %cst_75 [0] : vector<2x1xf32> to vector<1xf32>
    %120 = vector.shape_cast %119 : vector<1xf32> to vector<1x1xf32>
    %121 = vector.broadcast %120 : vector<1x1xf32> to vector<2x1xf32>
    %122 = arith.divf %118, %121 : vector<2x1xf32>
    %c0_76 = arith.constant 0 : index
    %c0_77 = arith.constant 0 : index
    %c0_78 = arith.constant 0 : index
    %123 = vector.load %arg19[%c0_76, %c0_77, %c0_78] : memref<1x2x1xf32, #tpu.memory_space<vmem>>, vector<1x2x1xf32>
    %124 = vector.shape_cast %123 : vector<1x2x1xf32> to vector<2x1xf32>
    %125 = vector.shape_cast %113 : vector<2x1xf32> to vector<1x2x1xf32>
    tpu.vector_store %arg19[%c0_76, %c0_77, %c0_78], %125 {strides = array<i32>} : memref<1x2x1xf32, #tpu.memory_space<vmem>>, vector<1x2x1xf32>,
    %126 = vector.extract_strided_slice %122 {offsets = [0, 0], sizes = [1, 1], strides = [1, 1]} : vector<2x1xf32> to vector<1x1xf32>
    %c0_79 = arith.constant 0 : index
    %c0_80 = arith.constant 0 : index
    %c0_81 = arith.constant 0 : index
    %127 = vector.load %arg20[%c0_79, %c0_80, %c0_81] : memref<1x1x1xf32, #tpu.memory_space<vmem>>, vector<1x1x1xf32>
    %128 = vector.shape_cast %127 : vector<1x1x1xf32> to vector<1x1xf32>
    %129 = vector.shape_cast %126 : vector<1x1xf32> to vector<1x1x1xf32>
    tpu.vector_store %arg20[%c0_79, %c0_80, %c0_81], %129 {strides = array<i32>} : memref<1x1x1xf32, #tpu.memory_space<vmem>>, vector<1x1x1xf32>,
    return
  }
  func.func @transform_0(%arg0: i32) -> (i32, i32, i32) {
    %c0_i32 = arith.constant 0 : i32
    %c0_i32_0 = arith.constant 0 : i32
    %c0_i32_1 = arith.constant 0 : i32
    return %arg0, %c0_i32, %c0_i32_0 : i32, i32, i32
  }
  func.func @transform_1(%arg0: i32) -> (i32, i32, i32) {
    %c0_i32 = arith.constant 0 : i32
    %c0_i32_0 = arith.constant 0 : i32
    %c0_i32_1 = arith.constant 0 : i32
    return %arg0, %c0_i32, %c0_i32_0 : i32, i32, i32
  }
  func.func @transform_2(%arg0: i32) -> (i32, i32) {
    %c0_i32 = arith.constant 0 : i32
    %c0_i32_0 = arith.constant 0 : i32
    %c0_i32_1 = arith.constant 0 : i32
    return %c0_i32, %c0_i32_0 : i32, i32
  }
  func.func @transform_3(%arg0: i32) -> (i32, i32) {
    %c0_i32 = arith.constant 0 : i32
    %c0_i32_0 = arith.constant 0 : i32
    %c0_i32_1 = arith.constant 0 : i32
    return %c0_i32, %c0_i32_0 : i32, i32
  }
  func.func @transform_4(%arg0: i32) -> (i32, i32) {
    %c0_i32 = arith.constant 0 : i32
    %c0_i32_0 = arith.constant 0 : i32
    %c0_i32_1 = arith.constant 0 : i32
    return %c0_i32, %c0_i32_0 : i32, i32
  }
  func.func @transform_5(%arg0: i32) -> (i32, i32) {
    %c0_i32 = arith.constant 0 : i32
    %c0_i32_0 = arith.constant 0 : i32
    %c0_i32_1 = arith.constant 0 : i32
    return %c0_i32, %c0_i32_0 : i32, i32
  }
  func.func @transform_6(%arg0: i32) -> (i32, i32) {
    %c0_i32 = arith.constant 0 : i32
    %c0_i32_0 = arith.constant 0 : i32
    %c0_i32_1 = arith.constant 0 : i32
    return %c0_i32, %c0_i32_0 : i32, i32
  }
  func.func @transform_7(%arg0: i32) -> (i32, i32) {
    %c0_i32 = arith.constant 0 : i32
    %c0_i32_0 = arith.constant 0 : i32
    %c0_i32_1 = arith.constant 0 : i32
    return %c0_i32, %c0_i32_0 : i32, i32
  }
  func.func @transform_8(%arg0: i32) -> (i32, i32) {
    %c0_i32 = arith.constant 0 : i32
    %c0_i32_0 = arith.constant 0 : i32
    %c0_i32_1 = arith.constant 0 : i32
    return %c0_i32, %c0_i32_0 : i32, i32
  }
  func.func @transform_9(%arg0: i32) -> (i32, i32) {
    %c0_i32 = arith.constant 0 : i32
    %c0_i32_0 = arith.constant 0 : i32
    %c0_i32_1 = arith.constant 0 : i32
    return %c0_i32, %c0_i32_0 : i32, i32
  }
  func.func @transform_10(%arg0: i32) -> (i32, i32) {
    %c0_i32 = arith.constant 0 : i32
    %c0_i32_0 = arith.constant 0 : i32
    %c0_i32_1 = arith.constant 0 : i32
    return %c0_i32, %c0_i32_0 : i32, i32
  }
  func.func @transform_11(%arg0: i32) -> (i32, i32) {
    %c0_i32 = arith.constant 0 : i32
    %c0_i32_0 = arith.constant 0 : i32
    %c0_i32_1 = arith.constant 0 : i32
    return %c0_i32, %c0_i32_0 : i32, i32
  }
  func.func @transform_12(%arg0: i32) -> (i32, i32) {
    %c0_i32 = arith.constant 0 : i32
    %c0_i32_0 = arith.constant 0 : i32
    %c0_i32_1 = arith.constant 0 : i32
    return %c0_i32, %c0_i32_0 : i32, i32
  }
  func.func @transform_13(%arg0: i32) -> (i32, i32) {
    %c0_i32 = arith.constant 0 : i32
    %c0_i32_0 = arith.constant 0 : i32
    %c0_i32_1 = arith.constant 0 : i32
    return %c0_i32, %c0_i32_0 : i32, i32
  }
  func.func @transform_14(%arg0: i32) -> (i32, i32) {
    %c0_i32 = arith.constant 0 : i32
    %c0_i32_0 = arith.constant 0 : i32
    %c0_i32_1 = arith.constant 0 : i32
    return %c0_i32, %c0_i32_0 : i32, i32
  }
  func.func @transform_15(%arg0: i32) -> (i32, i32) {
    %c0_i32 = arith.constant 0 : i32
    %c0_i32_0 = arith.constant 0 : i32
    %c0_i32_1 = arith.constant 0 : i32
    return %c0_i32, %c0_i32_0 : i32, i32
  }
  func.func @transform_16(%arg0: i32) -> (i32, i32) {
    %c0_i32 = arith.constant 0 : i32
    %c0_i32_0 = arith.constant 0 : i32
    %c0_i32_1 = arith.constant 0 : i32
    return %c0_i32, %c0_i32_0 : i32, i32
  }
  func.func @transform_17(%arg0: i32) -> (i32, i32, i32) {
    %c0_i32 = arith.constant 0 : i32
    %c0_i32_0 = arith.constant 0 : i32
    %c0_i32_1 = arith.constant 0 : i32
    return %arg0, %c0_i32, %c0_i32_0 : i32, i32, i32
  }
  func.func @transform_18(%arg0: i32) -> (i32, i32, i32) {
    %c0_i32 = arith.constant 0 : i32
    %c0_i32_0 = arith.constant 0 : i32
    %c0_i32_1 = arith.constant 0 : i32
    return %arg0, %c0_i32, %c0_i32_0 : i32, i32, i32
  }
  func.func @transform_19(%arg0: i32) -> (i32, i32, i32) {
    %c0_i32 = arith.constant 0 : i32
    %c0_i32_0 = arith.constant 0 : i32
    %c0_i32_1 = arith.constant 0 : i32
    return %arg0, %c0_i32, %c0_i32_0 : i32, i32, i32
  }
}

</mosaic_0001>

<bundles_post_ra>
// kernel: object_place_net_fb_composite_forward.1
= control target key start
LH: loop header
LB: loop body
LE: loop exit
PB: predicated region body
PF: predicated region fallthrough
CT: control target
= control target key end

     0   :  { %s10390_s0 = inlined_call_operand.vmem [shape: f32[2,4,1024], index: 0, kind: input, shape index: {}]   ;;  %s10391_s1 = inlined_call_operand.vmem [shape: f32[2,3,1024], index: 1, kind: input, shape index: {}]   ;;  %s10392_s2 = inlined_call_operand.vmem [shape: f32[64,7], index: 2, kind: input, shape index: {}]   ;;  %s10393_s3 = inlined_call_operand.vmem [shape: f32[4,64], index: 3, kind: input, shape index: {}]   ;;  %s10394_s4 = inlined_call_operand.vmem [shape: f32[32,32], index: 4, kind: input, shape index: {}]   ;;  %s10395_s5 = inlined_call_operand.vmem [shape: f32[32,32], index: 5, kind: input, shape index: {}]   ;;  %s10396_s6 = inlined_call_operand.vmem [shape: f32[32,4], index: 6, kind: input, shape index: {}]   ;;  %s10397_s7 = inlined_call_operand.vmem [shape: f32[2,32], index: 7, kind: input, shape index: {}]   ;;  %s10398_s8 = inlined_call_operand.vmem [shape: f32[1,32], index: 8, kind: input, shape index: {}]   ;;  %s10399_s9 = inlined_call_operand.vmem [shape: f32[32,1], index: 9, kind: input, shape index: {}]   ;;  %s10400_s10 = inlined_call_operand.vmem [shape: f32[128,1], index: 10, kind: input, shape index: {}]   ;;  %s10401_s11 = inlined_call_operand.vmem [shape: f32[128,128], index: 11, kind: input, shape index: {}]   ;;  %s10402_s12 = inlined_call_operand.vmem [shape: f32[128,4], index: 12, kind: input, shape index: {}]   ;;  %s10403_s13 = inlined_call_operand.vmem [shape: f32[1024,32], index: 13, kind: input, shape index: {}]   ;;  %s10404_s14 = inlined_call_operand.vmem [shape: f32[32,1024], index: 14, kind: input, shape index: {}]   ;;  %s10405_s15 = inlined_call_operand.vmem [shape: f32[160,1024], index: 15, kind: input, shape index: {}]   ;;  %s10406_s16 = inlined_call_operand.vmem [shape: f32[5,160], index: 16, kind: input, shape index: {}]   ;;  %s10407_s17 = inlined_call_operand.vmem [shape: f32[2,4,1024], index: 17, kind: output, shape index: {0}]   ;;  %s10408_s18 = inlined_call_operand.vmem [shape: f32[2,2,1], index: 18, kind: output, shape index: {1}]   ;;  %s10409_s19 = inlined_call_operand.vmem [shape: f32[2,1,1], index: 19, kind: output, shape index: {2}]  }
   0x1   :  { %10421 = sst [smem:[#allocation6_spill]] %s10390_s0  ;;  %s7588_s0 = smov 0  }
   0x2   :  { %10422 = sst [smem:[#allocation7_spill]] %s10391_s1 }
   0x3   :  { %10423 = sst [smem:[#allocation8_spill]] %s10392_s2 }
   0x4   :  { %10424 = sst [smem:[#allocation9_spill]] %s10393_s3 }
   0x5   :  { %10425 = sst [smem:[#allocation10_spill]] %s10394_s4 }
   0x6 LB: > { %s6220_s30 = sadd.s32 4294967295, %s7482_s0   ;;  %p6224_p0 = scmp.ge.s32.totalorder %s7482_s0, 1  ;;  %s7482_s0 = sphi %s7588_s0, %s30_s0  }
   0x7   : > { %p552_p1 = scmp.lt.s32.totalorder %s7482_s0, 3 }
   0x9   : > { %p553_p2 = pnand %p6224_p0, %p552_p1 }
   0xb   : > { %556 = sbr.rel (%p553_p2) target bundleno = 3104 (0xc20), region = 88 }
  0x12   : > { %p620_p3 = scmp.lt.s32.totalorder %s6220_s30, 1  ;;  %v7484_v0 = vmov 0.0   ;;  %s10426_s22 = sld [smem:[#allocation6_spill]]  ;;  %vm674_vm0 = vcmask 1043456   ;;  %vm716_vm1 = vcmask 1046528   ;;  %vm691_vm2 = vcmask 56320  }
  0x13   : > { %805 = vmatprep.mubr.f32.mxu0 %v7484_v0  ;;  %918 = vmatprep.mubr.f32.mxu1 %v7484_v0  ;;  %s10427_s25 = sld [smem:[#allocation7_spill]]  ;;  %s10428_s28 = sld [smem:[#allocation8_spill]]  ;;  %v7757_v33 = vld [vmem:[%s10402_s12] sm:$0xff]  ;;  %vm1567_vm3 = vcmask 31744   ;;  %v7765_v34 = vld [vmem:[%s10402_s12 + $0x8] sm:$0xff]  ;;  %v7775_v35 = vld [vmem:[%s10402_s12 + $0x10] sm:$0xff] }
  0x14   : > { %s10456_s30 = smov (!%p620_p3, %s6220_s30), 1  ;;  %v7783_v36 = vld [vmem:[%s10402_s12 + $0x18] sm:$0xff]  ;;  %v7791_v37 = vld [vmem:[%s10402_s12 + $0x20] sm:$0xff]  ;;  %v7799_v38 = vld [vmem:[%s10402_s12 + $0x28] sm:$0xff]  ;;  %vm7486_vm4 = vmmov 0   ;;  %vm1339_vm5 = vcmask 523264  }
  0x15   : > { %s7601_s20 = sshll.u32 %s10456_s30, 5  ;;  %vm3425_vm6 = vcmask 261120   ;;  %s10431_s4 = sld [smem:[#allocation10_spill]]  ;;  %vm5511_vm7 = vcmask 1042432   ;;  %vm6074_vm8 = vcmask 1024   ;;  %vm6095_vm9 = vcmask 0  }
  0x18   : > { %s624_s2 = scalar_lea.vmem %s10426_s22, %s7601_s20 }
  0x19   : > { %s7611_s3 = scalar_lea.vmem %s10427_s25, %s7601_s20  ;;  %v7613_v1 = vld [vmem:[%s624_s2] sm:$0xff]  ;;  %v7616_v3 = vld [vmem:[%s624_s2 + $0x8] sm:$0xff]  ;;  %v7625_v8 = vld [vmem:[%s624_s2 + $0x10] sm:$0xff] }
  0x1a   : > { %v646_v2 = vld [vmem:[%s7611_s3] sm:$0x77]  ;;  %v654_v4 = vcombine.high %v7613_v1, %v7613_v1  ;;  %v647_v6 = vld [vmem:[%s7611_s3 + $0x8] sm:$0x77]  ;;  %v7623_v7 = vcombine.high %v7616_v3, %v7616_v3  ;;  %v648_v9 = vld [vmem:[%s7611_s3 + $0x10] sm:$0x77]  ;;  %v7630_v11 = vcombine.high %v7625_v8, %v7625_v8 }
  0x1b   : > { %v666_v5 = vcombine.low %v646_v2, %v646_v2  ;;  %v667_v10 = vcombine.low %v647_v6, %v647_v6  ;;  %v7632_v12 = vld [vmem:[%s624_s2 + $0x18] sm:$0xff]  ;;  %v683_v16 = vld [vmem:[%s10428_s28] sm:$0xff]  ;;  %v668_v18 = vcombine.low %v648_v9, %v648_v9  ;;  %v684_v25 = vld [vmem:[%s10428_s28 + $0x8] sm:$0xff] }
  0x1c   : > { %v649_v13 = vld [vmem:[%s7611_s3 + $0x18] sm:$0x77]  ;;  %v676_v14 = vsel %vm674_vm0, %v654_v4, %v646_v2  ;;  %v678_v17 = vsel %vm674_vm0, %v7623_v7, %v647_v6  ;;  %v7649_v20 = vcombine.high %v7632_v12, %v7632_v12  ;;  %v680_v21 = vsel %vm674_vm0, %v7630_v11, %v648_v9  ;;  %v685_v27 = vld [vmem:[%s10428_s28 + $0x10] sm:$0xff]  ;;  %v687_v29 = vld [vmem:[%s10428_s28 + $0x20] sm:$0xff] }
  0x1d   : > { %v675_v15 = vsel %vm674_vm0, %v7613_v1, %v666_v5  ;;  %6232 = vmatprep.subr.msk.mxu0 %vm716_vm1, %v676_v14  ;;  %6242 = vmatprep.subr.msk.mxu1 %vm716_vm1, %v678_v17  ;;  %v677_v19 = vsel %vm674_vm0, %v7616_v3, %v667_v10  ;;  %v669_v22 = vcombine.low %v649_v13, %v649_v13  ;;  %v686_v28 = vld [vmem:[%s10428_s28 + $0x18] sm:$0xff]  ;;  %v688_v30 = vld [vmem:[%s10428_s28 + $0x28] sm:$0xff]  ;;  %v689_v31 = vld [vmem:[%s10428_s28 + $0x30] sm:$0xff] }
  0x1e   : > { %6233 = vmatpush1.msk.msra.mxu0 %vm716_vm1, %v675_v15  ;;  %6243 = vmatpush1.msk.msra.mxu1 %vm716_vm1, %v677_v19  ;;  %v679_v23 = vsel %vm674_vm0, %v7625_v8, %v668_v18  ;;  %v682_v24 = vsel %vm674_vm0, %v7649_v20, %v649_v13  ;;  %v690_v32 = vld [vmem:[%s10428_s28 + $0x38] sm:$0xff]  ;;  %s10429_s28 = sld [smem:[#allocation9_spill]] }
  0x1f   : > { %6234 = vmatmul.mubr.msk.f32.vlgmr.msra.gmra.mrb[0].mxu0 %vm691_vm2, %v683_v16  ;;  %6244 = vmatmul.mubr.msk.f32.vlgmr.msra.gmra.mrb[0].mxu1 %vm691_vm2, %v683_v16  ;;  %v681_v26 = vsel %vm674_vm0, %v7632_v12, %v669_v22 }
  0x20   : > { %811 = vmatprep.mubr.f32.mxu0 %v7484_v0  ;;  %924 = vmatprep.mubr.f32.mxu1 %v7484_v0 }
  0x21   : > { %6252 = vmatprep.subr.msk.mxu0 %vm716_vm1, %v680_v21  ;;  %6262 = vmatprep.subr.msk.mxu1 %vm716_vm1, %v682_v24 }
  0x22   : > { %6253 = vmatpush1.msk.msra.mxu0 %vm716_vm1, %v679_v23  ;;  %6263 = vmatpush1.msk.msra.mxu1 %vm716_vm1, %v681_v26 }
  0x23   : > { %6235 = vmatmul.mubr.msk.f32.gmra.mrb[2].mxu0 %vm691_vm2, %v684_v25  ;;  %6245 = vmatmul.mubr.msk.f32.gmra.mrb[2].mxu1 %vm691_vm2, %v684_v25 }
  0x24   : > { %817 = vmatprep.mubr.f32.mxu0 %v7484_v0  ;;  %930 = vmatprep.mubr.f32.mxu1 %v7484_v0 }
  0x25   : > { %6274 = vmatprep.subr.msk.mxu1 %vm674_vm0, %v654_v4 }
  0x27   : > { %6236 = vmatmul.mubr.msk.f32.gmra.mrb[4].mxu0 %vm691_vm2, %v685_v27  ;;  %6246 = vmatmul.mubr.msk.f32.gmra.mrb[4].mxu1 %vm691_vm2, %v685_v27 }
  0x28   : > { %823 = vmatprep.mubr.f32.mxu0 %v7484_v0  ;;  %936 = vmatprep.mubr.f32.mxu1 %v7484_v0 }
  0x2b   : > { %6237 = vmatmul.mubr.msk.f32.gmra.mrb[6].mxu0 %vm691_vm2, %v686_v28  ;;  %6247 = vmatmul.mubr.msk.f32.gmra.mrb[6].mxu1 %vm691_vm2, %v686_v28 }
  0x2c   : > { %829 = vmatprep.mubr.f32.mxu0 %v7484_v0  ;;  %942 = vmatprep.mubr.f32.mxu1 %v7484_v0 }
  0x2f   : > { %6238 = vmatmul.mubr.msk.f32.gmra.mrb[8].mxu0 %vm691_vm2, %v687_v29  ;;  %6248 = vmatmul.mubr.msk.f32.gmra.mrb[8].mxu1 %vm691_vm2, %v687_v29 }
  0x30   : > { %835 = vmatprep.mubr.f32.mxu0 %v7484_v0  ;;  %948 = vmatprep.mubr.f32.mxu1 %v7484_v0 }
  0x33   : > { %6239 = vmatmul.mubr.msk.f32.gmra.mrb[10].mxu0 %vm691_vm2, %v688_v30  ;;  %6249 = vmatmul.mubr.msk.f32.gmra.mrb[10].mxu1 %vm691_vm2, %v688_v30 }
  0x34   : > { %841 = vmatprep.mubr.f32.mxu0 %v7484_v0  ;;  %954 = vmatprep.mubr.f32.mxu1 %v7484_v0 }
  0x37   : > { %6240 = vmatmul.mubr.msk.f32.gmra.mrb[12].mxu0 %vm691_vm2, %v689_v31  ;;  %6250 = vmatmul.mubr.msk.f32.gmra.mrb[12].mxu1 %vm691_vm2, %v689_v31 }
  0x38   : > { %847 = vmatprep.mubr.f32.mxu0 %v7484_v0  ;;  %960 = vmatprep.mubr.f32.mxu1 %v7484_v0 }
  0x3b   : > { %6241 = vmatmul.mubr.msk.f32.gmra.mrb[14].mxu0 %vm691_vm2, %v690_v32  ;;  %6251 = vmatmul.mubr.msk.f32.gmra.mrb[14].mxu1 %vm691_vm2, %v690_v32 }
  0x3c   : > { %1031 = vmatprep.mubr.f32.mxu0 %v7484_v0  ;;  %1144 = vmatprep.mubr.f32.mxu1 %v7484_v0 }
  0x3f   : > { %6254 = vmatmul.mubr.msk.f32.vlgmr.msra.gmra.mrb[16].mxu0 %vm691_vm2, %v683_v16  ;;  %6264 = vmatmul.mubr.msk.f32.vlgmr.msra.gmra.mrb[16].mxu1 %vm691_vm2, %v683_v16 }
  0x40   : > { %1037 = vmatprep.mubr.f32.mxu0 %v7484_v0  ;;  %1150 = vmatprep.mubr.f32.mxu1 %v7484_v0 }
  0x41   : > { %6275 = vmatpush1.msk.msra.mxu1 %vm674_vm0, %v7613_v1 }
  0x42   : > { %6310 = vmatprep.subr.msk.mxu1 %vm674_vm0, %v7630_v11 }
  0x43   : > { %6255 = vmatmul.mubr.msk.f32.gmra.mrb[18].mxu0 %vm691_vm2, %v684_v25  ;;  %6265 = vmatmul.mubr.msk.f32.gmra.mrb[18].mxu1 %vm691_vm2, %v684_v25 }
  0x44   : > { %1043 = vmatprep.mubr.f32.mxu0 %v7484_v0  ;;  %1156 = vmatprep.mubr.f32.mxu1 %v7484_v0 }
  0x47   : > { %6256 = vmatmul.mubr.msk.f32.gmra.mrb[20].mxu0 %vm691_vm2, %v685_v27  ;;  %6266 = vmatmul.mubr.msk.f32.gmra.mrb[20].mxu1 %vm691_vm2, %v685_v27 }
  0x48   : > { %1049 = vmatprep.mubr.f32.mxu0 %v7484_v0  ;;  %1162 = vmatprep.mubr.f32.mxu1 %v7484_v0 }
  0x4b   : > { %6257 = vmatmul.mubr.msk.f32.gmra.mrb[22].mxu0 %vm691_vm2, %v686_v28  ;;  %6267 = vmatmul.mubr.msk.f32.gmra.mrb[22].mxu1 %vm691_vm2, %v686_v28 }
  0x4c   : > { %1055 = vmatprep.mubr.f32.mxu0 %v7484_v0  ;;  %1168 = vmatprep.mubr.f32.mxu1 %v7484_v0 }
  0x4f   : > { %6258 = vmatmul.mubr.msk.f32.gmra.mrb[24].mxu0 %vm691_vm2, %v687_v29  ;;  %6268 = vmatmul.mubr.msk.f32.gmra.mrb[24].mxu1 %vm691_vm2, %v687_v29 }
  0x50   : > { %1061 = vmatprep.mubr.f32.mxu0 %v7484_v0  ;;  %1174 = vmatprep.mubr.f32.mxu1 %v7484_v0 }
  0x53   : > { %6259 = vmatmul.mubr.msk.f32.gmra.mrb[26].mxu0 %vm691_vm2, %v688_v30  ;;  %6269 = vmatmul.mubr.msk.f32.gmra.mrb[26].mxu1 %vm691_vm2, %v688_v30 }
  0x54   : > { %1067 = vmatprep.mubr.f32.mxu0 %v7484_v0  ;;  %1180 = vmatprep.mubr.f32.mxu1 %v7484_v0 }
  0x57   : > { %6260 = vmatmul.mubr.msk.f32.gmra.mrb[28].mxu0 %vm691_vm2, %v689_v31  ;;  %6270 = vmatmul.mubr.msk.f32.gmra.mrb[28].mxu1 %vm691_vm2, %v689_v31 }
  0x58   : > { %1073 = vmatprep.mubr.f32.mxu0 %v7484_v0  ;;  %1186 = vmatprep.mubr.f32.mxu1 %v7484_v0 }
  0x5b   : > { %6261 = vmatmul.mubr.msk.f32.gmra.mrb[30].mxu0 %vm691_vm2, %v690_v32  ;;  %6271 = vmatmul.mubr.msk.f32.gmra.mrb[30].mxu1 %vm691_vm2, %v690_v32 }
  0x5c   : > { %1696 = vmatprep.mubr.f32.mxu1 %v7484_v0  ;;  %6902 = vmatprep.mubr.msk.f32.mxu0 %vm7486_vm4, %v7484_v0 }
  0x5f   : > { %6276 = vmatmul.mubr.msk.f32.vlgmr.msra.gmra.mrb[32].mxu1 %vm1567_vm3, %v7757_v33 }
  0x60   : > { %1702 = vmatprep.mubr.f32.mxu1 %v7484_v0  ;;  %6311 = vmatpush1.msk.msra.mxu1 %vm674_vm0, %v7625_v8 }
  0x63   : > { %6277 = vmatmul.mubr.msk.f32.gmra.mrb[34].mxu1 %vm1567_vm3, %v7765_v34 }
  0x64   : > { %1708 = vmatprep.mubr.f32.mxu1 %v7484_v0 }
  0x67   : > { %6278 = vmatmul.mubr.msk.f32.gmra.mrb[36].mxu1 %vm1567_vm3, %v7775_v35 }
  0x68   : > { %1714 = vmatprep.mubr.f32.mxu1 %v7484_v0 }
  0x6b   : > { %6279 = vmatmul.mubr.msk.f32.gmra.mrb[38].mxu1 %vm1567_vm3, %v7783_v36 }
  0x6c   : > { %1720 = vmatprep.mubr.f32.mxu1 %v7484_v0 }
  0x6f   : > { %6280 = vmatmul.mubr.msk.f32.gmra.mrb[40].mxu1 %vm1567_vm3, %v7791_v37 }
  0x70   : > { %1726 = vmatprep.mubr.f32.mxu1 %v7484_v0 }
  0x73   : > { %6281 = vmatmul.mubr.msk.f32.gmra.mrb[42].mxu1 %vm1567_vm3, %v7799_v38 }
  0x74   : > { %1732 = vmatprep.mubr.f32.mxu1 %v7484_v0 }
  0xf2   : > { %v807_v39 = vpop.f32.mrb[0].mxu0  ;;  %v920_v40 = vpop.f32.mrb[0].mxu1 }
  0xf3   : > { %v1193_v41 = vmax.f32 %v807_v39, 0.0  ;;  %v809_v42 = vpop.f32.mrb[1].mxu0  ;;  %v922_v43 = vpop.f32.mrb[1].mxu1  ;;  %v1195_v45 = vmax.f32 %v920_v40, 0.0 }
  0xf4   : > { %v1194_v44 = vmax.f32 %v809_v42, 0.0  ;;  %v1196_v48 = vmax.f32 %v922_v43, 0.0 }
  0xf6   : > { %v1257_v46 = vadd.f32 %v1194_v44, %v1193_v41  ;;  %v813_v47 = vpop.f32.mrb[2].mxu0  ;;  %v926_v49 = vpop.f32.mrb[2].mxu1 }
  0xf7   : > { %v1201_v50 = vmax.f32 %v813_v47, 0.0  ;;  %v815_v51 = vpop.f32.mrb[3].mxu0  ;;  %v928_v52 = vpop.f32.mrb[3].mxu1  ;;  %v1203_v55 = vmax.f32 %v926_v49, 0.0 }
  0xf8   : > { %v1258_v53 = vadd.f32 %v1257_v46, %v1195_v45  ;;  %v1202_v54 = vmax.f32 %v815_v51, 0.0  ;;  %v1204_v59 = vmax.f32 %v928_v52, 0.0 }
  0xfa   : > { %v7804_v56 = vadd.f32 %v1258_v53, %v1196_v48  ;;  %v1266_v57 = vadd.f32 %v1202_v54, %v1201_v50  ;;  %v819_v58 = vpop.f32.mrb[4].mxu0  ;;  %v932_v60 = vpop.f32.mrb[4].mxu1 }
  0xfb   : > { %v1209_v61 = vmax.f32 %v819_v58, 0.0  ;;  %v821_v62 = vpop.f32.mrb[5].mxu0  ;;  %v934_v63 = vpop.f32.mrb[5].mxu1  ;;  %v1211_v4 = vmax.f32 %v932_v60, 0.0 }
  0xfc   : > { %v1267_v1 = vadd.f32 %v1266_v57, %v1203_v55  ;;  %v1210_v2 = vmax.f32 %v821_v62, 0.0  ;;  %v1212_v9 = vmax.f32 %v934_v63, 0.0 }
  0xfe   : > { %v7806_v5 = vadd.f32 %v1267_v1, %v1204_v59  ;;  %v1275_v6 = vadd.f32 %v1210_v2, %v1209_v61  ;;  %v825_v8 = vpop.f32.mrb[6].mxu0  ;;  %v938_v10 = vpop.f32.mrb[6].mxu1 }
  0xff   : > { %v1217_v11 = vmax.f32 %v825_v8, 0.0  ;;  %v827_v13 = vpop.f32.mrb[7].mxu0  ;;  %v940_v14 = vpop.f32.mrb[7].mxu1  ;;  %v1219_v17 = vmax.f32 %v938_v10, 0.0 }
 0x100   : > { %v1276_v15 = vadd.f32 %v1275_v6, %v1211_v4  ;;  %v1218_v16 = vmax.f32 %v827_v13, 0.0  ;;  %v1220_v22 = vmax.f32 %v940_v14, 0.0 }
 0x102   : > { %v7808_v18 = vadd.f32 %v1276_v15, %v1212_v9  ;;  %v1284_v19 = vadd.f32 %v1218_v16, %v1217_v11  ;;  %v831_v21 = vpop.f32.mrb[8].mxu0  ;;  %v944_v23 = vpop.f32.mrb[8].mxu1 }
 0x103   : > { %v1225_v24 = vmax.f32 %v831_v21, 0.0  ;;  %v833_v25 = vpop.f32.mrb[9].mxu0  ;;  %v946_v26 = vpop.f32.mrb[9].mxu1  ;;  %v1227_v29 = vmax.f32 %v944_v23, 0.0 }
 0x104   : > { %v1285_v27 = vadd.f32 %v1284_v19, %v1219_v17  ;;  %v1226_v28 = vmax.f32 %v833_v25, 0.0  ;;  %v1228_v39 = vmax.f32 %v946_v26, 0.0 }
 0x106   : > { %v7810_v30 = vadd.f32 %v1285_v27, %v1220_v22  ;;  %v1293_v31 = vadd.f32 %v1226_v28, %v1225_v24  ;;  %v837_v32 = vpop.f32.mrb[10].mxu0  ;;  %v950_v40 = vpop.f32.mrb[10].mxu1 }
 0x107   : > { %v1233_v41 = vmax.f32 %v837_v32, 0.0  ;;  %v839_v42 = vpop.f32.mrb[11].mxu0  ;;  %v952_v43 = vpop.f32.mrb[11].mxu1  ;;  %v1235_v46 = vmax.f32 %v950_v40, 0.0 }
 0x108   : > { %v1294_v44 = vadd.f32 %v1293_v31, %v1227_v29  ;;  %v1234_v45 = vmax.f32 %v839_v42, 0.0  ;;  %v1236_v50 = vmax.f32 %v952_v43, 0.0 }
 0x10a   : > { %v7812_v47 = vadd.f32 %v1294_v44, %v1228_v39  ;;  %v1302_v48 = vadd.f32 %v1234_v45, %v1233_v41  ;;  %v843_v49 = vpop.f32.mrb[12].mxu0  ;;  %v956_v51 = vpop.f32.mrb[12].mxu1 }
 0x10b   : > { %v1241_v52 = vmax.f32 %v843_v49, 0.0  ;;  %v845_v53 = vpop.f32.mrb[13].mxu0  ;;  %v958_v54 = vpop.f32.mrb[13].mxu1  ;;  %v1243_v58 = vmax.f32 %v956_v51, 0.0 }
 0x10c   : > { %v1303_v55 = vadd.f32 %v1302_v48, %v1235_v46  ;;  %v1242_v57 = vmax.f32 %v845_v53, 0.0  ;;  %v1244_v61 = vmax.f32 %v958_v54, 0.0 }
 0x10e   : > { %v1311_v59 = vadd.f32 %v1242_v57, %v1241_v52  ;;  %v849_v60 = vpop.f32.mrb[14].mxu0  ;;  %v962_v62 = vpop.f32.mrb[14].mxu1  ;;  %v7814_v63 = vadd.f32 %v1303_v55, %v1236_v50 }
 0x10f   : > { %v1249_v1 = vmax.f32 %v849_v60, 0.0  ;;  %v851_v2 = vpop.f32.mrb[15].mxu0  ;;  %v964_v4 = vpop.f32.mrb[15].mxu1  ;;  %v1251_v9 = vmax.f32 %v962_v62, 0.0 }
 0x110   : > { %v1312_v6 = vadd.f32 %v1311_v59, %v1243_v58  ;;  %v1250_v8 = vmax.f32 %v851_v2, 0.0  ;;  %v1252_v11 = vmax.f32 %v964_v4, 0.0 }
 0x112   : > { %v1320_v10 = vadd.f32 %v1250_v8, %v1249_v1  ;;  %v1033_v13 = vpop.f32.mrb[16].mxu0  ;;  %v1146_v14 = vpop.f32.mrb[16].mxu1  ;;  %v7816_v15 = vadd.f32 %v1312_v6, %v1244_v61 }
 0x113   : > { %v1197_v16 = vmax.f32 %v1033_v13, 0.0  ;;  %v1035_v17 = vpop.f32.mrb[17].mxu0  ;;  %v1148_v19 = vpop.f32.mrb[17].mxu1  ;;  %v1199_v24 = vmax.f32 %v1146_v14, 0.0 }
 0x114   : > { %v1321_v21 = vadd.f32 %v1320_v10, %v1251_v9  ;;  %v1198_v22 = vmax.f32 %v1035_v17, 0.0  ;;  %v1200_v42 = vmax.f32 %v1148_v19, 0.0 }
 0x115   : > { %v1260_v23 = vadd.f32 %v7804_v56, %v1197_v16 }
 0x116   : > { %v1039_v25 = vpop.f32.mrb[18].mxu0  ;;  %v1152_v26 = vpop.f32.mrb[18].mxu1  ;;  %v7819_v27 = vadd.f32 %v1321_v21, %v1252_v11 }
 0x117   : > { %v1205_v28 = vmax.f32 %v1039_v25, 0.0  ;;  %v1041_v29 = vpop.f32.mrb[19].mxu0  ;;  %v1154_v31 = vpop.f32.mrb[19].mxu1  ;;  %v1261_v32 = vadd.f32 %v1260_v23, %v1198_v22  ;;  %v1207_v41 = vmax.f32 %v1152_v26, 0.0 }
 0x118   : > { %v1206_v39 = vmax.f32 %v1041_v29, 0.0  ;;  %v1208_v54 = vmax.f32 %v1154_v31, 0.0 }
 0x119   : > { %v1269_v40 = vadd.f32 %v7806_v5, %v1205_v28  ;;  %v1262_v43 = vadd.f32 %v1261_v32, %v1199_v24 }
 0x11a   : > { %v1045_v44 = vpop.f32.mrb[20].mxu0  ;;  %v1158_v45 = vpop.f32.mrb[20].mxu1 }
 0x11b   : > { %v1213_v46 = vmax.f32 %v1045_v44, 0.0  ;;  %v1047_v48 = vpop.f32.mrb[21].mxu0  ;;  %v1263_v56 = vadd.f32 %v1262_v43, %v1200_v42  ;;  %v1160_v49 = vpop.f32.mrb[21].mxu1  ;;  %v1270_v50 = vadd.f32 %v1269_v40, %v1206_v39  ;;  %v1215_v53 = vmax.f32 %v1158_v45, 0.0 }
 0x11c   : > { %v1214_v51 = vmax.f32 %v1047_v48, 0.0  ;;  %v1216_v6 = vmax.f32 %v1160_v49, 0.0  ;;  %v7829_v49 = vld [vmem:[%s10402_s12 + $0x30] sm:$0xff] }
 0x11d   : > { %v1278_v52 = vadd.f32 %v7808_v18, %v1213_v46  ;;  %1264 = vadd.xlane.f32.xlu0 %v1263_v56  ;;  %v1271_v55 = vadd.f32 %v1270_v50, %v1207_v41  ;;  %6282 = vmatmul.mubr.msk.f32.gmra.mrb[44].mxu1 %vm1567_vm3, %v7829_v49 }
 0x11e   : > { %v1051_v57 = vpop.f32.mrb[22].mxu0  ;;  %v1164_v58 = vpop.f32.mrb[22].mxu1  ;;  %1738 = vmatprep.mubr.f32.mxu1 %v7484_v0 }
 0x11f   : > { %v1221_v5 = vmax.f32 %v1051_v57, 0.0  ;;  %v1053_v59 = vpop.f32.mrb[23].mxu0  ;;  %v1272_v60 = vadd.f32 %v1271_v55, %v1208_v54  ;;  %v1166_v61 = vpop.f32.mrb[23].mxu1  ;;  %v1279_v62 = vadd.f32 %v1278_v52, %v1214_v51  ;;  %v1223_v4 = vmax.f32 %v1164_v58, 0.0 }
 0x120   : > { %v1222_v1 = vmax.f32 %v1053_v59, 0.0  ;;  %v1224_v22 = vmax.f32 %v1166_v61, 0.0  ;;  %v7838_v61 = vld [vmem:[%s10402_s12 + $0x38] sm:$0xff] }
 0x121   : > { %v1287_v2 = vadd.f32 %v7810_v30, %v1221_v5  ;;  %1273 = vadd.xlane.f32.xlu0 %v1272_v60  ;;  %v1280_v8 = vadd.f32 %v1279_v62, %v1215_v53  ;;  %6283 = vmatmul.mubr.msk.f32.gmra.mrb[46].mxu1 %vm1567_vm3, %v7838_v61 }
 0x122   : > { %v1057_v9 = vpop.f32.mrb[24].mxu0  ;;  %v1170_v18 = vpop.f32.mrb[24].mxu1  ;;  %1744 = vmatprep.mubr.f32.mxu1 %v7484_v0 }
 0x123   : > { %v1229_v10 = vmax.f32 %v1057_v9, 0.0  ;;  %v1059_v11 = vpop.f32.mrb[25].mxu0  ;;  %v1281_v13 = vadd.f32 %v1280_v8, %v1216_v6  ;;  %v1172_v14 = vpop.f32.mrb[25].mxu1  ;;  %v1288_v16 = vadd.f32 %v1287_v2, %v1222_v1  ;;  %v1231_v21 = vmax.f32 %v1170_v18, 0.0  ;;  %v7848_v18 = vld [vmem:[%s10402_s12 + $0x40] sm:$0xff] }
 0x124   : > { %v1230_v17 = vmax.f32 %v1059_v11, 0.0  ;;  %v1232_v41 = vmax.f32 %v1172_v14, 0.0  ;;  %v10412_v6 = vmov 0.0|0.0   ;;  %v7864_v14 = vld [vmem:[%s10402_s12 + $0x50] sm:$0xff] }
 0x125   : > { %v1296_v19 = vadd.f32 %v7812_v47, %v1229_v10  ;;  %1282 = vadd.xlane.f32.xlu1 %v1281_v13  ;;  %v1289_v23 = vadd.f32 %v1288_v16, %v1223_v4  ;;  %7032 = vmatprep.subr.bf16.mxu0 %v10412_v6  ;;  %v7856_v13 = vld [vmem:[%s10402_s12 + $0x48] sm:$0xff]  ;;  %v7872_v16 = vld [vmem:[%s10402_s12 + $0x58] sm:$0xff] }
 0x126   : > { %v1063_v24 = vpop.f32.mrb[26].mxu0  ;;  %v1176_v30 = vpop.f32.mrb[26].mxu1  ;;  %6284 = vmatmul.mubr.msk.f32.gmra.mrb[48].mxu1 %vm1567_vm3, %v7848_v18 }
 0x127   : > { %v1237_v25 = vmax.f32 %v1063_v24, 0.0  ;;  %v1065_v26 = vpop.f32.mrb[27].mxu0  ;;  %v1290_v28 = vadd.f32 %v1289_v23, %v1224_v22  ;;  %v1178_v29 = vpop.f32.mrb[27].mxu1  ;;  %v1297_v31 = vadd.f32 %v1296_v19, %v1230_v17  ;;  %v1239_v40 = vmax.f32 %v1176_v30, 0.0  ;;  %1750 = vmatprep.mubr.f32.mxu1 %v7484_v0  ;;  %v7880_v17 = vld [vmem:[%s10402_s12 + $0x60] sm:$0xff]  ;;  %v7888_v19 = vld [vmem:[%s10402_s12 + $0x68] sm:$0xff] }
 0x128   : > { %v1238_v32 = vmax.f32 %v1065_v26, 0.0  ;;  %v1240_v52 = vmax.f32 %v1178_v29, 0.0  ;;  %v7906_v22 = vld [vmem:[%s10402_s12 + $0x78] sm:$0xff] }
 0x129   : > { %v1305_v39 = vadd.f32 %v7814_v63, %v1237_v25  ;;  %1291 = vadd.xlane.f32.xlu1 %v1290_v28  ;;  %v1298_v42 = vadd.f32 %v1297_v31, %v1231_v21  ;;  %v7896_v21 = vld [vmem:[%s10402_s12 + $0x70] sm:$0xff] }
 0x12a   : > { %v1069_v43 = vpop.f32.mrb[28].mxu0  ;;  %v1182_v47 = vpop.f32.mrb[28].mxu1  ;;  %6285 = vmatmul.mubr.msk.f32.gmra.mrb[50].mxu1 %vm1567_vm3, %v7856_v13 }
 0x12b   : > { %v1306_v44 = vadd.f32 %v1305_v39, %v1238_v32  ;;  %v1245_v45 = vmax.f32 %v1069_v43, 0.0  ;;  %v1071_v46 = vpop.f32.mrb[29].mxu0  ;;  %v1299_v48 = vadd.f32 %v1298_v42, %v1232_v41  ;;  %v1184_v56 = vpop.f32.mrb[29].mxu1  ;;  %v1247_v53 = vmax.f32 %v1182_v47, 0.0  ;;  %1756 = vmatprep.mubr.f32.mxu1 %v7484_v0 }
 0x12c   : > { %v1246_v50 = vmax.f32 %v1071_v46, 0.0  ;;  %v1248_v62 = vmax.f32 %v1184_v56, 0.0 }
 0x12d   : > { %v1307_v63 = vadd.f32 %v1306_v44, %v1239_v40  ;;  %v1314_v51 = vadd.f32 %v7816_v15, %v1245_v45  ;;  %1300 = vadd.xlane.f32.xlu0 %v1299_v48 }
 0x12e   : > { %v1075_v54 = vpop.f32.mrb[30].mxu0  ;;  %v1188_v55 = vpop.f32.mrb[30].mxu1  ;;  %6286 = vmatmul.mubr.msk.f32.gmra.mrb[52].mxu1 %vm1567_vm3, %v7864_v14 }
 0x12f   : > { %v1315_v57 = vadd.f32 %v1314_v51, %v1246_v50  ;;  %v1253_v58 = vmax.f32 %v1075_v54, 0.0  ;;  %v1077_v5 = vpop.f32.mrb[31].mxu0  ;;  %v1308_v59 = vadd.f32 %v1307_v63, %v1240_v52  ;;  %v1190_v60 = vpop.f32.mrb[31].mxu1  ;;  %v1255_v4 = vmax.f32 %v1188_v55, 0.0  ;;  %1762 = vmatprep.mubr.f32.mxu1 %v7484_v0  ;;  %v2420_v50 = vld [vmem:[%s10403_s13 + $0x80] sm:$0xff]  ;;  %v2421_v63 = vld [vmem:[%s10403_s13 + $0x88] sm:$0xff] }
 0x130   : > { %v1254_v1 = vmax.f32 %v1077_v5, 0.0  ;;  %v1256_v11 = vmax.f32 %v1190_v60, 0.0  ;;  %v7044_v51 = vpack.c.bf16 %v2421_v63, %v2420_v50  ;;  %v2404_v52 = vld [vmem:[%s10403_s13] sm:$0xff]  ;;  %v2414_v50 = vld [vmem:[%s10403_s13 + $0x50] sm:$0xff]  ;;  %v2415_v63 = vld [vmem:[%s10403_s13 + $0x58] sm:$0xff] }
 0x131   : > { %v1316_v15 = vadd.f32 %v1315_v57, %v1247_v53  ;;  %v1323_v2 = vadd.f32 %v7819_v27, %v1253_v58  ;;  %1309 = vadd.xlane.f32.xlu1 %v1308_v59  ;;  %v2405_v53 = vld [vmem:[%s10403_s13 + $0x8] sm:$0xff]  ;;  %v1338_v54 = vld [vmem:[%s10429_s28] sm:$0xf]  ;;  %v2422_v57 = vld [vmem:[%s10403_s13 + $0x90] sm:$0xff]  ;;  %s6231_s28 = sshll.u32 %s10456_s30, 1 }
 0x132   : > { %6287 = vmatmul.mubr.msk.f32.gmra.mrb[54].mxu1 %vm1567_vm3, %v7872_v16  ;;  %v7046_v55 = vpack.c.bf16 %v2405_v53, %v2404_v52  ;;  %7045 = vmatprep.subr.bf16.mxu1 %v7044_v51  ;;  %v2423_v58 = vld [vmem:[%s10403_s13 + $0x98] sm:$0xff]  ;;  %v2406_v59 = vld [vmem:[%s10403_s13 + $0x10] sm:$0xff]  ;;  %v2424_v60 = vld [vmem:[%s10403_s13 + $0xa0] sm:$0xff] }
 0x133   : > { %v1324_v8 = vadd.f32 %v1323_v2, %v1254_v1  ;;  %v1317_v9 = vadd.f32 %v1316_v15, %v1248_v62  ;;  %1768 = vmatprep.mubr.f32.mxu1 %v7484_v0  ;;  %v7048_v5 = vpack.c.bf16 %v2423_v58, %v2422_v57  ;;  %v7993_v62 = vpop.f32.mrb[32].mxu1  ;;  %v2425_v15 = vld [vmem:[%s10403_s13 + $0xa8] sm:$0xff]  ;;  %v2408_v2 = vld [vmem:[%s10403_s13 + $0x20] sm:$0xff] }
 0x134   : > { %v2432_v51 = vld [vmem:[%s10403_s13 + $0xe0] sm:$0xff]  ;;  %v2453_v53 = vld [vmem:[%s10403_s13 + $0x188] sm:$0xff] }
 0x135   : > { %v1325_v10 = vadd.f32 %v1324_v8, %v1255_v4  ;;  %1318 = vadd.xlane.f32.xlu0 %v1317_v9  ;;  %v2409_v4 = vld [vmem:[%s10403_s13 + $0x28] sm:$0xff]  ;;  %v1700_v8 = vpop.f32.mrb[33].mxu1  ;;  %v2426_v9 = vld [vmem:[%s10403_s13 + $0xb0] sm:$0xff]  ;;  %v2452_v52 = vld [vmem:[%s10403_s13 + $0x180] sm:$0xff] }
 0x136   : > { %6288 = vmatmul.mubr.msk.f32.gmra.mrb[56].mxu1 %vm1567_vm3, %v7880_v17  ;;  %v2416_v58 = vld [vmem:[%s10403_s13 + $0x60] sm:$0xff] }
 0x137   : > { %v1326_v27 = vadd.f32 %v1325_v10, %v1256_v11  ;;  %1774 = vmatprep.mubr.f32.mxu1 %v7484_v0  ;;  %v2427_v10 = vld [vmem:[%s10403_s13 + $0xb8] sm:$0xff]  ;;  %v8015_v11 = vpop.f32.mrb[34].mxu1 }
 0x139   : > { %1327 = vadd.xlane.f32.xlu1 %v1326_v27  ;;  %v7054_v27 = vpack.c.bf16 %v2409_v4, %v2408_v2  ;;  %v2484_v2 = vld [vmem:[%s10403_s13 + $0x280] sm:$0xff] }
 0x13a   : > { %6289 = vmatmul.mubr.msk.f32.gmra.mrb[58].mxu1 %vm1567_vm3, %v7888_v19  ;;  %v1423_v4 = vld [vmem:[%s10405_s15] sm:$0xff] }
 0x13b   : > { %1780 = vmatprep.mubr.f32.mxu1 %v7484_v0 }
 0x13e   : > { %6290 = vmatmul.mubr.msk.f32.gmra.mrb[60].mxu1 %vm1567_vm3, %v7896_v21 }
 0x13f   : > { %1786 = vmatprep.mubr.f32.mxu1 %v7484_v0 }
 0x142   : > { %6291 = vmatmul.mubr.msk.f32.gmra.mrb[62].mxu1 %vm1567_vm3, %v7906_v22 }
 0x143   : > { %2018 = vmatprep.mubr.f32.mxu1 %v7484_v0 }
 0x146   : > { %6312 = vmatmul.mubr.msk.f32.vlgmr.msra.gmra.mrb[64].mxu1 %vm1567_vm3, %v7757_v33 }
 0x147   : > { %2024 = vmatprep.mubr.f32.mxu1 %v7484_v0  ;;  %7047 = vmatpush3.bf16.msra.mxu1 %v7046_v55  ;;  %v7066_v55 = vpack.c.bf16 %v2415_v63, %v2414_v50  ;;  %v2473_v50 = vld [vmem:[%s10403_s13 + $0x228] sm:$0xff]  ;;  %v2491_v63 = vld [vmem:[%s10403_s13 + $0x2b8] sm:$0xff] }
 0x148   : > { %7049 = vmatprep.subr.bf16.mxu1 %v7048_v5  ;;  %v2417_v5 = vld [vmem:[%s10403_s13 + $0x68] sm:$0xff] }
 0x14a   : > { %6313 = vmatmul.mubr.msk.f32.gmra.mrb[66].mxu1 %vm1567_vm3, %v7765_v34 }
 0x14b   : > { %2030 = vmatprep.mubr.f32.mxu1 %v7484_v0 }
 0x14e   : > { %6314 = vmatmul.mubr.msk.f32.gmra.mrb[68].mxu1 %vm1567_vm3, %v7775_v35 }
 0x14f   : > { %2036 = vmatprep.mubr.f32.mxu1 %v7484_v0 }
 0x152   : > { %6315 = vmatmul.mubr.msk.f32.gmra.mrb[70].mxu1 %vm1567_vm3, %v7783_v36 }
 0x153   : > { %2042 = vmatprep.mubr.f32.mxu1 %v7484_v0 }
 0x156   : > { %6316 = vmatmul.mubr.msk.f32.gmra.mrb[72].mxu1 %vm1567_vm3, %v7791_v37 }
 0x157   : > { %2048 = vmatprep.mubr.f32.mxu1 %v7484_v0 }
 0x15a   : > { %6317 = vmatmul.mubr.msk.f32.gmra.mrb[74].mxu1 %vm1567_vm3, %v7799_v38 }
 0x15b   : > { %2054 = vmatprep.mubr.f32.mxu1 %v7484_v0 }
 0x15e   : > { %6318 = vmatmul.mubr.msk.f32.gmra.mrb[76].mxu1 %vm1567_vm3, %v7829_v49 }
 0x15f   : > { %2060 = vmatprep.mubr.f32.mxu1 %v7484_v0 }
 0x162   : > { %6319 = vmatmul.mubr.msk.f32.gmra.mrb[78].mxu1 %vm1567_vm3, %v7838_v61 }
 0x163   : > { %2066 = vmatprep.mubr.f32.mxu1 %v7484_v0 }
 0x166   : > { %6320 = vmatmul.mubr.msk.f32.gmra.mrb[80].mxu1 %vm1567_vm3, %v7848_v18 }
 0x167   : > { %2072 = vmatprep.mubr.f32.mxu1 %v7484_v0 }
 0x16a   : > { %6321 = vmatmul.mubr.msk.f32.gmra.mrb[82].mxu1 %vm1567_vm3, %v7856_v13 }
 0x16b   : > { %2078 = vmatprep.mubr.f32.mxu1 %v7484_v0 }
 0x16e   : > { %6322 = vmatmul.mubr.msk.f32.gmra.mrb[84].mxu1 %vm1567_vm3, %v7864_v14 }
 0x16f   : > { %2084 = vmatprep.mubr.f32.mxu1 %v7484_v0 }
 0x172   : > { %6323 = vmatmul.mubr.msk.f32.gmra.mrb[86].mxu1 %vm1567_vm3, %v7872_v16 }
 0x173   : > { %2090 = vmatprep.mubr.f32.mxu1 %v7484_v0 }
 0x176   : > { %6324 = vmatmul.mubr.msk.f32.gmra.mrb[88].mxu1 %vm1567_vm3, %v7880_v17 }
 0x177   : > { %2096 = vmatprep.mubr.f32.mxu1 %v7484_v0 }
 0x17a   : > { %6325 = vmatmul.mubr.msk.f32.gmra.mrb[90].mxu1 %vm1567_vm3, %v7888_v19 }
 0x17b   : > { %2102 = vmatprep.mubr.f32.mxu1 %v7484_v0 }
 0x17e   : > { %6326 = vmatmul.mubr.msk.f32.gmra.mrb[92].mxu1 %vm1567_vm3, %v7896_v21 }
 0x17f   : > { %2108 = vmatprep.mubr.f32.mxu1 %v7484_v0 }
 0x182   : > { %6327 = vmatmul.mubr.msk.f32.gmra.mrb[94].mxu1 %vm1567_vm3, %v7906_v22 }
 0x1aa   : > { %v1265_v23 = vpop.xlane.xlu0 %1264 }
 0x1ab   : > { %v1330_v30 = vmul.f32 0.0009765625, %v1265_v23  ;;  %v8017_v23 = vpop.f32.mrb[35].mxu1 }
 0x1ae   : > { %v1274_v24 = vpop.xlane.xlu0 %1273 }
 0x1af   : > { %v1331_v25 = vmul.f32 0.0009765625, %v1274_v24  ;;  %v2410_v24 = vld [vmem:[%s10403_s13 + $0x30] sm:$0xff] }
 0x1b1   : > { %v7033_v26 = vpack.c.bf16 %v1331_v25, %v1330_v30  ;;  %v2411_v30 = vld [vmem:[%s10403_s13 + $0x38] sm:$0xff]  ;;  %v8027_v25 = vpop.f32.mrb[36].mxu1 }
 0x1b2   : > { %v1283_v28 = vpop.xlane.xlu1 %1282 }
 0x1b3   : > { %7034 = vmatpush3.bf16.msra.mxu0 %v7033_v26  ;;  %v1332_v31 = vmul.f32 0.0009765625, %v1283_v28  ;;  %v2429_v26 = vld [vmem:[%s10403_s13 + $0xc8] sm:$0xff]  ;;  %v8038_v28 = vpop.f32.mrb[37].mxu1 }
 0x1b4   : > { %7035 = vmatprep.subr.bf16.mxu0 %v10412_v6 }
 0x1b6   : > { %v1292_v29 = vpop.xlane.xlu1 %1291 }
 0x1b7   : > { %v1333_v32 = vmul.f32 0.0009765625, %v1292_v29  ;;  %v8040_v29 = vpop.f32.mrb[38].mxu1 }
 0x1b9   : > { %v7036_v39 = vpack.c.bf16 %v1333_v32, %v1332_v31  ;;  %v7058_v31 = vpack.c.bf16 %v2411_v30, %v2410_v24  ;;  %v1424_v32 = vld [vmem:[%s10405_s15 + $0x8] sm:$0xff]  ;;  %v2276_v24 = vmul.f32 %v7993_v62, %v1423_v4  ;;  %v1431_v30 = vld [vmem:[%s10405_s15 + $0x40] sm:$0xff]  ;;  %v2470_v62 = vld [vmem:[%s10403_s13 + $0x210] sm:$0xff] }
 0x1ba   : > { %v1301_v40 = vpop.xlane.xlu0 %1300  ;;  %v1463_v4 = vld [vmem:[%s10405_s15 + $0x140] sm:$0xff] }
 0x1bb   : > { %7037 = vmatpush3.bf16.msra.mxu0 %v7036_v39  ;;  %v1334_v42 = vmul.f32 0.0009765625, %v1301_v40  ;;  %v8045_v39 = vpop.f32.mrb[39].mxu1  ;;  %v2412_v40 = vld [vmem:[%s10403_s13 + $0x40] sm:$0xff] }
 0x1bc   : > { %7038 = vmatprep.subr.bf16.mxu0 %v10412_v6 }
 0x1be   : > { %v1310_v41 = vpop.xlane.xlu1 %1309 }
 0x1bf   : > { %v1335_v43 = vmul.f32 0.0009765625, %v1310_v41  ;;  %v2413_v41 = vld [vmem:[%s10403_s13 + $0x48] sm:$0xff] }
 0x1c1   : > { %v7039_v47 = vpack.c.bf16 %v1335_v43, %v1334_v42  ;;  %v2277_v42 = vmul.f32 %v1700_v8, %v1424_v32  ;;  %v8055_v43 = vpop.f32.mrb[40].mxu1 }
 0x1c2   : > { %v1319_v44 = vpop.xlane.xlu0 %1318 }
 0x1c3   : > { %7040 = vmatpush3.bf16.msra.mxu0 %v7039_v47  ;;  %v1336_v46 = vmul.f32 0.0009765625, %v1319_v44  ;;  %v2430_v47 = vld [vmem:[%s10403_s13 + $0xd0] sm:$0xff]  ;;  %v8064_v44 = vpop.f32.mrb[41].mxu1  ;;  %2596 = vmatprep.mubr.f32.mxu1 %v2277_v42  ;;  %v1439_v42 = vld [vmem:[%s10405_s15 + $0x80] sm:$0xff] }
 0x1c4   : > { %7041 = vmatprep.subr.bf16.mxu0 %v10412_v6 }
 0x1c6   : > { %v1328_v45 = vpop.xlane.xlu1 %1327 }
 0x1c7   : > { %v1337_v48 = vmul.f32 0.0009765625, %v1328_v45  ;;  %v8066_v45 = vpop.f32.mrb[42].mxu1 }
 0x1c9   : > { %v7042_v56 = vpack.c.bf16 %v1337_v48, %v1336_v46  ;;  %v7062_v46 = vpack.c.bf16 %v2413_v41, %v2412_v40  ;;  %v8068_v48 = vpop.f32.mrb[43].mxu1  ;;  %v2489_v40 = vld [vmem:[%s10403_s13 + $0x2a8] sm:$0xff]  ;;  %v2284_v41 = vmul.f32 %v8015_v11, %v1431_v30  ;;  %v2472_v11 = vld [vmem:[%s10403_s13 + $0x220] sm:$0xff] }
 0x1ca   : > { %v1480_v30 = vld [vmem:[%s10405_s15 + $0x1c8] sm:$0xff] }
 0x1cb   : > { %7043 = vmatpush3.bf16.msra.mxu0 %v7042_v56 }
 0x1cc   : > { %6292 = vmatprep.subr.msk.mxu0 %vm674_vm0, %v7623_v7  ;;  %v2407_v7 = vld [vmem:[%s10403_s13 + $0x18] sm:$0xff] }
 0x1cd   : > { %v7050_v1 = vpack.c.bf16 %v2407_v7, %v2406_v59  ;;  %v2434_v59 = vld [vmem:[%s10403_s13 + $0xf0] sm:$0xff]  ;;  %v7070_v7 = vpack.c.bf16 %v2417_v5, %v2416_v58  ;;  %v2493_v58 = vld [vmem:[%s10403_s13 + $0x2c8] sm:$0xff] }
 0x1ce   : > { %6903 = vmatmul.mubr.msk.f32.vlgmr.msra.gmra.mrb[32].mxu0 %vm1339_vm5, %v1338_v54  ;;  %v7076_v54 = vpack.c.bf16 %v2453_v53, %v2452_v52  ;;  %v7118_v53 = vpack.c.bf16 %v2473_v50, %v2472_v11  ;;  %v2455_v50 = vld [vmem:[%s10403_s13 + $0x198] sm:$0xff] }
 0x1cf   : > { %6293 = vmatpush1.msk.msra.mxu0 %vm674_vm0, %v7616_v3  ;;  %1857 = vmatprep.mubr.f32.mxu0 %v7484_v0  ;;  %v7052_v3 = vpack.c.bf16 %v2425_v15, %v2424_v60  ;;  %v2419_v15 = vld [vmem:[%s10403_s13 + $0x78] sm:$0xff] }
 0x1d0   : > { %6328 = vmatprep.subr.msk.mxu0 %vm674_vm0, %v7649_v20  ;;  %7051 = vmatpush3.bf16.msra.mxu1 %v7050_v1  ;;  %v7056_v20 = vpack.c.bf16 %v2427_v10, %v2426_v9  ;;  %v2418_v1 = vld [vmem:[%s10403_s13 + $0x70] sm:$0xff]  ;;  %v2468_v10 = vld [vmem:[%s10403_s13 + $0x200] sm:$0xff] }
 0x1d1   : > { %7053 = vmatprep.subr.bf16.mxu1 %v7052_v3  ;;  %v7074_v8 = vpack.c.bf16 %v2419_v15, %v2418_v1  ;;  %v1432_v3 = vld [vmem:[%s10405_s15 + $0x48] sm:$0xff] }
 0x1d2   : > { %6294 = vmatmul.mubr.msk.f32.vlgmr.msra.gmra.mrb[34].mxu0 %vm1567_vm3, %v7757_v33  ;;  %v2428_v33 = vld [vmem:[%s10403_s13 + $0xc0] sm:$0xff]  ;;  %v2477_v15 = vld [vmem:[%s10403_s13 + $0x248] sm:$0xff] }
 0x1d3   : > { %1863 = vmatprep.mubr.f32.mxu0 %v7484_v0  ;;  %6329 = vmatpush1.msk.msra.mxu0 %vm674_vm0, %v7632_v12  ;;  %v7060_v12 = vpack.c.bf16 %v2429_v26, %v2428_v33  ;;  %v2285_v33 = vmul.f32 %v8017_v23, %v1432_v3  ;;  %v2488_v23 = vld [vmem:[%s10403_s13 + $0x2a0] sm:$0xff] }
 0x1d4   : > { %7055 = vmatpush3.bf16.msra.mxu1 %v7054_v27  ;;  %7077 = vmatprep.subr.bf16.mxu0 %v7076_v54  ;;  %v2469_v27 = vld [vmem:[%s10403_s13 + $0x208] sm:$0xff] }
 0x1d5   : > { %7057 = vmatprep.subr.bf16.mxu1 %v7056_v20  ;;  %v2487_v20 = vld [vmem:[%s10403_s13 + $0x298] sm:$0xff]  ;;  %v7110_v26 = vpack.c.bf16 %v2469_v27, %v2468_v10  ;;  %v1456_v54 = vld [vmem:[%s10405_s15 + $0x108] sm:$0xff]  ;;  %v2316_v10 = vmul.f32 %v8066_v45, %v1463_v4  ;;  %v2458_v4 = vld [vmem:[%s10403_s13 + $0x1b0] sm:$0xff] }
 0x1d6   : > { %6295 = vmatmul.mubr.msk.f32.gmra.mrb[36].mxu0 %vm1567_vm3, %v7765_v34  ;;  %v2431_v34 = vld [vmem:[%s10403_s13 + $0xd8] sm:$0xff] }
 0x1d7   : > { %1869 = vmatprep.mubr.f32.mxu0 %v7484_v0  ;;  %v7064_v56 = vpack.c.bf16 %v2431_v34, %v2430_v47 }
 0x1d8   : > { %7059 = vmatpush3.bf16.msra.mxu1 %v7058_v31  ;;  %v1440_v31 = vld [vmem:[%s10405_s15 + $0x88] sm:$0xff] }
 0x1d9   : > { %7061 = vmatprep.subr.bf16.mxu1 %v7060_v12  ;;  %v2471_v12 = vld [vmem:[%s10403_s13 + $0x218] sm:$0xff]  ;;  %v2293_v47 = vmul.f32 %v8038_v28, %v1440_v31  ;;  %v2490_v28 = vld [vmem:[%s10403_s13 + $0x2b0] sm:$0xff] }
 0x1da   : > { %6296 = vmatmul.mubr.msk.f32.gmra.mrb[38].mxu0 %vm1567_vm3, %v7775_v35  ;;  %v2433_v35 = vld [vmem:[%s10403_s13 + $0xe8] sm:$0xff]  ;;  %v7114_v34 = vpack.c.bf16 %v2471_v12, %v2470_v62  ;;  %v1487_v62 = vld [vmem:[%s10405_s15 + $0x200] sm:$0xff] }
 0x1db   : > { %1875 = vmatprep.mubr.f32.mxu0 %v7484_v0  ;;  %v7068_v57 = vpack.c.bf16 %v2433_v35, %v2432_v51  ;;  %v2292_v51 = vmul.f32 %v8027_v25, %v1439_v42  ;;  %v1447_v35 = vld [vmem:[%s10405_s15 + $0xc0] sm:$0xff]  ;;  %v2474_v25 = vld [vmem:[%s10403_s13 + $0x230] sm:$0xff] }
 0x1dc   : > { %7063 = vmatpush3.bf16.msra.mxu1 %v7062_v46  ;;  %v1448_v46 = vld [vmem:[%s10405_s15 + $0xc8] sm:$0xff]  ;;  %v2300_v5 = vmul.f32 %v8040_v29, %v1447_v35  ;;  %v2476_v29 = vld [vmem:[%s10403_s13 + $0x240] sm:$0xff] }
 0x1dd   : > { %7065 = vmatprep.subr.bf16.mxu1 %v7064_v56  ;;  %v7116_v56 = vpack.c.bf16 %v2489_v40, %v2488_v23  ;;  %v2301_v52 = vmul.f32 %v8045_v39, %v1448_v46  ;;  %v2492_v39 = vld [vmem:[%s10403_s13 + $0x2c0] sm:$0xff]  ;;  %v7126_v3 = vpack.c.bf16 %v2477_v15, %v2476_v29  ;;  %v2437_v46 = vld [vmem:[%s10403_s13 + $0x108] sm:$0xff] }
 0x1de   : > { %6297 = vmatmul.mubr.msk.f32.gmra.mrb[40].mxu0 %vm1567_vm3, %v7783_v36  ;;  %v2435_v36 = vld [vmem:[%s10403_s13 + $0xf8] sm:$0xff]  ;;  %v7124_v1 = vpack.c.bf16 %v2493_v58, %v2492_v39  ;;  %v1495_v42 = vld [vmem:[%s10405_s15 + $0x240] sm:$0xff]  ;;  %v2457_v58 = vld [vmem:[%s10403_s13 + $0x1a8] sm:$0xff] }
 0x1df   : > { %1881 = vmatprep.mubr.f32.mxu0 %v7484_v0  ;;  %v7072_v60 = vpack.c.bf16 %v2435_v36, %v2434_v59  ;;  %v1455_v59 = vld [vmem:[%s10405_s15 + $0x100] sm:$0xff]  ;;  %v2309_v36 = vmul.f32 %v8064_v44, %v1456_v54  ;;  %v2494_v44 = vld [vmem:[%s10403_s13 + $0x2d0] sm:$0xff]  ;;  %v2441_v15 = vld [vmem:[%s10403_s13 + $0x128] sm:$0xff] }
 0x1e0   : > { %7067 = vmatpush3.bf16.msra.mxu1 %v7066_v55  ;;  %v7120_v55 = vpack.c.bf16 %v2491_v63, %v2490_v28  ;;  %v1503_v63 = vld [vmem:[%s10405_s15 + $0x280] sm:$0xff]  ;;  %v2438_v54 = vld [vmem:[%s10403_s13 + $0x110] sm:$0xff] }
 0x1e1   : > { %7069 = vmatprep.subr.bf16.mxu1 %v7068_v57  ;;  %v2475_v57 = vld [vmem:[%s10403_s13 + $0x238] sm:$0xff]  ;;  %v2456_v39 = vld [vmem:[%s10403_s13 + $0x1a0] sm:$0xff] }
 0x1e2   : > { %6298 = vmatmul.mubr.msk.f32.gmra.mrb[42].mxu0 %vm1567_vm3, %v7791_v37  ;;  %v2485_v37 = vld [vmem:[%s10403_s13 + $0x288] sm:$0xff]  ;;  %v2440_v29 = vld [vmem:[%s10403_s13 + $0x120] sm:$0xff] }
 0x1e3   : > { %1887 = vmatprep.mubr.f32.mxu0 %v7484_v0  ;;  %v7108_v9 = vpack.c.bf16 %v2485_v37, %v2484_v2  ;;  %v2495_v2 = vld [vmem:[%s10403_s13 + $0x2d8] sm:$0xff]  ;;  %v2308_v37 = vmul.f32 %v8055_v43, %v1455_v59  ;;  %v1471_v43 = vld [vmem:[%s10405_s15 + $0x180] sm:$0xff] }
 0x1e4   : > { %7071 = vmatpush3.bf16.msra.mxu1 %v7070_v7  ;;  %v7122_v7 = vpack.c.bf16 %v2475_v57, %v2474_v25  ;;  %v1511_v59 = vld [vmem:[%s10405_s15 + $0x2c0] sm:$0xff] }
 0x1e5   : > { %7073 = vmatprep.subr.bf16.mxu1 %v7072_v60  ;;  %v1464_v60 = vld [vmem:[%s10405_s15 + $0x148] sm:$0xff] }
 0x1e6   : > { %6299 = vmatmul.mubr.msk.f32.gmra.mrb[44].mxu0 %vm1567_vm3, %v7799_v38  ;;  %v2486_v38 = vld [vmem:[%s10403_s13 + $0x290] sm:$0xff] }
 0x1e7   : > { %1893 = vmatprep.mubr.f32.mxu0 %v7484_v0  ;;  %v7112_v32 = vpack.c.bf16 %v2487_v20, %v2486_v38 }
 0x1e8   : > { %7075 = vmatpush3.bf16.msra.mxu1 %v7074_v8  ;;  %v2317_v8 = vmul.f32 %v8068_v48, %v1464_v60  ;;  %v1472_v48 = vld [vmem:[%s10405_s15 + $0x188] sm:$0xff] }
 0x1e9   : > { %7109 = vmatprep.subr.bf16.mxu1 %v7108_v9  ;;  %v7128_v9 = vpack.c.bf16 %v2495_v2, %v2494_v44 }
 0x1ea   : > { %6300 = vmatmul.mubr.msk.f32.gmra.mrb[46].mxu0 %vm1567_vm3, %v7829_v49 }
 0x1eb   : > { %1899 = vmatprep.mubr.f32.mxu0 %v7484_v0  ;;  %2597 = vmatmul.mubr.f32.vlgmr.msra.gmra.mrb[96].mxu1 %v2276_v24  ;;  %v1479_v24 = vld [vmem:[%s10405_s15 + $0x1c0] sm:$0xff] }
 0x1ec   : > { %2601 = vmatprep.mubr.f32.mxu1 %v2285_v33  ;;  %7111 = vmatpush3.bf16.msra.mxu1 %v7110_v26 }
 0x1ed   : > { %7113 = vmatprep.subr.bf16.mxu1 %v7112_v32 }
 0x1ee   : > { %6301 = vmatmul.mubr.msk.f32.gmra.mrb[48].mxu0 %vm1567_vm3, %v7838_v61 }
 0x1ef   : > { %1905 = vmatprep.mubr.f32.mxu0 %v7484_v0  ;;  %2602 = vmatmul.mubr.f32.gmra.mrb[98].mxu1 %v2284_v41 }
 0x1f0   : > { %2606 = vmatprep.mubr.f32.mxu1 %v2293_v47  ;;  %7115 = vmatpush3.bf16.msra.mxu1 %v7114_v34  ;;  %v1734_v27 = vpop.f32.mrb[44].mxu1  ;;  %v2436_v34 = vld [vmem:[%s10403_s13 + $0x100] sm:$0xff] }
 0x1f1   : > { %7117 = vmatprep.subr.bf16.mxu1 %v7116_v56  ;;  %v2324_v38 = vmul.f32 %v1734_v27, %v1471_v43  ;;  %v1736_v45 = vpop.f32.mrb[45].mxu1  ;;  %v7078_v35 = vpack.c.bf16 %v2437_v46, %v2436_v34  ;;  %v7086_v43 = vpack.c.bf16 %v2441_v15, %v2440_v29  ;;  %v2462_v34 = vld [vmem:[%s10403_s13 + $0x1d0] sm:$0xff]  ;;  %v2463_v46 = vld [vmem:[%s10403_s13 + $0x1d8] sm:$0xff]  ;;  %v2448_v15 = vld [vmem:[%s10403_s13 + $0x160] sm:$0xff] }
 0x1f2   : > { %6302 = vmatmul.mubr.msk.f32.gmra.mrb[50].mxu0 %vm1567_vm3, %v7848_v18  ;;  %v2325_v20 = vmul.f32 %v1736_v45, %v1472_v48  ;;  %v2443_v45 = vld [vmem:[%s10403_s13 + $0x138] sm:$0xff] }
 0x1f3   : > { %1911 = vmatprep.mubr.f32.mxu0 %v7484_v0  ;;  %2607 = vmatmul.mubr.f32.gmra.mrb[100].mxu1 %v2292_v51  ;;  %v1504_v51 = vld [vmem:[%s10405_s15 + $0x288] sm:$0xff] }
 0x1f4   : > { %2611 = vmatprep.mubr.f32.mxu1 %v2301_v52  ;;  %7119 = vmatpush3.bf16.msra.mxu1 %v7118_v53  ;;  %v1740_v33 = vpop.f32.mrb[46].mxu1 }
 0x1f5   : > { %7121 = vmatprep.subr.bf16.mxu1 %v7120_v55  ;;  %v2332_v26 = vmul.f32 %v1740_v33, %v1479_v24  ;;  %v1742_v31 = vpop.f32.mrb[47].mxu1  ;;  %v2460_v33 = vld [vmem:[%s10403_s13 + $0x1c0] sm:$0xff] }
 0x1f6   : > { %6303 = vmatmul.mubr.msk.f32.gmra.mrb[52].mxu0 %vm1567_vm3, %v7856_v13  ;;  %v2333_v32 = vmul.f32 %v1742_v31, %v1480_v30  ;;  %v7464_v31 = vld [vmem:[%s10402_s12 + $0x10] sm:$0xff] }
 0x1f7   : > { %1917 = vmatprep.mubr.f32.mxu0 %v7484_v0  ;;  %2612 = vmatmul.mubr.f32.gmra.mrb[102].mxu1 %v2300_v5  ;;  %v7462_v5 = vld [vmem:[%s10402_s12] sm:$0xff] }
 0x1f8   : > { %2616 = vmatprep.mubr.f32.mxu1 %v2309_v36  ;;  %7123 = vmatpush3.bf16.msra.mxu1 %v7122_v7  ;;  %v1512_v36 = vld [vmem:[%s10405_s15 + $0x2c8] sm:$0xff] }
 0x1f9   : > { %7125 = vmatprep.subr.bf16.mxu1 %v7124_v1  ;;  %v1746_v12 = vpop.f32.mrb[48].mxu1  ;;  %v7084_v1 = vpack.c.bf16 %v2457_v58, %v2456_v39  ;;  %v2465_v39 = vld [vmem:[%s10403_s13 + $0x1e8] sm:$0xff]  ;;  %v2496_v58 = vld [vmem:[%s10403_s13 + $0x2e0] sm:$0xff] }
 0x1fa   : > { %6304 = vmatmul.mubr.msk.f32.gmra.mrb[54].mxu0 %vm1567_vm3, %v7864_v14  ;;  %v2340_v23 = vmul.f32 %v1746_v12, %v1487_v62  ;;  %v1748_v40 = vpop.f32.mrb[49].mxu1  ;;  %v1528_v62 = vld [vmem:[%s10405_s15 + $0x348] sm:$0xff] }
 0x1fb   : > { %1923 = vmatprep.mubr.f32.mxu0 %v7484_v0  ;;  %2617 = vmatmul.mubr.f32.gmra.mrb[104].mxu1 %v2308_v37 }
 0x1fc   : > { %2621 = vmatprep.mubr.f32.mxu1 %v2317_v8  ;;  %7127 = vmatpush3.bf16.msra.mxu1 %v7126_v3  ;;  %v2459_v8 = vld [vmem:[%s10403_s13 + $0x1b8] sm:$0xff]  ;;  %v7463_v3 = vld [vmem:[%s10402_s12 + $0x8] sm:$0xff] }
 0x1fd   : > { %7129 = vmatprep.subr.bf16.mxu1 %v7128_v9  ;;  %v1752_v47 = vpop.f32.mrb[50].mxu1  ;;  %v1519_v9 = vld [vmem:[%s10405_s15 + $0x300] sm:$0xff]  ;;  %v7088_v27 = vpack.c.bf16 %v2459_v8, %v2458_v4  ;;  %v1544_v4 = vld [vmem:[%s10405_s15 + $0x3c8] sm:$0xff] }
 0x1fe   : > { %6305 = vmatmul.mubr.msk.f32.gmra.mrb[56].mxu0 %vm1567_vm3, %v7872_v16  ;;  %v2348_v56 = vmul.f32 %v1752_v47, %v1495_v42  ;;  %v1754_v11 = vpop.f32.mrb[51].mxu1 }
 0x1ff   : > { %1929 = vmatprep.mubr.f32.mxu0 %v7484_v0  ;;  %2622 = vmatmul.mubr.f32.gmra.mrb[106].mxu1 %v2316_v10  ;;  %v1520_v10 = vld [vmem:[%s10405_s15 + $0x308] sm:$0xff] }
 0x200   : > { %2626 = vmatprep.mubr.f32.mxu1 %v2325_v20 }
 0x201   : > { %v1758_v52 = vpop.f32.mrb[52].mxu1 }
 0x202   : > { %6306 = vmatmul.mubr.msk.f32.gmra.mrb[58].mxu0 %vm1567_vm3, %v7880_v17  ;;  %v1488_v17 = vld [vmem:[%s10405_s15 + $0x208] sm:$0xff]  ;;  %v1760_v55 = vpop.f32.mrb[53].mxu1  ;;  %v2356_v25 = vmul.f32 %v1758_v52, %v1503_v63  ;;  %v7096_v52 = vpack.c.bf16 %v2463_v46, %v2462_v34 }
 0x203   : > { %1935 = vmatprep.mubr.f32.mxu0 %v7484_v0  ;;  %2627 = vmatmul.mubr.f32.gmra.mrb[108].mxu1 %v2324_v38  ;;  %v2341_v41 = vmul.f32 %v1748_v40, %v1488_v17  ;;  %v2357_v57 = vmul.f32 %v1760_v55, %v1504_v51  ;;  %v2442_v38 = vld [vmem:[%s10403_s13 + $0x130] sm:$0xff]  ;;  %v2444_v40 = vld [vmem:[%s10403_s13 + $0x140] sm:$0xff]  ;;  %v1436_v34 = vld [vmem:[%s10405_s15 + $0x68] sm:$0xff] }
 0x204   : > { %2631 = vmatprep.mubr.f32.mxu1 %v2333_v32  ;;  %v1527_v32 = vld [vmem:[%s10405_s15 + $0x340] sm:$0xff]  ;;  %v7090_v17 = vpack.c.bf16 %v2443_v45, %v2442_v38  ;;  %v2499_v45 = vld [vmem:[%s10403_s13 + $0x2f8] sm:$0xff] }
 0x205   : > { %v1764_v60 = vpop.f32.mrb[54].mxu1  ;;  %v2464_v55 = vld [vmem:[%s10403_s13 + $0x1e0] sm:$0xff] }
 0x206   : > { %6307 = vmatmul.mubr.msk.f32.gmra.mrb[60].mxu0 %vm1567_vm3, %v7888_v19  ;;  %v1496_v19 = vld [vmem:[%s10405_s15 + $0x248] sm:$0xff]  ;;  %v1766_v44 = vpop.f32.mrb[55].mxu1  ;;  %v2364_v2 = vmul.f32 %v1764_v60, %v1511_v59  ;;  %v7466_v59 = vld [vmem:[%s10402_s12 + $0x20] sm:$0xff] }
 0x207   : > { %1941 = vmatprep.mubr.f32.mxu0 %v7484_v0  ;;  %2632 = vmatmul.mubr.f32.gmra.mrb[110].mxu1 %v2332_v26  ;;  %v2349_v28 = vmul.f32 %v1754_v11, %v1496_v19  ;;  %v2365_v37 = vmul.f32 %v1766_v44, %v1512_v36  ;;  %v2461_v26 = vld [vmem:[%s10403_s13 + $0x1c8] sm:$0xff]  ;;  %v7465_v11 = vld [vmem:[%s10402_s12 + $0x18] sm:$0xff] }
 0x208   : > { %2636 = vmatprep.mubr.f32.mxu1 %v2341_v41  ;;  %v2445_v41 = vld [vmem:[%s10403_s13 + $0x148] sm:$0xff] }
 0x209   : > { %v1770_v48 = vpop.f32.mrb[56].mxu1  ;;  %v7094_v63 = vpack.c.bf16 %v2445_v41, %v2444_v40  ;;  %v2481_v60 = vld [vmem:[%s10403_s13 + $0x268] sm:$0xff]  ;;  %v1427_v40 = vld [vmem:[%s10405_s15 + $0x20] sm:$0xff] }
 0x20a   : > { %6308 = vmatmul.mubr.msk.f32.gmra.mrb[62].mxu0 %vm1567_vm3, %v7896_v21  ;;  %v2454_v21 = vld [vmem:[%s10403_s13 + $0x190] sm:$0xff]  ;;  %v1772_v20 = vpop.f32.mrb[57].mxu1  ;;  %v2372_v24 = vmul.f32 %v1770_v48, %v1519_v9  ;;  %v1543_v9 = vld [vmem:[%s10405_s15 + $0x3c0] sm:$0xff] }
 0x20b   : > { %1947 = vmatprep.mubr.f32.mxu0 %v7484_v0  ;;  %2637 = vmatmul.mubr.f32.gmra.mrb[112].mxu1 %v2340_v23  ;;  %v7080_v53 = vpack.c.bf16 %v2455_v50, %v2454_v21  ;;  %v2373_v30 = vmul.f32 %v1772_v20, %v1520_v10  ;;  %v7092_v23 = vpack.c.bf16 %v2461_v26, %v2460_v33  ;;  %v1536_v21 = vld [vmem:[%s10405_s15 + $0x388] sm:$0xff]  ;;  %v2478_v50 = vld [vmem:[%s10403_s13 + $0x250] sm:$0xff]  ;;  %v2483_v26 = vld [vmem:[%s10403_s13 + $0x278] sm:$0xff] }
 0x20c   : > { %2641 = vmatprep.mubr.f32.mxu1 %v2349_v28  ;;  %v2479_v28 = vld [vmem:[%s10403_s13 + $0x258] sm:$0xff]  ;;  %v2498_v48 = vld [vmem:[%s10403_s13 + $0x2f0] sm:$0xff] }
 0x20d   : > { %v1776_v12 = vpop.f32.mrb[58].mxu1  ;;  %v2482_v20 = vld [vmem:[%s10403_s13 + $0x270] sm:$0xff]  ;;  %v7136_v33 = vpack.c.bf16 %v2499_v45, %v2498_v48  ;;  %v7469_v45 = vld [vmem:[%s10402_s12 + $0x68] sm:$0xff] }
 0x20e   : > { %6309 = vmatmul.mubr.msk.f32.gmra.mrb[64].mxu0 %vm1567_vm3, %v7906_v22  ;;  %v2439_v22 = vld [vmem:[%s10403_s13 + $0x118] sm:$0xff]  ;;  %v1778_v42 = vpop.f32.mrb[59].mxu1  ;;  %v2380_v19 = vmul.f32 %v1776_v12, %v1527_v32  ;;  %v2450_v32 = vld [vmem:[%s10403_s13 + $0x170] sm:$0xff] }
 0x20f   : > { %2179 = vmatprep.mubr.f32.mxu0 %v7484_v0  ;;  %2642 = vmatmul.mubr.f32.gmra.mrb[114].mxu1 %v2348_v56  ;;  %v7082_v7 = vpack.c.bf16 %v2439_v22, %v2438_v54  ;;  %v2381_v47 = vmul.f32 %v1778_v42, %v1528_v62  ;;  %v1535_v56 = vld [vmem:[%s10405_s15 + $0x380] sm:$0xff]  ;;  %v2447_v54 = vld [vmem:[%s10403_s13 + $0x158] sm:$0xff] }
 0x210   : > { %2646 = vmatprep.mubr.f32.mxu1 %v2357_v57  ;;  %v2451_v62 = vld [vmem:[%s10403_s13 + $0x178] sm:$0xff] }
 0x211   : > { %v1782_v51 = vpop.f32.mrb[60].mxu1 }
 0x212   : > { %6330 = vmatmul.mubr.msk.f32.vlgmr.msra.gmra.mrb[66].mxu0 %vm1567_vm3, %v7462_v5  ;;  %v1784_v22 = vpop.f32.mrb[61].mxu1  ;;  %v2497_v5 = vld [vmem:[%s10403_s13 + $0x2e8] sm:$0xff] }
 0x213   : > { %2185 = vmatprep.mubr.f32.mxu0 %v7484_v0  ;;  %7079 = vmatpush3.bf16.msra.mxu0 %v7078_v35  ;;  %v7130_v35 = vpack.c.bf16 %v2479_v28, %v2478_v50  ;;  %v2389_v57 = vmul.f32 %v1784_v22, %v1536_v21  ;;  %v7132_v36 = vpack.c.bf16 %v2497_v5, %v2496_v58  ;;  %v1444_v50 = vld [vmem:[%s10405_s15 + $0xa8] sm:$0xff] }
 0x214   : > { %7081 = vmatprep.subr.bf16.mxu0 %v7080_v53  ;;  %2647 = vmatmul.mubr.f32.gmra.mrb[116].mxu1 %v2356_v25  ;;  %v2446_v53 = vld [vmem:[%s10403_s13 + $0x150] sm:$0xff]  ;;  %v2388_v25 = vmul.f32 %v1782_v51, %v1535_v56  ;;  %v1435_v56 = vld [vmem:[%s10405_s15 + $0x60] sm:$0xff] }
 0x215   : > { %2651 = vmatprep.mubr.f32.mxu1 %v2365_v37  ;;  %7131 = vmatpush3.bf16.msra.mxu1 %v7130_v35  ;;  %v1788_v29 = vpop.f32.mrb[62].mxu1  ;;  %v2449_v37 = vld [vmem:[%s10403_s13 + $0x168] sm:$0xff] }
 0x216   : > { %6331 = vmatmul.mubr.msk.f32.gmra.mrb[68].mxu0 %vm1567_vm3, %v7463_v3  ;;  %v1790_v8 = vpop.f32.mrb[63].mxu1  ;;  %v2466_v3 = vld [vmem:[%s10403_s13 + $0x1f0] sm:$0xff]  ;;  %7133 = vmatprep.subr.bf16.mxu1 %v7132_v36  ;;  %v2396_v38 = vmul.f32 %v1788_v29, %v1543_v9 }
 0x217   : > { %2191 = vmatprep.mubr.f32.mxu0 %v7484_v0  ;;  %7083 = vmatpush3.bf16.msra.mxu0 %v7082_v7  ;;  %v2480_v7 = vld [vmem:[%s10403_s13 + $0x260] sm:$0xff]  ;;  %v2397_v10 = vmul.f32 %v1790_v8, %v1544_v4 }
 0x218   : > { %7085 = vmatprep.subr.bf16.mxu0 %v7084_v1  ;;  %2652 = vmatmul.mubr.f32.gmra.mrb[118].mxu1 %v2364_v2  ;;  %v7098_v1 = vpack.c.bf16 %v2447_v54, %v2446_v53  ;;  %v7134_v44 = vpack.c.bf16 %v2481_v60, %v2480_v7  ;;  %v7100_v2 = vpack.c.bf16 %v2465_v39, %v2464_v55  ;;  %v1451_v54 = vld [vmem:[%s10405_s15 + $0xe0] sm:$0xff] }
 0x219   : > { %2656 = vmatprep.mubr.f32.mxu1 %v2373_v30  ;;  %v2020_v30 = vpop.f32.mrb[64].mxu1  ;;  %v1459_v39 = vld [vmem:[%s10405_s15 + $0x120] sm:$0xff] }
 0x21a   : > { %6332 = vmatmul.mubr.msk.f32.gmra.mrb[70].mxu0 %vm1567_vm3, %v7464_v31  ;;  %7135 = vmatpush3.bf16.msra.mxu1 %v7134_v44  ;;  %v2022_v12 = vpop.f32.mrb[65].mxu1  ;;  %v2280_v42 = vmul.f32 %v2020_v30, %v1427_v40  ;;  %v1467_v7 = vld [vmem:[%s10405_s15 + $0x160] sm:$0xff]  ;;  %v1492_v30 = vld [vmem:[%s10405_s15 + $0x228] sm:$0xff] }
 0x21b   : > { %2197 = vmatprep.mubr.f32.mxu0 %v7484_v0  ;;  %7087 = vmatpush3.bf16.msra.mxu0 %v7086_v43  ;;  %v2467_v43 = vld [vmem:[%s10403_s13 + $0x1f8] sm:$0xff]  ;;  %v2516_v8 = vld [vmem:[%s10403_s13 + $0x380] sm:$0xff] }
 0x21c   : > { %7089 = vmatprep.subr.bf16.mxu0 %v7088_v27  ;;  %2657 = vmatmul.mubr.f32.gmra.mrb[120].mxu1 %v2372_v24  ;;  %v7467_v27 = vld [vmem:[%s10402_s12 + $0x28] sm:$0xff]  ;;  %v7102_v24 = vpack.c.bf16 %v2449_v37, %v2448_v15  ;;  %v7104_v31 = vpack.c.bf16 %v2467_v43, %v2466_v3 }
 0x21d   : > { %2661 = vmatprep.mubr.f32.mxu1 %v2381_v47  ;;  %7137 = vmatprep.subr.bf16.mxu1 %v7136_v33  ;;  %v2026_v47 = vpop.f32.mrb[66].mxu1  ;;  %v1476_v15 = vld [vmem:[%s10405_s15 + $0x1a8] sm:$0xff] }
 0x21e   : > { %6333 = vmatmul.mubr.msk.f32.gmra.mrb[72].mxu0 %vm1567_vm3, %v7465_v11  ;;  %v2028_v46 = vpop.f32.mrb[67].mxu1  ;;  %v2517_v3 = vld [vmem:[%s10403_s13 + $0x388] sm:$0xff] }
 0x21f   : > { %2203 = vmatprep.mubr.f32.mxu0 %v7484_v0  ;;  %7091 = vmatpush3.bf16.msra.mxu0 %v7090_v17  ;;  %v1428_v17 = vld [vmem:[%s10405_s15 + $0x28] sm:$0xff]  ;;  %v2289_v11 = vmul.f32 %v2028_v46, %v1436_v34  ;;  %v7140_v9 = vpack.c.bf16 %v2517_v3, %v2516_v8 }
 0x220   : > { %7093 = vmatprep.subr.bf16.mxu0 %v7092_v23  ;;  %2662 = vmatmul.mubr.f32.gmra.mrb[122].mxu1 %v2380_v19  ;;  %v7138_v23 = vpack.c.bf16 %v2483_v26, %v2482_v20  ;;  %v2281_v41 = vmul.f32 %v2022_v12, %v1428_v17  ;;  %v7106_v19 = vpack.c.bf16 %v2451_v62, %v2450_v32  ;;  %v1484_v43 = vld [vmem:[%s10405_s15 + $0x1e8] sm:$0xff]  ;;  %v1491_v26 = vld [vmem:[%s10405_s15 + $0x220] sm:$0xff]  ;;  %v7470_v32 = vld [vmem:[%s10402_s12 + $0x70] sm:$0xff] }
 0x221   : > { %2666 = vmatprep.mubr.f32.mxu1 %v2389_v57  ;;  %v2032_v21 = vpop.f32.mrb[68].mxu1  ;;  %v1499_v17 = vld [vmem:[%s10405_s15 + $0x260] sm:$0xff]  ;;  %v1508_v46 = vld [vmem:[%s10405_s15 + $0x2a8] sm:$0xff] }
 0x222   : > { %6334 = vmatmul.mubr.msk.f32.gmra.mrb[74].mxu0 %vm1567_vm3, %v7466_v59  ;;  %7139 = vmatpush3.bf16.msra.mxu1 %v7138_v23  ;;  %v2034_v28 = vpop.f32.mrb[69].mxu1  ;;  %v1468_v59 = vld [vmem:[%s10405_s15 + $0x168] sm:$0xff] }
 0x223   : > { %2209 = vmatprep.mubr.f32.mxu0 %v7484_v0  ;;  %7095 = vmatpush3.bf16.msra.mxu0 %v7094_v63  ;;  %v1443_v63 = vld [vmem:[%s10405_s15 + $0xa0] sm:$0xff]  ;;  %v2297_v51 = vmul.f32 %v2034_v28, %v1444_v50  ;;  %v1500_v23 = vld [vmem:[%s10405_s15 + $0x268] sm:$0xff] }
 0x224   : > { %7097 = vmatprep.subr.bf16.mxu0 %v7096_v52  ;;  %2667 = vmatmul.mubr.f32.gmra.mrb[124].mxu1 %v2388_v25  ;;  %v1452_v52 = vld [vmem:[%s10405_s15 + $0xe8] sm:$0xff] }
 0x225   : > { %2671 = vmatprep.mubr.f32.mxu1 %v2397_v10  ;;  %v2038_v35 = vpop.f32.mrb[70].mxu1  ;;  %v1460_v25 = vld [vmem:[%s10405_s15 + $0x128] sm:$0xff] }
 0x226   : > { %6335 = vmatmul.mubr.msk.f32.gmra.mrb[76].mxu0 %vm1567_vm3, %v7467_v27  ;;  %v2040_v53 = vpop.f32.mrb[71].mxu1  ;;  %v1483_v27 = vld [vmem:[%s10405_s15 + $0x1e0] sm:$0xff]  ;;  %v1516_v28 = vld [vmem:[%s10405_s15 + $0x2e8] sm:$0xff] }
 0x227   : > { %2215 = vmatprep.mubr.f32.mxu0 %v7484_v0  ;;  %7099 = vmatpush3.bf16.msra.mxu0 %v7098_v1  ;;  %v2305_v22 = vmul.f32 %v2040_v53, %v1452_v52  ;;  %v1475_v1 = vld [vmem:[%s10405_s15 + $0x1a0] sm:$0xff]  ;;  %v1524_v53 = vld [vmem:[%s10405_s15 + $0x328] sm:$0xff] }
 0x228   : > { %7101 = vmatprep.subr.bf16.mxu0 %v7100_v2  ;;  %2672 = vmatmul.mubr.f32.gmra.mrb[126].mxu1 %v2396_v38  ;;  %v7487_v2 = vmov 0  }
 0x229   : > { %2886 = vmatprep.mubr.f32.mxu1 %v2281_v41  ;;  %v2044_v55 = vpop.f32.mrb[72].mxu1  ;;  %7438 = vset.pattern.permute.xlu0 %v7487_v2 }
 0x22a   : > { %6336 = vmatmul.mubr.msk.f32.gmra.mrb[78].mxu0 %vm1567_vm3, %v7829_v49  ;;  %v2288_v49 = vmul.f32 %v2026_v47, %v1435_v56  ;;  %v2046_v57 = vpop.f32.mrb[73].mxu1  ;;  %7439 = vset.pattern.permute.xlu1 %v7487_v2  ;;  %v1507_v47 = vld [vmem:[%s10405_s15 + $0x2a0] sm:$0xff] }
 0x22b   : > { %2221 = vmatprep.mubr.f32.mxu0 %v7484_v0  ;;  %7103 = vmatpush3.bf16.msra.mxu0 %v7102_v24  ;;  %v2313_v58 = vmul.f32 %v2046_v57, %v1460_v25  ;;  %v1532_v57 = vld [vmem:[%s10405_s15 + $0x368] sm:$0xff] }
 0x22c   : > { %7105 = vmatprep.subr.bf16.mxu0 %v7104_v31  ;;  %2887 = vmatmul.mubr.f32.vlgmr.msra.gmra.mrb[128].mxu1 %v2280_v42 }
 0x22d   : > { %2891 = vmatprep.mubr.f32.mxu1 %v2289_v11  ;;  %v2050_v5 = vpop.f32.mrb[74].mxu1 }
 0x22e   : > { %6337 = vmatmul.mubr.msk.f32.gmra.mrb[80].mxu0 %vm1567_vm3, %v7838_v61  ;;  %v2296_v61 = vmul.f32 %v2032_v21, %v1443_v63  ;;  %v2052_v36 = vpop.f32.mrb[75].mxu1  ;;  %v1515_v21 = vld [vmem:[%s10405_s15 + $0x2e0] sm:$0xff] }
 0x22f   : > { %2227 = vmatprep.mubr.f32.mxu0 %v7484_v0  ;;  %7107 = vmatpush3.bf16.msra.mxu0 %v7106_v19  ;;  %v2321_v60 = vmul.f32 %v2052_v36, %v1468_v59  ;;  %v7471_v19 = vld [vmem:[%s10402_s12 + $0x78] sm:$0xff]  ;;  %v1540_v36 = vld [vmem:[%s10405_s15 + $0x3a8] sm:$0xff] }
 0x230   : > { %2892 = vmatmul.mubr.f32.gmra.mrb[130].mxu1 %v2288_v49  ;;  %7141 = vmatprep.subr.bf16.mxu0 %v7140_v9  ;;  %v1426_v9 = vld [vmem:[%s10405_s15 + $0x18] sm:$0xff] }
 0x231   : > { %2896 = vmatprep.mubr.f32.mxu1 %v2297_v51  ;;  %v2056_v29 = vpop.f32.mrb[76].mxu1 }
 0x232   : > { %6338 = vmatmul.mubr.msk.f32.gmra.mrb[82].mxu0 %vm1567_vm3, %v7848_v18  ;;  %v2304_v18 = vmul.f32 %v2038_v35, %v1451_v54  ;;  %v2058_v44 = vpop.f32.mrb[77].mxu1  ;;  %v2328_v37 = vmul.f32 %v2056_v29, %v1475_v1  ;;  %v1523_v35 = vld [vmem:[%s10405_s15 + $0x320] sm:$0xff] }
 0x233   : > { %2233 = vmatprep.mubr.f32.mxu0 %v7484_v0  ;;  %v2329_v4 = vmul.f32 %v2058_v44, %v1476_v15  ;;  %v1547_v1 = vld [vmem:[%s10405_s15 + $0x3e0] sm:$0xff]  ;;  %v1548_v15 = vld [vmem:[%s10405_s15 + $0x3e8] sm:$0xff] }
 0x234   : > { %2897 = vmatmul.mubr.f32.gmra.mrb[132].mxu1 %v2296_v61 }
 0x235   : > { %2901 = vmatprep.mubr.f32.mxu1 %v2305_v22  ;;  %v2062_v10 = vpop.f32.mrb[78].mxu1 }
 0x236   : > { %6339 = vmatmul.mubr.msk.f32.gmra.mrb[84].mxu0 %vm1567_vm3, %v7856_v13  ;;  %v2312_v13 = vmul.f32 %v2044_v55, %v1459_v39  ;;  %v2064_v48 = vpop.f32.mrb[79].mxu1  ;;  %v2336_v20 = vmul.f32 %v2062_v10, %v1483_v27  ;;  %v1531_v55 = vld [vmem:[%s10405_s15 + $0x360] sm:$0xff] }
 0x237   : > { %2239 = vmatprep.mubr.f32.mxu0 %v7484_v0  ;;  %v2337_v38 = vmul.f32 %v2064_v48, %v1484_v43  ;;  %v2500_v10 = vld [vmem:[%s10403_s13 + $0x300] sm:$0xff]  ;;  %v2501_v43 = vld [vmem:[%s10403_s13 + $0x308] sm:$0xff]  ;;  %v1425_v48 = vld [vmem:[%s10405_s15 + $0x10] sm:$0xff] }
 0x238   : > { %2902 = vmatmul.mubr.f32.gmra.mrb[134].mxu1 %v2304_v18 }
 0x239   : > { %2906 = vmatprep.mubr.f32.mxu1 %v2313_v58  ;;  %v2068_v24 = vpop.f32.mrb[80].mxu1 }
 0x23a   : > { %6340 = vmatmul.mubr.msk.f32.gmra.mrb[86].mxu0 %vm1567_vm3, %v7864_v14  ;;  %v2320_v14 = vmul.f32 %v2050_v5, %v1467_v7  ;;  %v2070_v33 = vpop.f32.mrb[81].mxu1  ;;  %v2344_v62 = vmul.f32 %v2068_v24, %v1491_v26  ;;  %v1539_v5 = vld [vmem:[%s10405_s15 + $0x3a0] sm:$0xff]  ;;  %v1434_v26 = vld [vmem:[%s10405_s15 + $0x58] sm:$0xff] }
 0x23b   : > { %2245 = vmatprep.mubr.f32.mxu0 %v7484_v0  ;;  %v2345_v31 = vmul.f32 %v2070_v33, %v1492_v30  ;;  %v7142_v30 = vpack.c.bf16 %v2501_v43, %v2500_v10  ;;  %v2510_v10 = vld [vmem:[%s10403_s13 + $0x350] sm:$0xff]  ;;  %v2511_v43 = vld [vmem:[%s10403_s13 + $0x358] sm:$0xff] }
 0x23c   : > { %2907 = vmatmul.mubr.f32.gmra.mrb[136].mxu1 %v2312_v13 }
 0x23d   : > { %2911 = vmatprep.mubr.f32.mxu1 %v2321_v60  ;;  %v2074_v12 = vpop.f32.mrb[82].mxu1 }
 0x23e   : > { %6341 = vmatmul.mubr.msk.f32.gmra.mrb[88].mxu0 %vm1567_vm3, %v7872_v16  ;;  %v7468_v16 = vld [vmem:[%s10402_s12 + $0x60] sm:$0xff]  ;;  %v2076_v40 = vpop.f32.mrb[83].mxu1  ;;  %v2352_v41 = vmul.f32 %v2074_v12, %v1499_v17  ;;  %v1433_v17 = vld [vmem:[%s10405_s15 + $0x50] sm:$0xff] }
 0x23f   : > { %2251 = vmatprep.mubr.f32.mxu0 %v7484_v0  ;;  %v2353_v42 = vmul.f32 %v2076_v40, %v1500_v23  ;;  %v2520_v23 = vld [vmem:[%s10403_s13 + $0x3a0] sm:$0xff]  ;;  %v2521_v40 = vld [vmem:[%s10403_s13 + $0x3a8] sm:$0xff] }
 0x240   : > { %2912 = vmatmul.mubr.f32.gmra.mrb[138].mxu1 %v2320_v14 }
 0x241   : > { %2916 = vmatprep.mubr.f32.mxu1 %v2329_v4  ;;  %v2080_v34 = vpop.f32.mrb[84].mxu1 }
 0x242   : > { %6342 = vmatmul.mubr.msk.f32.gmra.mrb[90].mxu0 %vm1567_vm3, %v7468_v16  ;;  %v2082_v56 = vpop.f32.mrb[85].mxu1  ;;  %v2360_v11 = vmul.f32 %v2080_v34, %v1507_v47  ;;  %v1442_v34 = vld [vmem:[%s10405_s15 + $0x98] sm:$0xff] }
 0x243   : > { %2257 = vmatprep.mubr.f32.mxu0 %v7484_v0  ;;  %v2361_v49 = vmul.f32 %v2082_v56, %v1508_v46  ;;  %v7148_v46 = vpack.c.bf16 %v2521_v40, %v2520_v23  ;;  %v2504_v56 = vld [vmem:[%s10403_s13 + $0x320] sm:$0xff]  ;;  %v1473_v23 = vld [vmem:[%s10405_s15 + $0x190] sm:$0xff] }
 0x244   : > { %2917 = vmatmul.mubr.f32.gmra.mrb[140].mxu1 %v2328_v37 }
 0x245   : > { %2921 = vmatprep.mubr.f32.mxu1 %v2337_v38  ;;  %v2086_v50 = vpop.f32.mrb[86].mxu1  ;;  %v2518_v38 = vld [vmem:[%s10403_s13 + $0x390] sm:$0xff] }
 0x246   : > { %6343 = vmatmul.mubr.msk.f32.gmra.mrb[92].mxu0 %vm1567_vm3, %v7469_v45  ;;  %v2088_v63 = vpop.f32.mrb[87].mxu1  ;;  %v2368_v51 = vmul.f32 %v2086_v50, %v1515_v21  ;;  %v2519_v45 = vld [vmem:[%s10403_s13 + $0x398] sm:$0xff]  ;;  %v2522_v50 = vld [vmem:[%s10403_s13 + $0x3b0] sm:$0xff] }
 0x247   : > { %2263 = vmatprep.mubr.f32.mxu0 %v7484_v0  ;;  %v2369_v61 = vmul.f32 %v2088_v63, %v1516_v28  ;;  %v2523_v28 = vld [vmem:[%s10403_s13 + $0x3b8] sm:$0xff] }
 0x248   : > { %2922 = vmatmul.mubr.f32.gmra.mrb[142].mxu1 %v2336_v20 }
 0x249   : > { %2926 = vmatprep.mubr.f32.mxu1 %v2345_v31  ;;  %v2092_v52 = vpop.f32.mrb[88].mxu1  ;;  %v7144_v31 = vpack.c.bf16 %v2519_v45, %v2518_v38  ;;  %v3123_v38 = vlaneseq  ;;  %v2528_v45 = vld [vmem:[%s10403_s13 + $0x3e0] sm:$0xff] }
 0x24a   : > { %6344 = vmatmul.mubr.msk.f32.gmra.mrb[94].mxu0 %vm1567_vm3, %v7470_v32  ;;  %v2094_v54 = vpop.f32.mrb[89].mxu1  ;;  %v2376_v22 = vmul.f32 %v2092_v52, %v1523_v35  ;;  %v2502_v32 = vld [vmem:[%s10403_s13 + $0x310] sm:$0xff] }
 0x24b   : > { %2269 = vmatprep.mubr.f32.mxu0 %v7484_v0  ;;  %v2377_v18 = vmul.f32 %v2094_v54, %v1524_v53  ;;  %v1450_v53 = vld [vmem:[%s10405_s15 + $0xd8] sm:$0xff]  ;;  %v7152_v54 = vpack.c.bf16 %v2523_v28, %v2522_v50  ;;  %v2514_v28 = vld [vmem:[%s10403_s13 + $0x370] sm:$0xff] }
 0x24c   : > { %2927 = vmatmul.mubr.f32.gmra.mrb[144].mxu1 %v2344_v62  ;;  %v2503_v62 = vld [vmem:[%s10403_s13 + $0x318] sm:$0xff] }
 0x24d   : > { %2931 = vmatprep.mubr.f32.mxu1 %v2353_v42  ;;  %v2098_v25 = vpop.f32.mrb[90].mxu1 }
 0x24e   : > { %6345 = vmatmul.mubr.msk.f32.gmra.mrb[96].mxu0 %vm1567_vm3, %v7471_v19  ;;  %v2100_v39 = vpop.f32.mrb[91].mxu1  ;;  %v2384_v58 = vmul.f32 %v2098_v25, %v1531_v55  ;;  %v7146_v19 = vpack.c.bf16 %v2503_v62, %v2502_v32  ;;  %v1449_v25 = vld [vmem:[%s10405_s15 + $0xd0] sm:$0xff]  ;;  %v2512_v62 = vld [vmem:[%s10403_s13 + $0x360] sm:$0xff] }
 0x24f   : > { %v2385_v13 = vmul.f32 %v2100_v39, %v1532_v57  ;;  %v2524_v39 = vld [vmem:[%s10403_s13 + $0x3c0] sm:$0xff] }
 0x250   : > { %2932 = vmatmul.mubr.f32.gmra.mrb[146].mxu1 %v2352_v41 }
 0x251   : > { %2936 = vmatprep.mubr.f32.mxu1 %v2361_v49  ;;  %v2104_v59 = vpop.f32.mrb[92].mxu1  ;;  %v1441_v49 = vld [vmem:[%s10405_s15 + $0x90] sm:$0xff] }
 0x252   : > { %v2106_v7 = vpop.f32.mrb[93].mxu1  ;;  %v2392_v60 = vmul.f32 %v2104_v59, %v1539_v5 }
 0x253   : > { %v2393_v14 = vmul.f32 %v2106_v7, %v1540_v36  ;;  %v1458_v7 = vld [vmem:[%s10405_s15 + $0x118] sm:$0xff] }
 0x254   : > { %2937 = vmatmul.mubr.f32.gmra.mrb[148].mxu1 %v2360_v11  ;;  %v2505_v11 = vld [vmem:[%s10403_s13 + $0x328] sm:$0xff] }
 0x255   : > { %2941 = vmatprep.mubr.f32.mxu1 %v2369_v61  ;;  %v2110_v29 = vpop.f32.mrb[94].mxu1  ;;  %v7150_v61 = vpack.c.bf16 %v2505_v11, %v2504_v56 }
 0x256   : > { %v2112_v44 = vpop.f32.mrb[95].mxu1  ;;  %v2400_v2 = vmul.f32 %v2110_v29, %v1547_v1  ;;  %v2509_v1 = vld [vmem:[%s10403_s13 + $0x348] sm:$0xff]  ;;  %v1457_v29 = vld [vmem:[%s10405_s15 + $0x110] sm:$0xff] }
 0x257   : > { %v2401_v37 = vmul.f32 %v2112_v44, %v1548_v15  ;;  %v2526_v44 = vld [vmem:[%s10403_s13 + $0x3d0] sm:$0xff] }
 0x258   : > { %2942 = vmatmul.mubr.f32.gmra.mrb[150].mxu1 %v2368_v51 }
 0x259   : > { %2946 = vmatprep.mubr.f32.mxu1 %v2377_v18  ;;  %v2507_v18 = vld [vmem:[%s10403_s13 + $0x338] sm:$0xff] }
 0x25c   : > { %2947 = vmatmul.mubr.f32.gmra.mrb[152].mxu1 %v2376_v22  ;;  %v2506_v22 = vld [vmem:[%s10403_s13 + $0x330] sm:$0xff] }
 0x25d   : > { %2951 = vmatprep.mubr.f32.mxu1 %v2385_v13  ;;  %v7154_v59 = vpack.c.bf16 %v2507_v18, %v2506_v22  ;;  %v1490_v18 = vld [vmem:[%s10405_s15 + $0x218] sm:$0xff] }
 0x260   : > { %2952 = vmatmul.mubr.f32.gmra.mrb[154].mxu1 %v2384_v58  ;;  %v2525_v58 = vld [vmem:[%s10403_s13 + $0x3c8] sm:$0xff] }
 0x261   : > { %2956 = vmatprep.mubr.f32.mxu1 %v2393_v14  ;;  %v2508_v14 = vld [vmem:[%s10403_s13 + $0x340] sm:$0xff] }
 0x264   : > { %2957 = vmatmul.mubr.f32.gmra.mrb[156].mxu1 %v2392_v60  ;;  %v7156_v60 = vpack.c.bf16 %v2525_v58, %v2524_v39 }
 0x265   : > { %2961 = vmatprep.mubr.f32.mxu1 %v2401_v37 }
 0x268   : > { %2962 = vmatmul.mubr.f32.gmra.mrb[158].mxu1 %v2400_v2  ;;  %v2527_v2 = vld [vmem:[%s10403_s13 + $0x3d8] sm:$0xff] }
 0x2a1   : > { %v1409_v4 = vpop.f32.mrb[32].mxu0 }
 0x2a2   : > { %v1413_v16 = vsub.f32 0.0, %v1409_v4  ;;  %v6904_v8 = vpop.f32.mrb[33].mxu0 }
 0x2a4   : > { %v1414_v3 = vmul.f32 1.442695, %v1413_v16  ;;  %v7158_v16 = vpack.c.bf16 %v2509_v1, %v2508_v14  ;;  %v1497_v1 = vld [vmem:[%s10405_s15 + $0x250] sm:$0xff] }
 0x2a5   : > { %v1859_v27 = vpop.f32.mrb[34].mxu0 }
 0x2a6   : > { %7452 = vpow2.f32 %v1414_v3  ;;  %v1861_v20 = vpop.f32.mrb[35].mxu0  ;;  %v2278_v33 = vmul.f32 %v1859_v27, %v1425_v48  ;;  %v1466_v3 = vld [vmem:[%s10405_s15 + $0x158] sm:$0xff]  ;;  %v1465_v48 = vld [vmem:[%s10405_s15 + $0x150] sm:$0xff] }
 0x2a7   : > { %v2279_v24 = vmul.f32 %v1861_v20, %v1426_v9  ;;  %v7160_v9 = vpack.c.bf16 %v2527_v2, %v2526_v44  ;;  %v2529_v20 = vld [vmem:[%s10403_s13 + $0x3e8] sm:$0xff] }
 0x2a8   : > { %v7164_v32 = vpack.c.bf16 %v2529_v20, %v2528_v45  ;;  %v1505_v45 = vld [vmem:[%s10405_s15 + $0x290] sm:$0xff] }
 0x2a9   : > { %v1865_v12 = vpop.f32.mrb[36].mxu0  ;;  %2741 = vmatprep.mubr.f32.mxu0 %v2279_v24 }
 0x2aa   : > { %v1867_v41 = vpop.f32.mrb[37].mxu0  ;;  %2742 = vmatmul.mubr.f32.vlgmr.msra.gmra.mrb[98].mxu0 %v2278_v33  ;;  %v2286_v47 = vmul.f32 %v1865_v12, %v1433_v17  ;;  %v7162_v33 = vpack.c.bf16 %v2511_v43, %v2510_v10  ;;  %v2513_v17 = vld [vmem:[%s10403_s13 + $0x368] sm:$0xff]  ;;  %v1506_v10 = vld [vmem:[%s10405_s15 + $0x298] sm:$0xff] }
 0x2ab   : > { %v2287_v42 = vmul.f32 %v1867_v41, %v1434_v26  ;;  %7143 = vmatpush3.bf16.msra.mxu0 %v7142_v30  ;;  %v8727_v41 = vshrl.u32 %v3123_v38, 7  ;;  %v7166_v56 = vpack.c.bf16 %v2513_v17, %v2512_v62  ;;  %v3186_v38 = vld [vmem:[%s10400_s10 + $0x48] sm:$0xff]  ;;  %v1514_v62 = vld [vmem:[%s10405_s15 + $0x2d8] sm:$0xff] }
 0x2ac   : > { %7145 = vmatprep.subr.bf16.mxu0 %v7144_v31  ;;  %v1474_v31 = vld [vmem:[%s10405_s15 + $0x198] sm:$0xff] }
 0x2ad   : > { %v1871_v21 = vpop.f32.mrb[38].mxu0  ;;  %2746 = vmatprep.mubr.f32.mxu0 %v2287_v42  ;;  %10430 = vst [vmem:[#allocation2_spill] sm:$0xff] %v8727_v41  ;;  %v2530_v42 = vld [vmem:[%s10403_s13 + $0x3f0] sm:$0xff] }
 0x2ae   : > { %v1873_v63 = vpop.f32.mrb[39].mxu0  ;;  %2747 = vmatmul.mubr.f32.gmra.mrb[100].mxu0 %v2286_v47  ;;  %v2294_v52 = vmul.f32 %v1871_v21, %v1441_v49  ;;  %v1482_v21 = vld [vmem:[%s10405_s15 + $0x1d8] sm:$0xff] }
 0x2af   : > { %v2295_v51 = vmul.f32 %v1873_v63, %v1442_v34  ;;  %7147 = vmatpush3.bf16.msra.mxu0 %v7146_v19  ;;  %v2531_v19 = vld [vmem:[%s10403_s13 + $0x3f8] sm:$0xff] }
 0x2b0   : > { %v7453_v35 = vpop.eup %7452  ;;  %7149 = vmatprep.subr.bf16.mxu0 %v7148_v46  ;;  %v7168_v50 = vpack.c.bf16 %v2531_v19, %v2530_v42  ;;  %v2515_v63 = vld [vmem:[%s10403_s13 + $0x378] sm:$0xff]  ;;  %v1513_v19 = vld [vmem:[%s10405_s15 + $0x2d0] sm:$0xff] }
 0x2b1   : > { %v1416_v55 = vadd.f32 1.0, %v7453_v35  ;;  %v1877_v57 = vpop.f32.mrb[40].mxu0  ;;  %2751 = vmatprep.mubr.f32.mxu0 %v2295_v51  ;;  %v1481_v51 = vld [vmem:[%s10405_s15 + $0x1d0] sm:$0xff]  ;;  %v3195_v35 = vsub.s32 1, %v8727_v41  ;;  %v3188_v42 = vld [vmem:[%s10400_s10 + $0x58] sm:$0xff] }
 0x2b2   : > { %v1879_v13 = vpop.f32.mrb[41].mxu0  ;;  %2752 = vmatmul.mubr.f32.gmra.mrb[102].mxu0 %v2294_v52  ;;  %v2302_v36 = vmul.f32 %v1877_v57, %v1449_v25  ;;  %v1489_v57 = vld [vmem:[%s10405_s15 + $0x210] sm:$0xff] }
 0x2b3   : > { %7454 = vrcp.f32 %v1416_v55  ;;  %v2303_v5 = vmul.f32 %v1879_v13, %v1450_v53  ;;  %7151 = vmatpush3.bf16.msra.mxu0 %v7150_v61  ;;  %v3125_v55 = vsub.s32 2, %v8727_v41  ;;  %v3180_v13 = vld [vmem:[%s10400_s10 + $0x18] sm:$0xff] }
 0x2b4   : > { %7153 = vmatprep.subr.bf16.mxu0 %v7152_v54  ;;  %v7170_v54 = vpack.c.bf16 %v2515_v63, %v2514_v28  ;;  %v1522_v28 = vld [vmem:[%s10405_s15 + $0x318] sm:$0xff] }
 0x2b5   : > { %v1883_v15 = vpop.f32.mrb[42].mxu0  ;;  %2756 = vmatprep.mubr.f32.mxu0 %v2303_v5  ;;  %v3182_v5 = vld [vmem:[%s10400_s10 + $0x28] sm:$0xff] }
 0x2b6   : > { %v1885_v37 = vpop.f32.mrb[43].mxu0  ;;  %2757 = vmatmul.mubr.f32.gmra.mrb[104].mxu0 %v2302_v36  ;;  %v2310_v8 = vmul.f32 %v1883_v15, %v1457_v29 }
 0x2b7   : > { %v2311_v4 = vmul.f32 %v1885_v37, %v1458_v7  ;;  %7155 = vmatpush3.bf16.msra.mxu0 %v7154_v59  ;;  %v3131_v37 = vld [vmem:[%s10399_s9] sm:$0xff] }
 0x2b8   : > { %7157 = vmatprep.subr.bf16.mxu0 %v7156_v60  ;;  %v1498_v60 = vld [vmem:[%s10405_s15 + $0x258] sm:$0xff] }
 0x2b9   : > { %v1889_v27 = vpop.f32.mrb[44].mxu0  ;;  %2761 = vmatprep.mubr.f32.mxu0 %v2311_v4  ;;  %v3184_v4 = vld [vmem:[%s10400_s10 + $0x38] sm:$0xff] }
 0x2ba   : > { %v1891_v24 = vpop.f32.mrb[45].mxu0  ;;  %2762 = vmatmul.mubr.f32.gmra.mrb[106].mxu0 %v2310_v8  ;;  %v2318_v26 = vmul.f32 %v1889_v27, %v1465_v48 }
 0x2bb   : > { %v2319_v30 = vmul.f32 %v1891_v24, %v1466_v3  ;;  %7159 = vmatpush3.bf16.msra.mxu0 %v7158_v16  ;;  %v3132_v24 = vld [vmem:[%s10399_s9 + $0x8] sm:$0xff] }
 0x2bc   : > { %7161 = vmatprep.subr.bf16.mxu0 %v7160_v9 }
 0x2bd   : > { %v7455_v12 = vpop.eup %7454  ;;  %v1895_v40 = vpop.f32.mrb[46].mxu0  ;;  %2766 = vmatprep.mubr.f32.mxu0 %v2319_v30  ;;  %v3177_v30 = vld [vmem:[%s10400_s10] sm:$0xff] }
 0x2be   : > { %7456 = vrcp.f32 %v7455_v12  ;;  %v1897_v47 = vpop.f32.mrb[47].mxu0  ;;  %2767 = vmatmul.mubr.f32.gmra.mrb[108].mxu0 %v2318_v26  ;;  %v1419_v34 = vmul.f32 2.0, %v7455_v12  ;;  %v2326_v11 = vmul.f32 %v1895_v40, %v1473_v23 }
 0x2bf   : > { %v2327_v46 = vmul.f32 %v1897_v47, %v1474_v31  ;;  %7163 = vmatpush3.bf16.msra.mxu0 %v7162_v33 }
 0x2c0   : > { %v6273_v49 = vadd.f32 -1.0, %v1419_v34  ;;  %7165 = vmatprep.subr.bf16.mxu0 %v7164_v32  ;;  %v3133_v34 = vld [vmem:[%s10399_s9 + $0x10] sm:$0xff] }
 0x2c1   : > { %v1901_v61 = vpop.f32.mrb[48].mxu0  ;;  %2771 = vmatprep.mubr.f32.mxu0 %v2327_v46 }
 0x2c2   : > { %3115 = vperm.xlu0 %7438, %v6273_v49   ;;  %v1903_v52 = vpop.f32.mrb[49].mxu0  ;;  %2772 = vmatmul.mubr.f32.gmra.mrb[110].mxu0 %v2326_v11  ;;  %v2334_v22 = vmul.f32 %v1901_v61, %v1481_v51  ;;  %v8752_v25 = vrot.slane %v6273_v49, %v3195_v35 }
 0x2c3   : > { %v2335_v53 = vmul.f32 %v1903_v52, %v1482_v21  ;;  %7167 = vmatpush3.bf16.msra.mxu0 %v7166_v56  ;;  %v3178_v56 = vld [vmem:[%s10400_s10 + $0x8] sm:$0xff] }
 0x2c4   : > { %7169 = vmatprep.subr.bf16.mxu0 %v7168_v50  ;;  %v3200_v15 = vsub.f32 %v3180_v13, %v8752_v25  ;;  %v3202_v44 = vsub.f32 %v3182_v5, %v8752_v25  ;;  %v3204_v27 = vsub.f32 %v3184_v4, %v8752_v25  ;;  %v3206_v17 = vsub.f32 %v3186_v38, %v8752_v25  ;;  %v3190_v52 = vld [vmem:[%s10400_s10 + $0x68] sm:$0xff] }
 0x2c5   : > { %v1907_v39 = vpop.f32.mrb[50].mxu0  ;;  %2776 = vmatprep.mubr.f32.mxu0 %v2335_v53  ;;  %v3197_v40 = vsub.f32 %v3177_v30, %v8752_v25  ;;  %v3208_v63 = vsub.f32 %v3188_v42, %v8752_v25  ;;  %v3198_v35 = vsub.f32 %v3178_v56, %v8752_v25  ;;  %v1521_v53 = vld [vmem:[%s10405_s15 + $0x310] sm:$0xff] }
 0x2c6   : > { %v1909_v58 = vpop.f32.mrb[51].mxu0  ;;  %2777 = vmatmul.mubr.f32.gmra.mrb[112].mxu0 %v2334_v22  ;;  %v2342_v7 = vmul.f32 %v1907_v39, %v1489_v57  ;;  %v3134_v22 = vld [vmem:[%s10399_s9 + $0x18] sm:$0xff]  ;;  %v3179_v39 = vld [vmem:[%s10400_s10 + $0x10] sm:$0xff] }
 0x2c7   : > { %v2343_v59 = vmul.f32 %v1909_v58, %v1490_v18  ;;  %7171 = vmatpush3.bf16.msra.mxu0 %v7170_v54  ;;  %v1537_v30 = vld [vmem:[%s10405_s15 + $0x390] sm:$0xff] }
 0x2c8   : > { %v7457_v36 = vpop.eup %7456 }
 0x2c9   : > { %v8768_v14 = vrot.slane %v7457_v36, %v3125_v55  ;;  %3121 = vperm.xlu1 %7439, %v7457_v36   ;;  %v1913_v29 = vpop.f32.mrb[52].mxu0  ;;  %2781 = vmatprep.mubr.f32.mxu0 %v2343_v59  ;;  %v1530_v36 = vld [vmem:[%s10405_s15 + $0x358] sm:$0xff] }
 0x2ca   : > { %v1915_v2 = vpop.f32.mrb[53].mxu0  ;;  %2782 = vmatmul.mubr.f32.gmra.mrb[114].mxu0 %v2342_v7  ;;  %v2350_v9 = vmul.f32 %v1913_v29, %v1497_v1  ;;  %v3210_v7 = vsub.f32 %v3190_v52, %v8752_v25  ;;  %v3199_v29 = vsub.f32 %v3179_v39, %v8752_v25 }
 0x2cb   : > { %v2351_v16 = vmul.f32 %v1915_v2, %v1498_v60  ;;  %v3220_v8 = vmul.f32 %v8768_v14, %v3200_v15  ;;  %v3222_v3 = vmul.f32 %v8768_v14, %v3202_v44  ;;  %v3224_v32 = vmul.f32 %v8768_v14, %v3204_v27  ;;  %v3192_v15 = vld [vmem:[%s10400_s10 + $0x78] sm:$0xff]  ;;  %v1529_v44 = vld [vmem:[%s10405_s15 + $0x350] sm:$0xff] }
 0x2cc   : > { %v3226_v46 = vmul.f32 %v8768_v14, %v3206_v17  ;;  %v3217_v50 = vmul.f32 %v8768_v14, %v3197_v40  ;;  %v3228_v57 = vmul.f32 %v8768_v14, %v3208_v63  ;;  %v3218_v59 = vmul.f32 %v8768_v14, %v3198_v35  ;;  %v1546_v40 = vld [vmem:[%s10405_s15 + $0x3d8] sm:$0xff] }
 0x2cd   : > { %3143 = vperm.xlu1 %7439, %v3131_v37   ;;  %v1919_v43 = vpop.f32.mrb[54].mxu0  ;;  %2786 = vmatprep.mubr.f32.mxu0 %v2351_v16  ;;  %v3236_v48 = vadd.f32 1.0, %v3220_v8  ;;  %v3238_v31 = vadd.f32 1.0, %v3222_v3  ;;  %v3240_v21 = vadd.f32 1.0, %v3224_v32  ;;  %v3230_v16 = vmul.f32 %v8768_v14, %v3210_v7  ;;  %v3181_v8 = vld [vmem:[%s10400_s10 + $0x20] sm:$0xff] }
 0x2ce   : > { %v1921_v20 = vpop.f32.mrb[55].mxu0  ;;  %2787 = vmatmul.mubr.f32.gmra.mrb[116].mxu0 %v2350_v9  ;;  %v2358_v12 = vmul.f32 %v1919_v43, %v1505_v45  ;;  %v3242_v18 = vadd.f32 1.0, %v3226_v46  ;;  %v3233_v5 = vadd.f32 1.0, %v3217_v50  ;;  %v3244_v4 = vadd.f32 1.0, %v3228_v57  ;;  %v1545_v46 = vld [vmem:[%s10405_s15 + $0x3d0] sm:$0xff] }
 0x2cf   : > { %v2359_v33 = vmul.f32 %v1921_v20, %v1506_v10  ;;  %v3252_v26 = vmul.f32 15.5, %v3236_v48  ;;  %v3254_v49 = vmul.f32 15.5, %v3238_v31  ;;  %v3256_v13 = vmul.f32 15.5, %v3240_v21  ;;  %v1538_v48 = vld [vmem:[%s10405_s15 + $0x398] sm:$0xff] }
 0x2d0   : > { %v3258_v37 = vmul.f32 15.5, %v3242_v18  ;;  %v3249_v9 = vmul.f32 15.5, %v3233_v5  ;;  %v3234_v10 = vadd.f32 1.0, %v3218_v59  ;;  %v3219_v43 = vmul.f32 %v8768_v14, %v3199_v29  ;;  %v1429_v18 = vld [vmem:[%s10405_s15 + $0x30] sm:$0xff] }
 0x2d1   : > { %3148 = vperm.xlu1 %7439, %v3132_v24   ;;  %3298 = vperm.xlu0 %7438, %v3252_v26   ;;  %v1925_v23 = vpop.f32.mrb[56].mxu0  ;;  %v3212_v27 = vsub.f32 %v3192_v15, %v8752_v25  ;;  %v3201_v20 = vsub.f32 %v3181_v8, %v8752_v25  ;;  %v3183_v24 = vld [vmem:[%s10400_s10 + $0x30] sm:$0xff]  ;;  %v3260_v26 = vmul.f32 15.5, %v3244_v4  ;;  %v3246_v31 = vadd.f32 1.0, %v3230_v16 }
 0x2d2   : > { %2791 = vmatprep.mubr.f32.mxu0 %v2359_v33  ;;  %v1927_v47 = vpop.f32.mrb[57].mxu0  ;;  %v2366_v51 = vmul.f32 %v1925_v23, %v1513_v19  ;;  %v3250_v17 = vmul.f32 15.5, %v3234_v10  ;;  %v3203_v42 = vsub.f32 %v3183_v24, %v8752_v25  ;;  %v1437_v16 = vld [vmem:[%s10405_s15 + $0x70] sm:$0xff] }
 0x2d3   : > { %v2367_v11 = vmul.f32 %v1927_v47, %v1514_v62  ;;  %2792 = vmatmul.mubr.f32.gmra.mrb[118].mxu0 %v2358_v12  ;;  %v3232_v32 = vmul.f32 %v8768_v14, %v3212_v27  ;;  %v3235_v12 = vadd.f32 1.0, %v3219_v43  ;;  %v3221_v23 = vmul.f32 %v8768_v14, %v3201_v20 }
 0x2d5   : > { %3153 = vperm.xlu1 %7439, %v3133_v34   ;;  %3308 = vperm.xlu0 %7438, %v3254_v49   ;;  %v1931_v61 = vpop.f32.mrb[58].mxu0  ;;  %v3185_v34 = vld [vmem:[%s10400_s10 + $0x40] sm:$0xff]  ;;  %v3223_v49 = vmul.f32 %v8768_v14, %v3203_v42  ;;  %v3251_v50 = vmul.f32 15.5, %v3235_v12  ;;  %v3237_v63 = vadd.f32 1.0, %v3221_v23 }
 0x2d6   : > { %2796 = vmatprep.mubr.f32.mxu0 %v2367_v11  ;;  %v1933_v54 = vpop.f32.mrb[59].mxu0  ;;  %v2374_v60 = vmul.f32 %v1931_v61, %v1521_v53  ;;  %v3262_v11 = vmul.f32 15.5, %v3246_v31  ;;  %v1430_v61 = vld [vmem:[%s10405_s15 + $0x38] sm:$0xff]  ;;  %v3205_v35 = vsub.f32 %v3185_v34, %v8752_v25 }
 0x2d7   : > { %v2375_v58 = vmul.f32 %v1933_v54, %v1522_v28  ;;  %2797 = vmatmul.mubr.f32.gmra.mrb[120].mxu0 %v2366_v51  ;;  %v3248_v28 = vadd.f32 1.0, %v3232_v32  ;;  %v6525_v51 = vpop.f32.mrb[96].mxu1  ;;  %v3253_v59 = vmul.f32 15.5, %v3237_v63  ;;  %v1453_v63 = vld [vmem:[%s10405_s15 + $0xf0] sm:$0xff] }
 0x2d8   : > { %v6526_v52 = vpop.f32.mrb[97].mxu1  ;;  %v3225_v39 = vmul.f32 %v8768_v14, %v3205_v35 }
 0x2d9   : > { %3158 = vperm.xlu1 %7439, %v3134_v22   ;;  %3318 = vperm.xlu0 %7438, %v3256_v13   ;;  %v1937_v1 = vpop.f32.mrb[60].mxu0  ;;  %v8882_v22 = vadd.f32 %v6526_v52, %v6525_v51  ;;  %v3264_v5 = vmul.f32 15.5, %v3248_v28  ;;  %v6528_v7 = vpop.f32.mrb[98].mxu1 }
 0x2da   : > { %2801 = vmatprep.mubr.f32.mxu0 %v2375_v58  ;;  %v1939_v2 = vpop.f32.mrb[61].mxu0  ;;  %v2382_v38 = vmul.f32 %v1937_v1, %v1529_v44  ;;  %v3187_v58 = vld [vmem:[%s10400_s10 + $0x50] sm:$0xff]  ;;  %v6529_v1 = vpop.f32.mrb[99].mxu1 }
 0x2db   : > { %v2383_v3 = vmul.f32 %v1939_v2, %v1530_v36  ;;  %2802 = vmatmul.mubr.f32.gmra.mrb[122].mxu0 %v2374_v60  ;;  %v3239_v36 = vadd.f32 1.0, %v3223_v49  ;;  %v1438_v60 = vld [vmem:[%s10405_s15 + $0x78] sm:$0xff]  ;;  %v3207_v44 = vsub.f32 %v3187_v58, %v8752_v25  ;;  %v3189_v2 = vld [vmem:[%s10400_s10 + $0x60] sm:$0xff]  ;;  %v6531_v4 = vpop.f32.mrb[100].mxu1 }
 0x2dc   : > { %v3209_v20 = vsub.f32 %v3189_v2, %v8752_v25  ;;  %v1470_v2 = vld [vmem:[%s10405_s15 + $0x178] sm:$0xff] }
 0x2dd   : > { %3328 = vperm.xlu0 %7438, %v3258_v37   ;;  %3283 = vperm.xlu1 %7439, %v3249_v9   ;;  %v1943_v45 = vpop.f32.mrb[62].mxu0  ;;  %v8898_v37 = vadd.f32 %v6529_v1, %v6528_v7  ;;  %v6532_v9 = vpop.f32.mrb[101].mxu1  ;;  %v3255_v43 = vmul.f32 15.5, %v3239_v36 }
 0x2de   : > { %2806 = vmatprep.mubr.f32.mxu0 %v2383_v3  ;;  %v1945_v33 = vpop.f32.mrb[63].mxu0  ;;  %v2390_v19 = vmul.f32 %v1943_v45, %v1537_v30  ;;  %v3241_v3 = vadd.f32 1.0, %v3225_v39  ;;  %v8904_v27 = vadd.f32 %v6532_v9, %v6531_v4  ;;  %v1446_v45 = vld [vmem:[%s10405_s15 + $0xb8] sm:$0xff]  ;;  %v3229_v12 = vmul.f32 %v8768_v14, %v3209_v20 }
 0x2df   : > { %v2391_v62 = vmul.f32 %v1945_v33, %v1538_v48  ;;  %2807 = vmatmul.mubr.f32.gmra.mrb[124].mxu0 %v2382_v38  ;;  %v3227_v48 = vmul.f32 %v8768_v14, %v3207_v44  ;;  %v6534_v38 = vpop.f32.mrb[102].mxu1 }
 0x2e0   : > { %v6535_v24 = vpop.f32.mrb[103].mxu1  ;;  %v3257_v42 = vmul.f32 15.5, %v3241_v3 }
 0x2e1   : > { %3338 = vperm.xlu0 %7438, %v3260_v26   ;;  %3288 = vperm.xlu1 %7439, %v3250_v17   ;;  %v1949_v47 = vpop.f32.mrb[64].mxu0  ;;  %v3191_v26 = vld [vmem:[%s10400_s10 + $0x70] sm:$0xff]  ;;  %v8913_v31 = vadd.f32 %v6535_v24, %v6534_v38  ;;  %v6537_v32 = vpop.f32.mrb[104].mxu1 }
 0x2e2   : > { %2811 = vmatprep.mubr.f32.mxu0 %v2391_v62  ;;  %v1951_v56 = vpop.f32.mrb[65].mxu0  ;;  %v2398_v53 = vmul.f32 %v1949_v47, %v1545_v46  ;;  %v1445_v62 = vld [vmem:[%s10405_s15 + $0xb0] sm:$0xff]  ;;  %v6538_v23 = vpop.f32.mrb[105].mxu1  ;;  %v1454_v46 = vld [vmem:[%s10405_s15 + $0xf8] sm:$0xff] }
 0x2e3   : > { %v2399_v21 = vmul.f32 %v1951_v56, %v1546_v40  ;;  %2812 = vmatmul.mubr.f32.gmra.mrb[126].mxu0 %v2390_v19  ;;  %v3243_v19 = vadd.f32 1.0, %v3227_v48  ;;  %v8919_v47 = vadd.f32 %v6538_v23, %v6537_v32  ;;  %v6540_v34 = vpop.f32.mrb[106].mxu1  ;;  %v3211_v56 = vsub.f32 %v3191_v26, %v8752_v25 }
 0x2e4   : > { %v3245_v25 = vadd.f32 1.0, %v3229_v12  ;;  %v1477_v12 = vld [vmem:[%s10405_s15 + $0x1b0] sm:$0xff] }
 0x2e5   : > { %3348 = vperm.xlu0 %7438, %v3262_v11   ;;  %3293 = vperm.xlu1 %7439, %v3251_v50   ;;  %v2181_v54 = vpop.f32.mrb[66].mxu0  ;;  %v6541_v11 = vpop.f32.mrb[107].mxu1 }
 0x2e6   : > { %2816 = vmatprep.mubr.f32.mxu0 %v2399_v21  ;;  %v2183_v57 = vpop.f32.mrb[67].mxu0  ;;  %v2282_v29 = vmul.f32 %v2181_v54, %v1429_v18  ;;  %v8925_v50 = vadd.f32 %v6541_v11, %v6540_v34  ;;  %v6543_v28 = vpop.f32.mrb[108].mxu1  ;;  %v3261_v1 = vmul.f32 15.5, %v3245_v25  ;;  %v1494_v25 = vld [vmem:[%s10405_s15 + $0x238] sm:$0xff] }
 0x2e7   : > { %v2283_v13 = vmul.f32 %v2183_v57, %v1430_v61  ;;  %2817 = vmatmul.mubr.f32.gmra.mrb[128].mxu0 %v2398_v53  ;;  %v3231_v61 = vmul.f32 %v8768_v14, %v3211_v56  ;;  %v6544_v35 = vpop.f32.mrb[109].mxu1  ;;  %v3259_v53 = vmul.f32 15.5, %v3243_v19  ;;  %v1462_v57 = vld [vmem:[%s10405_s15 + $0x138] sm:$0xff] }
 0x2e8   : > { %v8931_v54 = vadd.f32 %v6544_v35, %v6543_v28  ;;  %v6546_v18 = vpop.f32.mrb[110].mxu1 }
 0x2e9   : > { %3358 = vperm.xlu0 %7438, %v3264_v5   ;;  %3303 = vperm.xlu1 %7439, %v3253_v59   ;;  %v2187_v15 = vpop.f32.mrb[68].mxu0  ;;  %v6547_v39 = vpop.f32.mrb[111].mxu1  ;;  %v1461_v59 = vld [vmem:[%s10405_s15 + $0x130] sm:$0xff] }
 0x2ea   : > { %3031 = vmatprep.mubr.f32.mxu0 %v2283_v13  ;;  %v2189_v8 = vpop.f32.mrb[69].mxu0  ;;  %v2290_v30 = vmul.f32 %v2187_v15, %v1437_v16  ;;  %v8936_v5 = vadd.f32 %v6547_v39, %v6546_v18  ;;  %v6549_v14 = vpop.f32.mrb[112].mxu1 }
 0x2eb   : > { %v2291_v10 = vmul.f32 %v2189_v8, %v1438_v60  ;;  %3032 = vmatmul.mubr.f32.vlgmr.msra.gmra.mrb[130].mxu0 %v2282_v29  ;;  %v6550_v7 = vpop.f32.mrb[113].mxu1  ;;  %v3247_v29 = vadd.f32 1.0, %v3231_v61 }
 0x2ec   : > { %v8941_v15 = vadd.f32 %v6550_v7, %v6549_v14  ;;  %v6552_v44 = vpop.f32.mrb[114].mxu1  ;;  %v1493_v14 = vld [vmem:[%s10405_s15 + $0x230] sm:$0xff] }
 0x2ed   : > { %3313 = vperm.xlu1 %7439, %v3255_v43   ;;  %v2193_v33 = vpop.f32.mrb[70].mxu0  ;;  %3036 = vmatprep.mubr.f32.mxu0 %v2291_v10  ;;  %v6553_v4 = vpop.f32.mrb[115].mxu1  ;;  %v1469_v10 = vld [vmem:[%s10405_s15 + $0x170] sm:$0xff] }
 0x2ee   : > { %v2195_v17 = vpop.f32.mrb[71].mxu0  ;;  %v2298_v49 = vmul.f32 %v2193_v33, %v1445_v62  ;;  %v8946_v3 = vadd.f32 %v6553_v4, %v6552_v44  ;;  %v6555_v9 = vpop.f32.mrb[116].mxu1 }
 0x2ef   : > { %v2299_v40 = vmul.f32 %v2195_v17, %v1446_v45  ;;  %3037 = vmatmul.mubr.f32.gmra.mrb[132].mxu0 %v2290_v30  ;;  %v6556_v48 = vpop.f32.mrb[117].mxu1  ;;  %v3263_v45 = vmul.f32 15.5, %v3247_v29  ;;  %v1478_v30 = vld [vmem:[%s10405_s15 + $0x1b8] sm:$0xff] }
 0x2f0   : > { %v8951_v20 = vadd.f32 %v6556_v48, %v6555_v9  ;;  %v6558_v24 = vpop.f32.mrb[118].mxu1  ;;  %v1502_v29 = vld [vmem:[%s10405_s15 + $0x278] sm:$0xff]  ;;  %v1501_v9 = vld [vmem:[%s10405_s15 + $0x270] sm:$0xff] }
 0x2f1   : > { %3323 = vperm.xlu1 %7439, %v3257_v42   ;;  %v2199_v21 = vpop.f32.mrb[72].mxu0  ;;  %3041 = vmatprep.mubr.f32.mxu0 %v2299_v40  ;;  %v6559_v33 = vpop.f32.mrb[119].mxu1 }
 0x2f2   : > { %v2201_v51 = vpop.f32.mrb[73].mxu0  ;;  %v2306_v58 = vmul.f32 %v2199_v21, %v1453_v63  ;;  %v8956_v62 = vadd.f32 %v6559_v33, %v6558_v24  ;;  %v6561_v17 = vpop.f32.mrb[120].mxu1  ;;  %v1485_v63 = vld [vmem:[%s10405_s15 + $0x1f0] sm:$0xff] }
 0x2f3   : > { %v2307_v52 = vmul.f32 %v2201_v51, %v1454_v46  ;;  %3042 = vmatmul.mubr.f32.gmra.mrb[134].mxu0 %v2298_v49  ;;  %v6562_v40 = vpop.f32.mrb[121].mxu1  ;;  %v1486_v46 = vld [vmem:[%s10405_s15 + $0x1f8] sm:$0xff] }
 0x2f4   : > { %v8961_v19 = vadd.f32 %v6562_v40, %v6561_v17  ;;  %v6564_v34 = vpop.f32.mrb[122].mxu1  ;;  %v1518_v40 = vld [vmem:[%s10405_s15 + $0x2f8] sm:$0xff] }
 0x2f5   : > { %3333 = vperm.xlu1 %7439, %v3259_v53   ;;  %v2205_v13 = vpop.f32.mrb[74].mxu0  ;;  %3046 = vmatprep.mubr.f32.mxu0 %v2307_v52  ;;  %v6565_v56 = vpop.f32.mrb[123].mxu1 }
 0x2f6   : > { %v2207_v36 = vpop.f32.mrb[75].mxu0  ;;  %v2314_v16 = vmul.f32 %v2205_v13, %v1461_v59  ;;  %v8966_v21 = vadd.f32 %v6565_v56, %v6564_v34  ;;  %v1517_v56 = vld [vmem:[%s10405_s15 + $0x2f0] sm:$0xff] }
 0x2f7   : > { %v2315_v60 = vmul.f32 %v2207_v36, %v1462_v57  ;;  %3047 = vmatmul.mubr.f32.gmra.mrb[136].mxu0 %v2306_v58  ;;  %v6567_v28 = vpop.f32.mrb[124].mxu1 }
 0x2f8   : > { %v6568_v61 = vpop.f32.mrb[125].mxu1 }
 0x2f9   : > { %3343 = vperm.xlu1 %7439, %v3261_v1   ;;  %v2211_v8 = vpop.f32.mrb[76].mxu0  ;;  %3051 = vmatprep.mubr.f32.mxu0 %v2315_v60  ;;  %v8971_v52 = vadd.f32 %v6568_v61, %v6567_v28 }
 0x2fa   : > { %v2213_v43 = vpop.f32.mrb[77].mxu0  ;;  %v2322_v26 = vmul.f32 %v2211_v8, %v1469_v10 }
 0x2fb   : > { %v2323_v38 = vmul.f32 %v2213_v43, %v1470_v2  ;;  %3052 = vmatmul.mubr.f32.gmra.mrb[138].mxu0 %v2314_v16  ;;  %v6570_v53 = vpop.f32.mrb[126].mxu1 }
 0x2fc   : > { %v6571_v18 = vpop.f32.mrb[127].mxu1 }
 0x2fd   : > { %3353 = vperm.xlu1 %7439, %v3263_v45   ;;  %v2217_v32 = vpop.f32.mrb[78].mxu0  ;;  %3056 = vmatprep.mubr.f32.mxu0 %v2323_v38  ;;  %v8976_v58 = vadd.f32 %v6571_v18, %v6570_v53  ;;  %v1510_v45 = vld [vmem:[%s10405_s15 + $0x2b8] sm:$0xff] }
 0x2fe   : > { %v2219_v23 = vpop.f32.mrb[79].mxu0  ;;  %v2330_v11 = vmul.f32 %v2217_v32, %v1477_v12 }
 0x2ff   : > { %v2331_v42 = vmul.f32 %v2219_v23, %v1478_v30  ;;  %3057 = vmatmul.mubr.f32.gmra.mrb[140].mxu0 %v2322_v26  ;;  %v6685_v13 = vpop.f32.mrb[128].mxu1  ;;  %v1509_v26 = vld [vmem:[%s10405_s15 + $0x2b0] sm:$0xff] }
 0x300   : > { %v6686_v36 = vpop.f32.mrb[129].mxu1 }
 0x301   : > { %v2223_v49 = vpop.f32.mrb[80].mxu0  ;;  %3061 = vmatprep.mubr.f32.mxu0 %v2331_v42  ;;  %v8981_v60 = vadd.f32 %v6686_v36, %v6685_v13 }
 0x302   : > { %v2225_v51 = vpop.f32.mrb[81].mxu0  ;;  %v2338_v57 = vmul.f32 %v2223_v49, %v1485_v63 }
 0x303   : > { %v2339_v35 = vmul.f32 %v2225_v51, %v1486_v46  ;;  %3062 = vmatmul.mubr.f32.gmra.mrb[142].mxu0 %v2330_v11  ;;  %v6688_v1 = vpop.f32.mrb[130].mxu1  ;;  %v1526_v51 = vld [vmem:[%s10405_s15 + $0x338] sm:$0xff] }
 0x304   : > { %v6689_v44 = vpop.f32.mrb[131].mxu1 }
 0x305   : > { %v2229_v39 = vpop.f32.mrb[82].mxu0  ;;  %3066 = vmatprep.mubr.f32.mxu0 %v2339_v35  ;;  %v8986_v16 = vadd.f32 %v6689_v44, %v6688_v1  ;;  %v1533_v1 = vld [vmem:[%s10405_s15 + $0x370] sm:$0xff] }
 0x306   : > { %v2231_v59 = vpop.f32.mrb[83].mxu0  ;;  %v2346_v2 = vmul.f32 %v2229_v39, %v1493_v14  ;;  %v1534_v14 = vld [vmem:[%s10405_s15 + $0x378] sm:$0xff] }
 0x307   : > { %v2347_v7 = vmul.f32 %v2231_v59, %v1494_v25  ;;  %3067 = vmatmul.mubr.f32.gmra.mrb[144].mxu0 %v2338_v57  ;;  %v6691_v8 = vpop.f32.mrb[132].mxu1  ;;  %v1525_v25 = vld [vmem:[%s10405_s15 + $0x330] sm:$0xff] }
 0x308   : > { %v6692_v43 = vpop.f32.mrb[133].mxu1 }
 0x309   : > { %v2235_v4 = vpop.f32.mrb[84].mxu0  ;;  %3071 = vmatprep.mubr.f32.mxu0 %v2347_v7  ;;  %v8991_v38 = vadd.f32 %v6692_v43, %v6691_v8  ;;  %v1542_v8 = vld [vmem:[%s10405_s15 + $0x3b8] sm:$0xff] }
 0x30a   : > { %v2237_v10 = vpop.f32.mrb[85].mxu0  ;;  %v2354_v24 = vmul.f32 %v2235_v4, %v1501_v9 }
 0x30b   : > { %v2355_v48 = vmul.f32 %v2237_v10, %v1502_v29  ;;  %3072 = vmatmul.mubr.f32.gmra.mrb[146].mxu0 %v2346_v2  ;;  %v6694_v33 = vpop.f32.mrb[134].mxu1 }
 0x30c   : > { %v6695_v17 = vpop.f32.mrb[135].mxu1 }
 0x30d   : > { %v2241_v30 = vpop.f32.mrb[86].mxu0  ;;  %3076 = vmatprep.mubr.f32.mxu0 %v2355_v48  ;;  %v8999_v23 = vadd.f32 %v6695_v17, %v6694_v33  ;;  %v1541_v48 = vld [vmem:[%s10405_s15 + $0x3b0] sm:$0xff] }
 0x30e   : > { %v2243_v32 = vpop.f32.mrb[87].mxu0  ;;  %v2362_v42 = vmul.f32 %v2241_v30, %v1509_v26  ;;  %v1550_v26 = vld [vmem:[%s10405_s15 + $0x3f8] sm:$0xff] }
 0x30f   : > { %v2363_v12 = vmul.f32 %v2243_v32, %v1510_v45  ;;  %3077 = vmatmul.mubr.f32.gmra.mrb[148].mxu0 %v2354_v24  ;;  %v6697_v46 = vpop.f32.mrb[136].mxu1 }
 0x310   : > { %v6698_v49 = vpop.f32.mrb[137].mxu1 }
 0x311   : > { %v2247_v34 = vpop.f32.mrb[88].mxu0  ;;  %3081 = vmatprep.mubr.f32.mxu0 %v2363_v12  ;;  %v9007_v63 = vadd.f32 %v6698_v49, %v6697_v46 }
 0x312   : > { %v2249_v11 = vpop.f32.mrb[89].mxu0  ;;  %v2370_v61 = vmul.f32 %v2247_v34, %v1517_v56 }
 0x313   : > { %v2371_v28 = vmul.f32 %v2249_v11, %v1518_v40  ;;  %3082 = vmatmul.mubr.f32.gmra.mrb[150].mxu0 %v2362_v42  ;;  %v6700_v53 = vpop.f32.mrb[138].mxu1  ;;  %v1549_v40 = vld [vmem:[%s10405_s15 + $0x3f0] sm:$0xff] }
 0x314   : > { %v6701_v57 = vpop.f32.mrb[139].mxu1 }
 0x315   : > { %v2253_v35 = vpop.f32.mrb[90].mxu0  ;;  %3086 = vmatprep.mubr.f32.mxu0 %v2371_v28  ;;  %v9015_v13 = vadd.f32 %v6701_v57, %v6700_v53 }
 0x316   : > { %v2255_v18 = vpop.f32.mrb[91].mxu0  ;;  %v2378_v59 = vmul.f32 %v2253_v35, %v1525_v25 }
 0x317   : > { %v2379_v39 = vmul.f32 %v2255_v18, %v1526_v51  ;;  %3087 = vmatmul.mubr.f32.gmra.mrb[152].mxu0 %v2370_v61  ;;  %v6703_v7 = vpop.f32.mrb[140].mxu1 }
 0x318   : > { %v6704_v44 = vpop.f32.mrb[141].mxu1 }
 0x319   : > { %v2259_v36 = vpop.f32.mrb[92].mxu0  ;;  %3091 = vmatprep.mubr.f32.mxu0 %v2379_v39  ;;  %v9023_v4 = vadd.f32 %v6704_v44, %v6703_v7 }
 0x31a   : > { %v2261_v29 = vpop.f32.mrb[93].mxu0  ;;  %v2386_v9 = vmul.f32 %v2259_v36, %v1533_v1 }
 0x31b   : > { %v2387_v2 = vmul.f32 %v2261_v29, %v1534_v14  ;;  %3092 = vmatmul.mubr.f32.gmra.mrb[154].mxu0 %v2378_v59  ;;  %v6706_v43 = vpop.f32.mrb[142].mxu1 }
 0x31c   : > { %v6707_v24 = vpop.f32.mrb[143].mxu1 }
 0x31d   : > { %v2265_v10 = vpop.f32.mrb[94].mxu0  ;;  %3096 = vmatprep.mubr.f32.mxu0 %v2387_v2  ;;  %v9031_v33 = vadd.f32 %v6707_v24, %v6706_v43  ;;  %v3112_v43 = vld [vmem:[%s10398_s8] sm:$0x1] }
 0x31e   : > { %v2267_v45 = vpop.f32.mrb[95].mxu0  ;;  %v2394_v32 = vmul.f32 %v2265_v10, %v1541_v48 }
 0x31f   : > { %v2395_v30 = vmul.f32 %v2267_v45, %v1542_v8  ;;  %3097 = vmatmul.mubr.f32.gmra.mrb[156].mxu0 %v2386_v9  ;;  %v6709_v12 = vpop.f32.mrb[144].mxu1 }
 0x320   : > { %v6710_v34 = vpop.f32.mrb[145].mxu1 }
 0x321   : > { %v2271_v17 = vpop.f32.mrb[96].mxu0  ;;  %3101 = vmatprep.mubr.f32.mxu0 %v2395_v30  ;;  %v9039_v56 = vadd.f32 %v6710_v34, %v6709_v12 }
 0x322   : > { %v2273_v42 = vpop.f32.mrb[97].mxu0  ;;  %v2402_v11 = vmul.f32 %v2271_v17, %v1549_v40  ;;  %v3138_v17 = vsub.s32 0, %v8727_v41 }
 0x323   : > { %v2403_v46 = vmul.f32 %v2273_v42, %v1550_v26  ;;  %3102 = vmatmul.mubr.f32.gmra.mrb[158].mxu0 %v2394_v32  ;;  %v6712_v49 = vpop.f32.mrb[146].mxu1 }
 0x324   : > { %v6713_v28 = vpop.f32.mrb[147].mxu1 }
 0x325   : > { %3106 = vmatprep.mubr.f32.mxu0 %v2403_v46  ;;  %v9041_v51 = vadd.f32 %v6713_v28, %v6712_v49 }
 0x327   : > { %3107 = vmatmul.mubr.f32.gmra.mrb[160].mxu0 %v2402_v11  ;;  %v6715_v61 = vpop.f32.mrb[148].mxu1 }
 0x328   : > { %v6716_v35 = vpop.f32.mrb[149].mxu1 }
 0x329   : > { %v9043_v53 = vadd.f32 %v6716_v35, %v6715_v61 }
 0x32b   : > { %v6718_v25 = vpop.f32.mrb[150].mxu1 }
 0x32c   : > { %v6719_v18 = vpop.f32.mrb[151].mxu1 }
 0x32d   : > { %v9045_v57 = vadd.f32 %v6719_v18, %v6718_v25 }
 0x32f   : > { %v6721_v39 = vpop.f32.mrb[152].mxu1 }
 0x330   : > { %v6722_v14 = vpop.f32.mrb[153].mxu1 }
 0x331   : > { %v9047_v59 = vadd.f32 %v6722_v14, %v6721_v39 }
 0x333   : > { %v6724_v36 = vpop.f32.mrb[154].mxu1 }
 0x334   : > { %v6725_v7 = vpop.f32.mrb[155].mxu1 }
 0x335   : > { %v9049_v1 = vadd.f32 %v6725_v7, %v6724_v36 }
 0x337   : > { %v6727_v29 = vpop.f32.mrb[156].mxu1 }
 0x338   : > { %v6728_v44 = vpop.f32.mrb[157].mxu1 }
 0x339   : > { %v9051_v2 = vadd.f32 %v6728_v44, %v6727_v29  ;;  %v3265_v29 = vld [vmem:[%s10401_s11] sm:$0xff] }
 0x33b   : > { %v6730_v8 = vpop.f32.mrb[158].mxu1 }
 0x33c   : > { %v6731_v9 = vpop.f32.mrb[159].mxu1 }
 0x33d   : > { %v9053_v10 = vadd.f32 %v6731_v9, %v6730_v8 }
 0x341   : > { %v3116_v48 = vpop.permute.xlu0 %3115 }
 0x342   : > { %v3118_v24 = vsub.f32 %v3112_v43, %v3116_v48 }
 0x348   : > { %v3122_v45 = vpop.permute.xlu1 %3121 }
 0x349   : > { %v3126_v30 = vrot.slane %v3122_v45, %v3125_v55 }
 0x34b   : > { %v3128_v26 = vmul.f32 %v3126_v30, %v3118_v24 }
 0x34c   : > { %v3144_v32 = vpop.permute.xlu1 %3143 }
 0x34d   : > { %v3129_v12 = vadd.f32 1.0, %v3128_v26 }
 0x34f   : > { %v3130_v40 = vmul.f32 15.5, %v3129_v12 }
 0x350   : > { %v3149_v42 = vpop.permute.xlu1 %3148 }
 0x351   : > { %v3139_v34 = vrot.slane %v3130_v40, %v3138_v17 }
 0x353   : > { %v3161_v46 = vsub.f32 %v3139_v34, %v3144_v32  ;;  %v3162_v11 = vsub.f32 %v3139_v34, %v3149_v42 }
 0x354   : > { %v3154_v49 = vpop.permute.xlu1 %3153 }
 0x355   : > { %v3165_v28 = vand.u32 2147483647, %v3161_v46  ;;  %v3166_v61 = vand.u32 2147483647, %v3162_v11  ;;  %v3163_v35 = vsub.f32 %v3139_v34, %v3154_v49 }
 0x357   : > { %v3169_v25 = vsub.f32 1.0, %v3165_v28  ;;  %v3170_v18 = vsub.f32 1.0, %v3166_v61  ;;  %v3167_v39 = vand.u32 2147483647, %v3163_v35 }
 0x358   : > { %v3159_v14 = vpop.permute.xlu1 %3158 }
 0x359   : > { %v3173_v36 = vmax.f32 %v3169_v25, 0.0  ;;  %v3174_v55 = vmax.f32 %v3170_v18, 0.0  ;;  %v3164_v7 = vsub.f32 %v3139_v34, %v3159_v14  ;;  %v3171_v9 = vsub.f32 1.0, %v3167_v39 }
 0x35b   : > { %v3168_v44 = vand.u32 2147483647, %v3164_v7  ;;  %v7172_v8 = vpack.c.bf16 %v3174_v55, %v3173_v36  ;;  %v3175_v26 = vmax.f32 %v3171_v9, 0.0 }
 0x35c   : > { %v3284_v43 = vpop.permute.xlu1 %3283 }
 0x35d   : > { %v3172_v48 = vsub.f32 1.0, %v3168_v44  ;;  %v3361_v45 = vsub.f32 %v3284_v43, %v3265_v29  ;;  %7173 = vmatprep.subr.bf16.mxu1 %v7172_v8 }
 0x35e   : > { %7175 = vmatpush3.bf16.msra.mxu1 %v7172_v8 }
 0x35f   : > { %v3176_v24 = vmax.f32 %v3172_v48, 0.0  ;;  %v3377_v30 = vand.u32 2147483647, %v3361_v45 }
 0x361   : > { %v3393_v32 = vsub.f32 1.0, %v3377_v30  ;;  %v7176_v17 = vpack.c.bf16 %v3176_v24, %v3175_v26 }
 0x363   : > { %v3409_v12 = vmax.f32 %v3393_v32, 0.0  ;;  %7177 = vmatprep.subr.bf16.mxu1 %v7176_v17 }
 0x364   : > { %7179 = vmatpush3.bf16.msra.mxu1 %v7176_v17 }
 0x365   : > { %6969 = vmatprep.mubr.f32.mxu0 %v3409_v12 }
 0x37d   : > { %v6605_v40 = vpop.f32.mrb[98].mxu0 }
 0x37e   : > { %v6606_v42 = vpop.f32.mrb[99].mxu0 }
 0x37f   : > { %v6607_v34 = vadd.f32 %v6606_v42, %v6605_v40 }
 0x381   : > { %v2744_v46 = vadd.f32 %v6607_v34, %v8882_v22  ;;  %v6608_v11 = vpop.f32.mrb[100].mxu0 }
 0x382   : > { %v6609_v49 = vpop.f32.mrb[101].mxu0 }
 0x383   : > { %v9066_v28 = vadd.f32 %v8981_v60, %v2744_v46  ;;  %v6610_v61 = vadd.f32 %v6609_v49, %v6608_v11 }
 0x385   : > { %v2749_v35 = vadd.f32 %v6610_v61, %v8898_v37  ;;  %v6611_v25 = vpop.f32.mrb[102].mxu0 }
 0x386   : > { %v6612_v18 = vpop.f32.mrb[103].mxu0 }
 0x387   : > { %v9070_v39 = vadd.f32 %v8986_v16, %v2749_v35  ;;  %v6613_v14 = vadd.f32 %v6612_v18, %v6611_v25 }
 0x389   : > { %v2754_v36 = vadd.f32 %v6613_v14, %v8904_v27  ;;  %v6614_v55 = vpop.f32.mrb[104].mxu0 }
 0x38a   : > { %v6615_v7 = vpop.f32.mrb[105].mxu0 }
 0x38b   : > { %v9074_v22 = vadd.f32 %v8991_v38, %v2754_v36  ;;  %v6616_v29 = vadd.f32 %v6615_v7, %v6614_v55 }
 0x38d   : > { %v2759_v60 = vadd.f32 %v6616_v29, %v8913_v31  ;;  %v6617_v44 = vpop.f32.mrb[106].mxu0 }
 0x38e   : > { %v6618_v8 = vpop.f32.mrb[107].mxu0 }
 0x38f   : > { %v9078_v37 = vadd.f32 %v8999_v23, %v2759_v60  ;;  %v6619_v9 = vadd.f32 %v6618_v8, %v6617_v44 }
 0x391   : > { %v2764_v16 = vadd.f32 %v6619_v9, %v8919_v47  ;;  %v6620_v43 = vpop.f32.mrb[108].mxu0 }
 0x392   : > { %v6621_v48 = vpop.f32.mrb[109].mxu0 }
 0x393   : > { %v9082_v27 = vadd.f32 %v9007_v63, %v2764_v16  ;;  %v6622_v45 = vadd.f32 %v6621_v48, %v6620_v43 }
 0x395   : > { %v2769_v38 = vadd.f32 %v6622_v45, %v8925_v50  ;;  %v6623_v24 = vpop.f32.mrb[110].mxu0 }
 0x396   : > { %v6624_v30 = vpop.f32.mrb[111].mxu0 }
 0x397   : > { %v9086_v31 = vadd.f32 %v9015_v13, %v2769_v38  ;;  %v6625_v26 = vadd.f32 %v6624_v30, %v6623_v24 }
 0x399   : > { %v2774_v23 = vadd.f32 %v6625_v26, %v8931_v54  ;;  %v6626_v32 = vpop.f32.mrb[112].mxu0 }
 0x39a   : > { %v6627_v17 = vpop.f32.mrb[113].mxu0 }
 0x39b   : > { %v9090_v47 = vadd.f32 %v9023_v4, %v2774_v23  ;;  %v6628_v12 = vadd.f32 %v6627_v17, %v6626_v32 }
 0x39d   : > { %v2779_v63 = vadd.f32 %v6628_v12, %v8936_v5  ;;  %v6629_v40 = vpop.f32.mrb[114].mxu0 }
 0x39e   : > { %v6630_v42 = vpop.f32.mrb[115].mxu0 }
 0x39f   : > { %v9094_v50 = vadd.f32 %v9031_v33, %v2779_v63  ;;  %v6631_v34 = vadd.f32 %v6630_v42, %v6629_v40 }
 0x3a1   : > { %v2784_v13 = vadd.f32 %v6631_v34, %v8941_v15  ;;  %v6632_v46 = vpop.f32.mrb[116].mxu0 }
 0x3a2   : > { %v6633_v11 = vpop.f32.mrb[117].mxu0 }
 0x3a3   : > { %v9098_v54 = vadd.f32 %v9039_v56, %v2784_v13  ;;  %v6634_v49 = vadd.f32 %v6633_v11, %v6632_v46 }
 0x3a5   : > { %v2789_v4 = vadd.f32 %v6634_v49, %v8946_v3 }
 0x3a6   : > { %v6635_v61 = vpop.f32.mrb[118].mxu0 }
 0x3a7   : > { %v9102_v35 = vadd.f32 %v9041_v51, %v2789_v4  ;;  %v6636_v5 = vpop.f32.mrb[119].mxu0 }
 0x3a8   : > { %v6637_v25 = vadd.f32 %v6636_v5, %v6635_v61 }
 0x3aa   : > { %v2794_v33 = vadd.f32 %v6637_v25, %v8951_v20  ;;  %v6638_v18 = vpop.f32.mrb[120].mxu0 }
 0x3ab   : > { %v6639_v14 = vpop.f32.mrb[121].mxu0 }
 0x3ac   : > { %v9106_v15 = vadd.f32 %v9043_v53, %v2794_v33  ;;  %v6640_v36 = vadd.f32 %v6639_v14, %v6638_v18 }
 0x3ae   : > { %v2799_v56 = vadd.f32 %v6640_v36, %v8956_v62  ;;  %v6641_v55 = vpop.f32.mrb[122].mxu0 }
 0x3af   : > { %v6642_v7 = vpop.f32.mrb[123].mxu0 }
 0x3b0   : > { %v9110_v3 = vadd.f32 %v9045_v57, %v2799_v56  ;;  %v6643_v29 = vadd.f32 %v6642_v7, %v6641_v55 }
 0x3b2   : > { %v2804_v51 = vadd.f32 %v6643_v29, %v8961_v19  ;;  %v6644_v60 = vpop.f32.mrb[124].mxu0 }
 0x3b3   : > { %v6645_v44 = vpop.f32.mrb[125].mxu0 }
 0x3b4   : > { %v9114_v20 = vadd.f32 %v9047_v59, %v2804_v51  ;;  %v6646_v8 = vadd.f32 %v6645_v44, %v6644_v60 }
 0x3b6   : > { %v2809_v53 = vadd.f32 %v6646_v8, %v8966_v21  ;;  %v6647_v9 = vpop.f32.mrb[126].mxu0 }
 0x3b7   : > { %v6648_v16 = vpop.f32.mrb[127].mxu0 }
 0x3b8   : > { %v9118_v62 = vadd.f32 %v9049_v1, %v2809_v53  ;;  %v6649_v43 = vadd.f32 %v6648_v16, %v6647_v9 }
 0x3ba   : > { %v2814_v57 = vadd.f32 %v6649_v43, %v8971_v52  ;;  %v6650_v48 = vpop.f32.mrb[128].mxu0 }
 0x3bb   : > { %v6651_v45 = vpop.f32.mrb[129].mxu0 }
 0x3bc   : > { %v9122_v19 = vadd.f32 %v9051_v2, %v2814_v57  ;;  %v6652_v38 = vadd.f32 %v6651_v45, %v6650_v48 }
 0x3be   : > { %v2819_v59 = vadd.f32 %v6652_v38, %v8976_v58  ;;  %v6765_v24 = vpop.f32.mrb[130].mxu0 }
 0x3bf   : > { %v6766_v30 = vpop.f32.mrb[131].mxu0 }
 0x3c0   : > { %v9126_v21 = vadd.f32 %v9053_v10, %v2819_v59  ;;  %v6767_v26 = vadd.f32 %v6766_v30, %v6765_v24 }
 0x3c2   : > { %v3034_v1 = vadd.f32 %v6767_v26, %v9066_v28  ;;  %v6768_v23 = vpop.f32.mrb[132].mxu0 }
 0x3c3   : > { %v6769_v32 = vpop.f32.mrb[133].mxu0 }
 0x3c4   : > { %v6770_v52 = vadd.f32 %v6769_v32, %v6768_v23  ;;  %6913 = vmatprep.mubr.msk.f32.mxu1 %vm3425_vm6, %v3034_v1 }
 0x3c6   : > { %v3039_v2 = vadd.f32 %v6770_v52, %v9070_v39  ;;  %v6771_v17 = vpop.f32.mrb[134].mxu0 }
 0x3c7   : > { %v6772_v12 = vpop.f32.mrb[135].mxu0 }
 0x3c8   : > { %v6773_v63 = vadd.f32 %v6772_v12, %v6771_v17  ;;  %6914 = vmatmul.mubr.msk.f32.vlgmr.msra.gmra.mrb[160].mxu1 %vm3425_vm6, %v3039_v2 }
 0x3ca   : > { %v3044_v58 = vadd.f32 %v6773_v63, %v9074_v22  ;;  %v6774_v10 = vpop.f32.mrb[136].mxu0 }
 0x3cb   : > { %v6775_v40 = vpop.f32.mrb[137].mxu0 }
 0x3cc   : > { %v6776_v42 = vadd.f32 %v6775_v40, %v6774_v10  ;;  %6916 = vmatprep.mubr.msk.f32.mxu1 %vm3425_vm6, %v3044_v58 }
 0x3ce   : > { %v3049_v28 = vadd.f32 %v6776_v42, %v9078_v37  ;;  %v6777_v34 = vpop.f32.mrb[138].mxu0 }
 0x3cf   : > { %v6778_v13 = vpop.f32.mrb[139].mxu0 }
 0x3d0   : > { %v6779_v46 = vadd.f32 %v6778_v13, %v6777_v34  ;;  %6917 = vmatmul.mubr.msk.f32.gmra.mrb[162].mxu1 %vm3425_vm6, %v3049_v28  ;;  %v3289_v28 = vpop.permute.xlu1 %3288 }
 0x3d2   : > { %v3054_v39 = vadd.f32 %v6779_v46, %v9082_v27  ;;  %v6780_v11 = vpop.f32.mrb[140].mxu0 }
 0x3d3   : > { %v6781_v49 = vpop.f32.mrb[141].mxu0 }
 0x3d4   : > { %v6782_v4 = vadd.f32 %v6781_v49, %v6780_v11  ;;  %6919 = vmatprep.mubr.msk.f32.mxu1 %vm3425_vm6, %v3054_v39  ;;  %v3294_v39 = vpop.permute.xlu1 %3293  ;;  %v3299_v11 = vpop.permute.xlu0 %3298 }
 0x3d6   : > { %v3059_v22 = vadd.f32 %v6782_v4, %v9086_v31  ;;  %v6783_v61 = vpop.f32.mrb[142].mxu0 }
 0x3d7   : > { %v6784_v5 = vpop.f32.mrb[143].mxu0 }
 0x3d8   : > { %v6785_v25 = vadd.f32 %v6784_v5, %v6783_v61  ;;  %6920 = vmatmul.mubr.msk.f32.gmra.mrb[164].mxu1 %vm3425_vm6, %v3059_v22  ;;  %v3304_v22 = vpop.permute.xlu1 %3303  ;;  %v3309_v5 = vpop.permute.xlu0 %3308 }
 0x3da   : > { %v3064_v37 = vadd.f32 %v6785_v25, %v9090_v47  ;;  %v6786_v33 = vpop.f32.mrb[144].mxu0  ;;  %v3266_v25 = vld [vmem:[%s10401_s11 + $0x8] sm:$0xff] }
 0x3db   : > { %v6787_v18 = vpop.f32.mrb[145].mxu0 }
 0x3dc   : > { %v6788_v14 = vadd.f32 %v6787_v18, %v6786_v33  ;;  %6922 = vmatprep.mubr.msk.f32.mxu1 %vm3425_vm6, %v3064_v37  ;;  %v3267_v37 = vld [vmem:[%s10401_s11 + $0x10] sm:$0xff]  ;;  %v3314_v33 = vpop.permute.xlu1 %3313 }
 0x3de   : > { %v3069_v27 = vadd.f32 %v6788_v14, %v9094_v50  ;;  %v6789_v36 = vpop.f32.mrb[146].mxu0 }
 0x3df   : > { %v6790_v56 = vpop.f32.mrb[147].mxu0 }
 0x3e0   : > { %v6791_v55 = vadd.f32 %v6790_v56, %v6789_v36  ;;  %6923 = vmatmul.mubr.msk.f32.gmra.mrb[166].mxu1 %vm3425_vm6, %v3069_v27  ;;  %v3362_v27 = vsub.f32 %v3289_v28, %v3266_v25  ;;  %v3268_v56 = vld [vmem:[%s10401_s11 + $0x18] sm:$0xff] }
 0x3e2   : > { %v3074_v31 = vadd.f32 %v6791_v55, %v9098_v54  ;;  %v6792_v7 = vpop.f32.mrb[148].mxu0  ;;  %v3319_v55 = vpop.permute.xlu0 %3318 }
 0x3e3   : > { %v6793_v29 = vpop.f32.mrb[149].mxu0 }
 0x3e4   : > { %v6794_v51 = vadd.f32 %v6793_v29, %v6792_v7  ;;  %6925 = vmatprep.mubr.msk.f32.mxu1 %vm3425_vm6, %v3074_v31  ;;  %v3363_v31 = vsub.f32 %v3294_v39, %v3267_v37  ;;  %v3269_v7 = vld [vmem:[%s10401_s11 + $0x20] sm:$0xff]  ;;  %v3364_v29 = vsub.f32 %v3299_v11, %v3268_v56 }
 0x3e6   : > { %v3079_v47 = vadd.f32 %v6794_v51, %v9102_v35  ;;  %v6795_v60 = vpop.f32.mrb[150].mxu0  ;;  %v3378_v51 = vand.u32 2147483647, %v3362_v27 }
 0x3e7   : > { %v6796_v44 = vpop.f32.mrb[151].mxu0 }
 0x3e8   : > { %v6797_v8 = vadd.f32 %v6796_v44, %v6795_v60  ;;  %6926 = vmatmul.mubr.msk.f32.gmra.mrb[168].mxu1 %vm3425_vm6, %v3079_v47  ;;  %v3324_v47 = vpop.permute.xlu1 %3323  ;;  %v3270_v60 = vld [vmem:[%s10401_s11 + $0x28] sm:$0xff]  ;;  %v3379_v44 = vand.u32 2147483647, %v3363_v31 }
 0x3ea   : > { %v3084_v50 = vadd.f32 %v6797_v8, %v9106_v15  ;;  %v6798_v53 = vpop.f32.mrb[152].mxu0  ;;  %v3365_v8 = vsub.f32 %v3304_v22, %v3269_v7  ;;  %v3278_v22 = vld [vmem:[%s10401_s11 + $0x68] sm:$0xff] }
 0x3eb   : > { %v6799_v9 = vpop.f32.mrb[153].mxu0 }
 0x3ec   : > { %v6800_v16 = vadd.f32 %v6799_v9, %v6798_v53  ;;  %6928 = vmatprep.mubr.msk.f32.mxu1 %vm3425_vm6, %v3084_v50  ;;  %v3271_v50 = vld [vmem:[%s10401_s11 + $0x30] sm:$0xff]  ;;  %v3329_v9 = vpop.permute.xlu0 %3328 }
 0x3ee   : > { %v3089_v54 = vadd.f32 %v6800_v16, %v9110_v3  ;;  %v6801_v43 = vpop.f32.mrb[154].mxu0 }
 0x3ef   : > { %v6802_v57 = vpop.f32.mrb[155].mxu0 }
 0x3f0   : > { %v6803_v48 = vadd.f32 %v6802_v57, %v6801_v43  ;;  %6929 = vmatmul.mubr.msk.f32.gmra.mrb[170].mxu1 %vm3425_vm6, %v3089_v54  ;;  %v3380_v54 = vand.u32 2147483647, %v3364_v29  ;;  %v3366_v43 = vsub.f32 %v3309_v5, %v3270_v60  ;;  %v3394_v57 = vsub.f32 1.0, %v3378_v51 }
 0x3f2   : > { %v3094_v35 = vadd.f32 %v6803_v48, %v9114_v20  ;;  %v6804_v45 = vpop.f32.mrb[156].mxu0 }
 0x3f3   : > { %v6805_v38 = vpop.f32.mrb[157].mxu0 }
 0x3f4   : > { %v6806_v59 = vadd.f32 %v6805_v38, %v6804_v45  ;;  %6931 = vmatprep.mubr.msk.f32.mxu1 %vm3425_vm6, %v3094_v35  ;;  %v3272_v35 = vld [vmem:[%s10401_s11 + $0x38] sm:$0xff]  ;;  %v3395_v45 = vsub.f32 1.0, %v3379_v44  ;;  %v3381_v38 = vand.u32 2147483647, %v3365_v8 }
 0x3f6   : > { %v3099_v15 = vadd.f32 %v6806_v59, %v9118_v62  ;;  %v6807_v24 = vpop.f32.mrb[158].mxu0  ;;  %v3367_v59 = vsub.f32 %v3314_v33, %v3271_v50  ;;  %v3279_v33 = vld [vmem:[%s10401_s11 + $0x70] sm:$0xff] }
 0x3f7   : > { %v6808_v30 = vpop.f32.mrb[159].mxu0 }
 0x3f8   : > { %v6809_v26 = vadd.f32 %v6808_v30, %v6807_v24  ;;  %6932 = vmatmul.mubr.msk.f32.gmra.mrb[172].mxu1 %vm3425_vm6, %v3099_v15  ;;  %v3273_v15 = vld [vmem:[%s10401_s11 + $0x40] sm:$0xff]  ;;  %v3334_v24 = vpop.permute.xlu1 %3333  ;;  %v3396_v30 = vsub.f32 1.0, %v3380_v54 }
 0x3fa   : > { %v3104_v3 = vadd.f32 %v6809_v26, %v9122_v19  ;;  %v6810_v1 = vpop.f32.mrb[160].mxu0  ;;  %v3382_v26 = vand.u32 2147483647, %v3366_v43 }
 0x3fb   : > { %v6811_v23 = vpop.f32.mrb[161].mxu0 }
 0x3fc   : > { %v6812_v32 = vadd.f32 %v6811_v23, %v6810_v1  ;;  %6934 = vmatprep.mubr.msk.f32.mxu1 %vm3425_vm6, %v3104_v3  ;;  %v3368_v3 = vsub.f32 %v3319_v55, %v3272_v35  ;;  %v3410_v1 = vmax.f32 %v3394_v57, 0.0  ;;  %v3274_v23 = vld [vmem:[%s10401_s11 + $0x48] sm:$0xff]  ;;  %v3280_v55 = vld [vmem:[%s10401_s11 + $0x78] sm:$0xff] }
 0x3fe   : > { %v3109_v20 = vadd.f32 %v6812_v32, %v9126_v21  ;;  %v3339_v32 = vpop.permute.xlu0 %3338 }
 0x400   : > { %6935 = vmatmul.mubr.msk.f32.gmra.mrb[174].mxu1 %vm3425_vm6, %v3109_v20  ;;  %v3411_v20 = vmax.f32 %v3395_v45, 0.0 }
 0x49b   : > { %v6915_v52 = vpop.f32.mrb[160].mxu1 }
 0x49c   : > { %v3540_v2 = vpop.f32.mrb[161].mxu1 }
 0x49d   : > { %v7180_v17 = vpack.c.bf16 %v6915_v52, %v3540_v2  ;;  %v3397_v52 = vsub.f32 1.0, %v3381_v38  ;;  %v3383_v2 = vand.u32 2147483647, %v3367_v59 }
 0x49f   : > { %7181 = vmatprep.subr.bf16.mxu0 %v7180_v17 }
 0x4a0   : > { %7183 = vmatpush3.bf16.msra.mxu0 %v7180_v17  ;;  %v3369_v17 = vsub.f32 %v3324_v47, %v3273_v15 }
 0x4a2   : > { %v3385_v28 = vand.u32 2147483647, %v3369_v17 }
 0x4a3   : > { %v6918_v62 = vpop.f32.mrb[162].mxu1 }
 0x4a4   : > { %v3550_v12 = vpop.f32.mrb[163].mxu1  ;;  %v3401_v5 = vsub.f32 1.0, %v3385_v28 }
 0x4a5   : > { %v7184_v63 = vpack.c.bf16 %v6918_v62, %v3550_v12  ;;  %v3275_v62 = vld [vmem:[%s10401_s11 + $0x50] sm:$0xff]  ;;  %v3412_v12 = vmax.f32 %v3396_v30, 0.0  ;;  %v3865_v30 = vld [vmem:[%s10395_s5] sm:$0xff] }
 0x4a6   : > { %v3417_v7 = vmax.f32 %v3401_v5, 0.0  ;;  %v3983_v5 = vld [vmem:[%s10404_s14 + $0x88] sm:$0xff] }
 0x4a7   : > { %7185 = vmatprep.subr.bf16.mxu0 %v7184_v63 }
 0x4a8   : > { %7187 = vmatpush3.bf16.msra.mxu0 %v7184_v63  ;;  %v3398_v63 = vsub.f32 1.0, %v3382_v26  ;;  %v3866_v26 = vld [vmem:[%s10395_s5 + $0x8] sm:$0xff] }
 0x4aa   : > { %v3414_v39 = vmax.f32 %v3398_v63, 0.0 }
 0x4ab   : > { %v6921_v19 = vpop.f32.mrb[164].mxu1 }
 0x4ac   : > { %v3560_v58 = vpop.f32.mrb[165].mxu1 }
 0x4ad   : > { %v7188_v10 = vpack.c.bf16 %v6921_v19, %v3560_v58  ;;  %v3384_v19 = vand.u32 2147483647, %v3368_v3  ;;  %v3370_v58 = vsub.f32 %v3329_v9, %v3274_v23  ;;  %v3867_v3 = vld [vmem:[%s10395_s5 + $0x10] sm:$0xff]  ;;  %v3868_v23 = vld [vmem:[%s10395_s5 + $0x18] sm:$0xff] }
 0x4af   : > { %7189 = vmatprep.subr.bf16.mxu0 %v7188_v10  ;;  %v3400_v11 = vsub.f32 1.0, %v3384_v19 }
 0x4b0   : > { %7191 = vmatpush3.bf16.msra.mxu0 %v7188_v10  ;;  %v3344_v10 = vpop.permute.xlu1 %3343 }
 0x4b3   : > { %v6924_v40 = vpop.f32.mrb[166].mxu1 }
 0x4b4   : > { %v3570_v42 = vpop.f32.mrb[167].mxu1 }
 0x4b5   : > { %v7192_v21 = vpack.c.bf16 %v6924_v40, %v3570_v42  ;;  %v3276_v40 = vld [vmem:[%s10401_s11 + $0x58] sm:$0xff]  ;;  %v3413_v42 = vmax.f32 %v3397_v52, 0.0 }
 0x4b7   : > { %7193 = vmatprep.subr.bf16.mxu0 %v7192_v21 }
 0x4b8   : > { %7195 = vmatpush3.bf16.msra.mxu0 %v7192_v21  ;;  %v3399_v21 = vsub.f32 1.0, %v3383_v2 }
 0x4bb   : > { %v6927_v34 = vpop.f32.mrb[168].mxu1 }
 0x4bc   : > { %v3580_v13 = vpop.f32.mrb[169].mxu1 }
 0x4bd   : > { %v7196_v46 = vpack.c.bf16 %v6927_v34, %v3580_v13  ;;  %v3371_v34 = vsub.f32 %v3334_v24, %v3275_v62  ;;  %v3277_v13 = vld [vmem:[%s10401_s11 + $0x60] sm:$0xff] }
 0x4be   : > { %v3373_v37 = vsub.f32 %v3344_v10, %v3277_v13  ;;  %v3764_v24 = vld [vmem:[%s10431_s4] sm:$0xff]  ;;  %v3967_v13 = vld [vmem:[%s10404_s14 + $0x8] sm:$0xff] }
 0x4bf   : > { %7197 = vmatprep.subr.bf16.mxu0 %v7196_v46  ;;  %v3387_v25 = vand.u32 2147483647, %v3371_v34  ;;  %7001 = vmatprep.mubr.msk.f32.mxu1 %vm3425_vm6, %v3764_v24 }
 0x4c0   : > { %7199 = vmatpush3.bf16.msra.mxu0 %v7196_v46  ;;  %v3349_v46 = vpop.permute.xlu0 %3348  ;;  %v3389_v51 = vand.u32 2147483647, %v3373_v37  ;;  %v3765_v37 = vld [vmem:[%s10431_s4 + $0x8] sm:$0xff] }
 0x4c1   : > { %v3374_v56 = vsub.f32 %v3349_v46, %v3278_v22  ;;  %v3403_v29 = vsub.f32 1.0, %v3387_v25  ;;  %v3975_v46 = vld [vmem:[%s10404_s14 + $0x48] sm:$0xff]  ;;  %v3966_v22 = vld [vmem:[%s10404_s14] sm:$0xff] }
 0x4c2   : > { %v3405_v9 = vsub.f32 1.0, %v3389_v51  ;;  %v3991_v25 = vld [vmem:[%s10404_s14 + $0xc8] sm:$0xff] }
 0x4c3   : > { %v6930_v49 = vpop.f32.mrb[170].mxu1  ;;  %v3390_v8 = vand.u32 2147483647, %v3374_v56  ;;  %v3767_v56 = vld [vmem:[%s10431_s4 + $0x18] sm:$0xff]  ;;  %v3971_v51 = vld [vmem:[%s10404_s14 + $0x28] sm:$0xff] }
 0x4c4   : > { %v3590_v4 = vpop.f32.mrb[171].mxu1  ;;  %v3359_v31 = vpop.permute.xlu0 %3358 }
 0x4c5   : > { %v7200_v61 = vpack.c.bf16 %v6930_v49, %v3590_v4  ;;  %v3386_v49 = vand.u32 2147483647, %v3370_v58  ;;  %v3372_v4 = vsub.f32 %v3339_v32, %v3276_v40  ;;  %v3376_v50 = vsub.f32 %v3359_v31, %v3280_v55  ;;  %v3969_v31 = vld [vmem:[%s10404_s14 + $0x18] sm:$0xff] }
 0x4c6   : > { %v3406_v43 = vsub.f32 1.0, %v3390_v8  ;;  %v7224_v32 = vpack.c.bf16 %v3868_v23, %v3867_v3  ;;  %v3978_v8 = vld [vmem:[%s10404_s14 + $0x60] sm:$0xff]  ;;  %v3992_v3 = vld [vmem:[%s10404_s14 + $0xd0] sm:$0xff]  ;;  %v3981_v23 = vld [vmem:[%s10404_s14 + $0x78] sm:$0xff] }
 0x4c7   : > { %7201 = vmatprep.subr.bf16.mxu0 %v7200_v61  ;;  %v3402_v27 = vsub.f32 1.0, %v3386_v49  ;;  %v3392_v57 = vand.u32 2147483647, %v3376_v50 }
 0x4c8   : > { %7203 = vmatpush3.bf16.msra.mxu0 %v7200_v61  ;;  %v3415_v61 = vmax.f32 %v3399_v21, 0.0  ;;  %v3422_v45 = vmax.f32 %v3406_v43, 0.0  ;;  %v3994_v43 = vld [vmem:[%s10404_s14 + $0xe0] sm:$0xff] }
 0x4c9   : > { %v3418_v60 = vmax.f32 %v3402_v27, 0.0  ;;  %v3408_v38 = vsub.f32 1.0, %v3392_v57  ;;  %v3982_v27 = vld [vmem:[%s10404_s14 + $0x80] sm:$0xff] }
 0x4cb   : > { %v6933_v18 = vpop.f32.mrb[172].mxu1  ;;  %v3424_v15 = vmax.f32 %v3408_v38, 0.0  ;;  %v3993_v38 = vld [vmem:[%s10404_s14 + $0xd8] sm:$0xff] }
 0x4cc   : > { %v3600_v14 = vpop.f32.mrb[173].mxu1 }
 0x4cd   : > { %v7204_v36 = vpack.c.bf16 %v6933_v18, %v3600_v14  ;;  %v3354_v18 = vpop.permute.xlu1 %3353  ;;  %v3416_v14 = vmax.f32 %v3400_v11, 0.0 }
 0x4ce   : > { %v3375_v47 = vsub.f32 %v3354_v18, %v3279_v33  ;;  %v3766_v18 = vld [vmem:[%s10431_s4 + $0x10] sm:$0xff]  ;;  %s10275_s4 = scalar_lea.vmem %s10407_s17, %s7601_s20  ;;  %s641_s20 = scalar_lea.vmem %s10409_s19, %s10456_s30 }
 0x4cf   : > { %7205 = vmatprep.subr.bf16.mxu0 %v7204_v36 }
 0x4d0   : > { %7207 = vmatpush3.bf16.msra.mxu0 %v7204_v36  ;;  %v3388_v36 = vand.u32 2147483647, %v3372_v4  ;;  %v7228_v4 = vpack.c.bf16 %v3975_v46, %v3967_v13 }
 0x4d2   : > { %v3404_v44 = vsub.f32 1.0, %v3388_v36  ;;  %v3990_v36 = vld [vmem:[%s10404_s14 + $0xc0] sm:$0xff] }
 0x4d3   : > { %v6936_v53 = vpop.f32.mrb[174].mxu1  ;;  %v7234_v55 = vpack.c.bf16 %v3990_v36, %v3982_v27 }
 0x4d4   : > { %v3610_v16 = vpop.f32.mrb[175].mxu1  ;;  %v3420_v54 = vmax.f32 %v3404_v44, 0.0  ;;  %v3970_v44 = vld [vmem:[%s10404_s14 + $0x20] sm:$0xff] }
 0x4d5   : > { %v7208_v48 = vpack.c.bf16 %v6936_v53, %v3610_v16  ;;  %v3419_v53 = vmax.f32 %v3403_v29, 0.0  ;;  %v3391_v16 = vand.u32 2147483647, %v3375_v47  ;;  %v3979_v47 = vld [vmem:[%s10404_s14 + $0x68] sm:$0xff]  ;;  %v7246_v50 = vpack.c.bf16 %v3978_v8, %v3970_v44  ;;  %v4822_v44 = vld [vmem:[%s10405_s15 + $0xc0] sm:$0xff] }
 0x4d6   : > { %v4815_v8 = vld [vmem:[%s10405_s15 + $0x88] sm:$0xff] }
 0x4d7   : > { %7209 = vmatprep.subr.bf16.mxu0 %v7208_v48  ;;  %v3407_v35 = vsub.f32 1.0, %v3391_v16 }
 0x4d8   : > { %7211 = vmatpush3.bf16.msra.mxu0 %v7208_v48  ;;  %v3421_v48 = vmax.f32 %v3405_v9, 0.0  ;;  %v3995_v9 = vld [vmem:[%s10404_s14 + $0xe8] sm:$0xff] }
 0x4d9   : > { %v3423_v59 = vmax.f32 %v3407_v35, 0.0  ;;  %v3976_v35 = vld [vmem:[%s10404_s14 + $0x50] sm:$0xff] }
 0x4db   : > { %6970 = vmatmul.mubr.f32.vlgmr.msra.gmra.mrb[162].mxu0 %v3410_v1  ;;  %v7220_v1 = vpack.c.bf16 %v3866_v26, %v3865_v30  ;;  %v3984_v26 = vld [vmem:[%s10404_s14 + $0x90] sm:$0xff] }
 0x4dc   : > { %6972 = vmatprep.mubr.f32.mxu0 %v3411_v20 }
 0x4dd   : > { %7221 = vmatprep.subr.bf16.mxu0 %v7220_v1 }
 0x4de   : > { %7223 = vmatpush3.bf16.msra.mxu0 %v7220_v1  ;;  %v3973_v1 = vld [vmem:[%s10404_s14 + $0x38] sm:$0xff] }
 0x4df   : > { %6973 = vmatmul.mubr.f32.gmra.mrb[164].mxu0 %v3412_v12  ;;  %7225 = vmatprep.subr.bf16.mxu0 %v7224_v32  ;;  %v7252_v46 = vpack.c.bf16 %v3981_v23, %v3973_v1 }
 0x4e0   : > { %6975 = vmatprep.mubr.f32.mxu0 %v3413_v42 }
 0x4e2   : > { %7227 = vmatpush3.bf16.msra.mxu0 %v7224_v32 }
 0x4e3   : > { %6976 = vmatmul.mubr.f32.gmra.mrb[166].mxu0 %v3414_v39 }
 0x4e4   : > { %6978 = vmatprep.mubr.f32.mxu0 %v3415_v61  ;;  %v3974_v61 = vld [vmem:[%s10404_s14 + $0x40] sm:$0xff] }
 0x4e5   : > { %v7230_v33 = vpack.c.bf16 %v3974_v61, %v3966_v22 }
 0x4e7   : > { %6979 = vmatmul.mubr.f32.gmra.mrb[168].mxu0 %v3416_v14  ;;  %v7232_v14 = vpack.c.bf16 %v3991_v25, %v3983_v5  ;;  %v4798_v25 = vld [vmem:[%s10405_s15] sm:$0xff] }
 0x4e8   : > { %6981 = vmatprep.mubr.f32.mxu0 %v3417_v7  ;;  %v3977_v7 = vld [vmem:[%s10404_s14 + $0x58] sm:$0xff] }
 0x4e9   : > { %v7236_v29 = vpack.c.bf16 %v3977_v7, %v3969_v31 }
 0x4eb   : > { %6982 = vmatmul.mubr.f32.gmra.mrb[170].mxu0 %v3418_v60  ;;  %7237 = vmatprep.subr.bf16.mxu0 %v7236_v29  ;;  %v7244_v60 = vpack.c.bf16 %v3979_v47, %v3971_v51 }
 0x4ec   : > { %6984 = vmatprep.mubr.f32.mxu0 %v3419_v53  ;;  %v3987_v53 = vld [vmem:[%s10404_s14 + $0xa8] sm:$0xff] }
 0x4ed   : > { %v7248_v16 = vpack.c.bf16 %v3995_v9, %v3987_v53 }
 0x4ef   : > { %6985 = vmatmul.mubr.f32.gmra.mrb[172].mxu0 %v3420_v54  ;;  %v3986_v54 = vld [vmem:[%s10404_s14 + $0xa0] sm:$0xff] }
 0x4f0   : > { %6987 = vmatprep.mubr.f32.mxu0 %v3421_v48  ;;  %v7250_v57 = vpack.c.bf16 %v3994_v43, %v3986_v54  ;;  %v3968_v48 = vld [vmem:[%s10404_s14 + $0x10] sm:$0xff] }
 0x4f3   : > { %6988 = vmatmul.mubr.f32.gmra.mrb[174].mxu0 %v3422_v45  ;;  %v3985_v45 = vld [vmem:[%s10404_s14 + $0x98] sm:$0xff] }
 0x4f4   : > { %6990 = vmatprep.mubr.f32.mxu0 %v3423_v59  ;;  %v7240_v30 = vpack.c.bf16 %v3993_v38, %v3985_v45 }
 0x4f7   : > { %6991 = vmatmul.mubr.f32.gmra.mrb[176].mxu0 %v3424_v15  ;;  %v7238_v15 = vpack.c.bf16 %v3976_v35, %v3968_v48 }
 0x5ae   : > { %v9221_v20 = vpop.f32.mrb[162].mxu0 }
 0x5af   : > { %v9223_v52 = vpop.f32.mrb[163].mxu0 }
 0x5b2   : > { %v9225_v2 = vpop.f32.mrb[164].mxu0 }
 0x5b3   : > { %v9227_v17 = vpop.f32.mrb[165].mxu0 }
 0x5b6   : > { %v9229_v62 = vpop.f32.mrb[166].mxu0 }
 0x5b7   : > { %v9231_v12 = vpop.f32.mrb[167].mxu0 }
 0x5ba   : > { %v9233_v63 = vpop.f32.mrb[168].mxu0 }
 0x5bb   : > { %v9235_v19 = vpop.f32.mrb[169].mxu0 }
 0x5be   : > { %v9237_v58 = vpop.f32.mrb[170].mxu0 }
 0x5bf   : > { %v9239_v10 = vpop.f32.mrb[171].mxu0 }
 0x5c2   : > { %v9241_v40 = vpop.f32.mrb[172].mxu0 }
 0x5c3   : > { %v9243_v42 = vpop.f32.mrb[173].mxu0 }
 0x5c6   : > { %v9245_v21 = vpop.f32.mrb[174].mxu0 }
 0x5c7   : > { %v9247_v28 = vpop.f32.mrb[175].mxu0 }
 0x5c8   : > { %v7212_v34 = vpack.c.bf16 %v9245_v21, %v9247_v28 }
 0x5ca   : > { %v9257_v39 = vpop.f32.mrb[176].mxu0  ;;  %7213 = vmatprep.subr.bf16.mxu1 %v7212_v34 }
 0x5cb   : > { %v9259_v11 = vpop.f32.mrb[177].mxu0  ;;  %7215 = vmatpush3.bf16.msra.mxu1 %v7212_v34  ;;  %v7242_v34 = vpack.c.bf16 %v3992_v3, %v3984_v26 }
 0x5cc   : > { %v7216_v49 = vpack.c.bf16 %v9257_v39, %v9259_v11 }
 0x5ce   : > { %7217 = vmatprep.subr.bf16.mxu1 %v7216_v49 }
 0x5cf   : > { %7219 = vmatpush3.bf16.msra.mxu1 %v7216_v49  ;;  %v3972_v49 = vld [vmem:[%s10404_s14 + $0x30] sm:$0xff] }
 0x5d0   : > { %7229 = vmatprep.subr.bf16.mxu1 %v7228_v4  ;;  %v3980_v4 = vld [vmem:[%s10404_s14 + $0x70] sm:$0xff] }
 0x5d1   : > { %v7254_v61 = vpack.c.bf16 %v3980_v4, %v3972_v49 }
 0x5d2   : > { %7002 = vmatmul.mubr.msk.f32.vlgmr.msra.gmra.mrb[176].mxu1 %vm3425_vm6, %v3765_v37  ;;  %v4806_v37 = vld [vmem:[%s10405_s15 + $0x40] sm:$0xff] }
 0x5d3   : > { %7231 = vmatpush1.bf16.msra.mxu1 %v7230_v33  ;;  %7004 = vmatprep.mubr.msk.f32.mxu1 %vm3425_vm6, %v3766_v18  ;;  %v4799_v33 = vld [vmem:[%s10405_s15 + $0x8] sm:$0xff] }
 0x5d4   : > { %7233 = vmatprep.subr.bf16.mxu1 %v7232_v14  ;;  %v4807_v18 = vld [vmem:[%s10405_s15 + $0x48] sm:$0xff] }
 0x5d6   : > { %7005 = vmatmul.mubr.msk.f32.gmra.mrb[178].mxu1 %vm3425_vm6, %v3767_v56 }
 0x5d7   : > { %7235 = vmatpush1.bf16.msra.mxu1 %v7234_v55  ;;  %4122 = vmatprep.mubr.f32.mxu1 %v7484_v0 }
 0x5d8   : > { %7245 = vmatprep.subr.bf16.mxu1 %v7244_v60  ;;  %v4814_v60 = vld [vmem:[%s10405_s15 + $0x80] sm:$0xff] }
 0x5da   : > { %6370 = vmatmul.mubr.msk.f32.vlgmr.msra.gmra.mrb[180].mxu1 %vm3425_vm6, %v9223_v52 }
 0x5db   : > { %4128 = vmatprep.mubr.f32.mxu1 %v7484_v0  ;;  %7247 = vmatpush1.bf16.msra.mxu1 %v7246_v50  ;;  %v4823_v50 = vld [vmem:[%s10405_s15 + $0xc8] sm:$0xff] }
 0x5dc   : > { %7249 = vmatprep.subr.bf16.mxu1 %v7248_v16 }
 0x5de   : > { %6371 = vmatmul.mubr.msk.f32.gmra.mrb[182].mxu1 %vm3425_vm6, %v9221_v20 }
 0x5df   : > { %4134 = vmatprep.mubr.f32.mxu1 %v7484_v0  ;;  %7251 = vmatpush1.bf16.msra.mxu1 %v7250_v57 }
 0x5e2   : > { %6372 = vmatmul.mubr.msk.f32.gmra.mrb[184].mxu1 %vm3425_vm6, %v9227_v17 }
 0x5e3   : > { %4140 = vmatprep.mubr.f32.mxu1 %v7484_v0 }
 0x5e6   : > { %6373 = vmatmul.mubr.msk.f32.gmra.mrb[186].mxu1 %vm3425_vm6, %v9225_v2 }
 0x5e7   : > { %4146 = vmatprep.mubr.f32.mxu1 %v7484_v0 }
 0x5ea   : > { %6374 = vmatmul.mubr.msk.f32.gmra.mrb[188].mxu1 %vm3425_vm6, %v9231_v12 }
 0x5eb   : > { %4152 = vmatprep.mubr.f32.mxu1 %v7484_v0 }
 0x5ee   : > { %6375 = vmatmul.mubr.msk.f32.gmra.mrb[190].mxu1 %vm3425_vm6, %v9229_v62 }
 0x5ef   : > { %4158 = vmatprep.mubr.f32.mxu1 %v7484_v0 }
 0x5f2   : > { %6376 = vmatmul.mubr.msk.f32.gmra.mrb[192].mxu1 %vm3425_vm6, %v9235_v19 }
 0x5f3   : > { %4164 = vmatprep.mubr.f32.mxu1 %v7484_v0 }
 0x5f6   : > { %6377 = vmatmul.mubr.msk.f32.gmra.mrb[194].mxu1 %vm3425_vm6, %v9233_v63 }
 0x5f7   : > { %4170 = vmatprep.mubr.f32.mxu1 %v7484_v0 }
 0x5fa   : > { %6378 = vmatmul.mubr.msk.f32.gmra.mrb[196].mxu1 %vm3425_vm6, %v9239_v10 }
 0x5fb   : > { %4176 = vmatprep.mubr.f32.mxu1 %v7484_v0 }
 0x5fe   : > { %6379 = vmatmul.mubr.msk.f32.gmra.mrb[198].mxu1 %vm3425_vm6, %v9237_v58 }
 0x5ff   : > { %4182 = vmatprep.mubr.f32.mxu1 %v7484_v0 }
 0x602   : > { %6380 = vmatmul.mubr.msk.f32.gmra.mrb[200].mxu1 %vm3425_vm6, %v9243_v42 }
 0x603   : > { %4188 = vmatprep.mubr.f32.mxu1 %v7484_v0 }
 0x606   : > { %6381 = vmatmul.mubr.msk.f32.gmra.mrb[202].mxu1 %vm3425_vm6, %v9241_v40 }
 0x607   : > { %4194 = vmatprep.mubr.f32.mxu1 %v7484_v0 }
 0x60a   : > { %6382 = vmatmul.mubr.msk.f32.gmra.mrb[204].mxu1 %vm3425_vm6, %v9247_v28 }
 0x60b   : > { %4200 = vmatprep.mubr.f32.mxu1 %v7484_v0 }
 0x60e   : > { %6383 = vmatmul.mubr.msk.f32.gmra.mrb[206].mxu1 %vm3425_vm6, %v9245_v21 }
 0x60f   : > { %4206 = vmatprep.mubr.f32.mxu1 %v7484_v0 }
 0x612   : > { %6384 = vmatmul.mubr.msk.f32.gmra.mrb[208].mxu1 %vm3425_vm6, %v9259_v11 }
 0x613   : > { %4212 = vmatprep.mubr.f32.mxu1 %v7484_v0 }
 0x616   : > { %6385 = vmatmul.mubr.msk.f32.gmra.mrb[210].mxu1 %vm3425_vm6, %v9257_v39 }
 0x617   : > { %4218 = vmatprep.mubr.f32.mxu1 %v7484_v0 }
 0x6a5   : > { %v7003_v59 = vpop.f32.mrb[176].mxu1 }
 0x6a6   : > { %v3846_v24 = vpop.f32.mrb[177].mxu1 }
 0x6a7   : > { %7015 = vmatprep.mubr.msk.f32.mxu0 %vm3425_vm6, %v3846_v24  ;;  %v4831_v24 = vld [vmem:[%s10405_s15 + $0x108] sm:$0xff] }
 0x6a8   : > { %7016 = vmatmul.mubr.msk.f32.vlgmr.msra.gmra.mrb[178].mxu0 %vm3425_vm6, %v7003_v59  ;;  %v4830_v59 = vld [vmem:[%s10405_s15 + $0x100] sm:$0xff] }
 0x6a9   : > { %v7006_v32 = vpop.f32.mrb[178].mxu1  ;;  %7239 = vmatpush1.bf16.msra.mxu0 %v7238_v15  ;;  %v4838_v15 = vld [vmem:[%s10405_s15 + $0x140] sm:$0xff] }
 0x6aa   : > { %v3856_v13 = vpop.f32.mrb[179].mxu1  ;;  %7241 = vmatprep.subr.bf16.mxu0 %v7240_v30  ;;  %v4839_v30 = vld [vmem:[%s10405_s15 + $0x148] sm:$0xff] }
 0x6ab   : > { %7018 = vmatprep.mubr.msk.f32.mxu0 %vm3425_vm6, %v3856_v13 }
 0x6ac   : > { %7019 = vmatmul.mubr.msk.f32.gmra.mrb[180].mxu0 %vm3425_vm6, %v7006_v32 }
 0x6ad   : > { %v4124_v22 = vpop.f32.mrb[180].mxu1  ;;  %7243 = vmatpush1.bf16.msra.mxu0 %v7242_v34  ;;  %4307 = vmatprep.mubr.f32.mxu0 %v7484_v0 }
 0x6ae   : > { %v4126_v5 = vpop.f32.mrb[181].mxu1  ;;  %7253 = vmatprep.subr.bf16.mxu0 %v7252_v46  ;;  %v9422_v27 = vmul.f32 %v4798_v25, %v4124_v22  ;;  %v4846_v22 = vld [vmem:[%s10405_s15 + $0x180] sm:$0xff]  ;;  %v4855_v25 = vld [vmem:[%s10405_s15 + $0x1c8] sm:$0xff] }
 0x6af   : > { %v4959_v55 = vmul.f32 %v4799_v33, %v4126_v5  ;;  %v4847_v5 = vld [vmem:[%s10405_s15 + $0x188] sm:$0xff] }
 0x6b0   : > { %6390 = vmatmul.mubr.msk.f32.vlgmr.msra.gmra.mrb[182].mxu0 %vm3425_vm6, %v9223_v52 }
 0x6b1   : > { %v4130_v14 = vpop.f32.mrb[182].mxu1  ;;  %4313 = vmatprep.mubr.f32.mxu0 %v7484_v0  ;;  %7255 = vmatpush1.bf16.msra.mxu0 %v7254_v61  ;;  %v4854_v61 = vld [vmem:[%s10405_s15 + $0x1c0] sm:$0xff] }
 0x6b2   : > { %v9424_v36 = vmul.f32 %v4806_v37, %v4130_v14  ;;  %v4132_v56 = vpop.f32.mrb[183].mxu1 }
 0x6b3   : > { %v4967_v31 = vmul.f32 %v4807_v18, %v4132_v56 }
 0x6b4   : > { %6391 = vmatmul.mubr.msk.f32.gmra.mrb[184].mxu0 %vm3425_vm6, %v9221_v20 }
 0x6b5   : > { %v7260_v29 = vpack.c.bf16 %v4967_v31, %v4959_v55  ;;  %v4136_v51 = vpop.f32.mrb[184].mxu1  ;;  %4319 = vmatprep.mubr.f32.mxu0 %v7484_v0  ;;  %v4809_v31 = vld [vmem:[%s10405_s15 + $0x58] sm:$0xff] }
 0x6b6   : > { %v4138_v47 = vpop.f32.mrb[185].mxu1  ;;  %v9446_v9 = vmul.f32 %v4814_v60, %v4136_v51  ;;  %v4862_v60 = vld [vmem:[%s10405_s15 + $0x200] sm:$0xff] }
 0x6b7   : > { %7261 = vmatprep.subr.bf16.mxu1 %v7260_v29  ;;  %v9450_v43 = vmul.f32 %v4815_v8, %v4138_v47  ;;  %v4863_v8 = vld [vmem:[%s10405_s15 + $0x208] sm:$0xff] }
 0x6b8   : > { %6392 = vmatmul.mubr.msk.f32.gmra.mrb[186].mxu0 %vm3425_vm6, %v9227_v17 }
 0x6b9   : > { %v4142_v53 = vpop.f32.mrb[186].mxu1  ;;  %4325 = vmatprep.mubr.f32.mxu0 %v7484_v0 }
 0x6ba   : > { %v9448_v16 = vmul.f32 %v4822_v44, %v4142_v53  ;;  %v4144_v54 = vpop.f32.mrb[187].mxu1  ;;  %v4870_v44 = vld [vmem:[%s10405_s15 + $0x240] sm:$0xff] }
 0x6bb   : > { %v9452_v57 = vmul.f32 %v4823_v50, %v4144_v54  ;;  %v4871_v50 = vld [vmem:[%s10405_s15 + $0x248] sm:$0xff] }
 0x6bc   : > { %6393 = vmatmul.mubr.msk.f32.gmra.mrb[188].mxu0 %vm3425_vm6, %v9225_v2 }
 0x6bd   : > { %v4148_v45 = vpop.f32.mrb[188].mxu1  ;;  %4331 = vmatprep.mubr.f32.mxu0 %v7484_v0 }
 0x6be   : > { %v4150_v38 = vpop.f32.mrb[189].mxu1  ;;  %v9476_v3 = vmul.f32 %v4830_v59, %v4148_v45 }
 0x6bf   : > { %v9480_v32 = vmul.f32 %v4831_v24, %v4150_v38 }
 0x6c0   : > { %6394 = vmatmul.mubr.msk.f32.gmra.mrb[190].mxu0 %vm3425_vm6, %v9231_v12 }
 0x6c1   : > { %v4154_v26 = vpop.f32.mrb[190].mxu1  ;;  %4337 = vmatprep.mubr.f32.mxu0 %v7484_v0 }
 0x6c2   : > { %v9478_v1 = vmul.f32 %v4838_v15, %v4154_v26  ;;  %v4156_v23 = vpop.f32.mrb[191].mxu1 }
 0x6c3   : > { %v9482_v34 = vmul.f32 %v4839_v30, %v4156_v23  ;;  %v4801_v30 = vld [vmem:[%s10405_s15 + $0x18] sm:$0xff] }
 0x6c4   : > { %6395 = vmatmul.mubr.msk.f32.gmra.mrb[192].mxu0 %vm3425_vm6, %v9229_v62 }
 0x6c5   : > { %v4160_v49 = vpop.f32.mrb[192].mxu1  ;;  %4343 = vmatprep.mubr.f32.mxu0 %v7484_v0 }
 0x6c6   : > { %v4162_v4 = vpop.f32.mrb[193].mxu1  ;;  %v9506_v33 = vmul.f32 %v4846_v22, %v4160_v49  ;;  %v4878_v49 = vld [vmem:[%s10405_s15 + $0x280] sm:$0xff]  ;;  %v4879_v22 = vld [vmem:[%s10405_s15 + $0x288] sm:$0xff] }
 0x6c7   : > { %v9510_v56 = vmul.f32 %v4847_v5, %v4162_v4  ;;  %v4886_v4 = vld [vmem:[%s10405_s15 + $0x2c0] sm:$0xff] }
 0x6c8   : > { %6396 = vmatmul.mubr.msk.f32.gmra.mrb[194].mxu0 %vm3425_vm6, %v9235_v19 }
 0x6c9   : > { %v4166_v37 = vpop.f32.mrb[194].mxu1  ;;  %4349 = vmatprep.mubr.f32.mxu0 %v7484_v0 }
 0x6ca   : > { %v9508_v18 = vmul.f32 %v4854_v61, %v4166_v37  ;;  %v4168_v14 = vpop.f32.mrb[195].mxu1  ;;  %v4887_v61 = vld [vmem:[%s10405_s15 + $0x2c8] sm:$0xff] }
 0x6cb   : > { %v9512_v55 = vmul.f32 %v4855_v25, %v4168_v14 }
 0x6cc   : > { %6397 = vmatmul.mubr.msk.f32.gmra.mrb[196].mxu0 %vm3425_vm6, %v9233_v63 }
 0x6cd   : > { %v4172_v51 = vpop.f32.mrb[196].mxu1  ;;  %4355 = vmatprep.mubr.f32.mxu0 %v7484_v0 }
 0x6ce   : > { %v4174_v47 = vpop.f32.mrb[197].mxu1  ;;  %v9536_v54 = vmul.f32 %v4862_v60, %v4172_v51 }
 0x6cf   : > { %v9540_v59 = vmul.f32 %v4863_v8, %v4174_v47 }
 0x6d0   : > { %6398 = vmatmul.mubr.msk.f32.gmra.mrb[198].mxu0 %vm3425_vm6, %v9239_v10 }
 0x6d1   : > { %v4178_v53 = vpop.f32.mrb[198].mxu1  ;;  %4361 = vmatprep.mubr.f32.mxu0 %v7484_v0 }
 0x6d2   : > { %v9538_v45 = vmul.f32 %v4870_v44, %v4178_v53  ;;  %v4180_v38 = vpop.f32.mrb[199].mxu1  ;;  %v4894_v53 = vld [vmem:[%s10405_s15 + $0x300] sm:$0xff] }
 0x6d3   : > { %v9542_v15 = vmul.f32 %v4871_v50, %v4180_v38  ;;  %v4902_v38 = vld [vmem:[%s10405_s15 + $0x340] sm:$0xff] }
 0x6d4   : > { %6399 = vmatmul.mubr.msk.f32.gmra.mrb[200].mxu0 %vm3425_vm6, %v9237_v58 }
 0x6d5   : > { %v4184_v26 = vpop.f32.mrb[200].mxu1  ;;  %4367 = vmatprep.mubr.f32.mxu0 %v7484_v0 }
 0x6d6   : > { %v4186_v23 = vpop.f32.mrb[201].mxu1  ;;  %v9566_v25 = vmul.f32 %v4878_v49, %v4184_v26  ;;  %v4895_v26 = vld [vmem:[%s10405_s15 + $0x308] sm:$0xff] }
 0x6d7   : > { %v9570_v51 = vmul.f32 %v4879_v22, %v4186_v23  ;;  %v4903_v23 = vld [vmem:[%s10405_s15 + $0x348] sm:$0xff] }
 0x6d8   : > { %6400 = vmatmul.mubr.msk.f32.gmra.mrb[202].mxu0 %vm3425_vm6, %v9243_v42 }
 0x6d9   : > { %v4190_v5 = vpop.f32.mrb[202].mxu1  ;;  %4373 = vmatprep.mubr.f32.mxu0 %v7484_v0 }
 0x6da   : > { %v9568_v37 = vmul.f32 %v4886_v4, %v4190_v5  ;;  %v4192_v14 = vpop.f32.mrb[203].mxu1 }
 0x6db   : > { %v9572_v47 = vmul.f32 %v4887_v61, %v4192_v14 }
 0x6dc   : > { %6401 = vmatmul.mubr.msk.f32.gmra.mrb[204].mxu0 %vm3425_vm6, %v9241_v40 }
 0x6dd   : > { %v4196_v8 = vpop.f32.mrb[204].mxu1  ;;  %4379 = vmatprep.mubr.f32.mxu0 %v7484_v0 }
 0x6de   : > { %v4198_v50 = vpop.f32.mrb[205].mxu1  ;;  %v9596_v4 = vmul.f32 %v4894_v53, %v4196_v8  ;;  %v4918_v53 = vld [vmem:[%s10405_s15 + $0x3c0] sm:$0xff] }
 0x6df   : > { %v9600_v5 = vmul.f32 %v4895_v26, %v4198_v50  ;;  %v4910_v50 = vld [vmem:[%s10405_s15 + $0x380] sm:$0xff]  ;;  %v4919_v26 = vld [vmem:[%s10405_s15 + $0x3c8] sm:$0xff] }
 0x6e0   : > { %6402 = vmatmul.mubr.msk.f32.gmra.mrb[206].mxu0 %vm3425_vm6, %v9247_v28 }
 0x6e1   : > { %v4202_v49 = vpop.f32.mrb[206].mxu1  ;;  %4385 = vmatprep.mubr.f32.mxu0 %v7484_v0 }
 0x6e2   : > { %v9598_v22 = vmul.f32 %v4902_v38, %v4202_v49  ;;  %v4204_v61 = vpop.f32.mrb[207].mxu1  ;;  %v4911_v38 = vld [vmem:[%s10405_s15 + $0x388] sm:$0xff] }
 0x6e3   : > { %v9602_v14 = vmul.f32 %v4903_v23, %v4204_v61 }
 0x6e4   : > { %6403 = vmatmul.mubr.msk.f32.gmra.mrb[208].mxu0 %vm3425_vm6, %v9245_v21 }
 0x6e5   : > { %v4208_v44 = vpop.f32.mrb[208].mxu1  ;;  %4391 = vmatprep.mubr.f32.mxu0 %v7484_v0 }
 0x6e6   : > { %v4210_v8 = vpop.f32.mrb[209].mxu1  ;;  %v9626_v49 = vmul.f32 %v4910_v50, %v4208_v44  ;;  %v3989_v44 = vld [vmem:[%s10404_s14 + $0xb8] sm:$0xff] }
 0x6e7   : > { %v9630_v60 = vmul.f32 %v4911_v38, %v4210_v8  ;;  %v3988_v8 = vld [vmem:[%s10404_s14 + $0xb0] sm:$0xff] }
 0x6e8   : > { %6404 = vmatmul.mubr.msk.f32.gmra.mrb[210].mxu0 %vm3425_vm6, %v9259_v11 }
 0x6e9   : > { %v4214_v23 = vpop.f32.mrb[210].mxu1  ;;  %4397 = vmatprep.mubr.f32.mxu0 %v7484_v0 }
 0x6ea   : > { %v9628_v61 = vmul.f32 %v4918_v53, %v4214_v23  ;;  %v4216_v6 = vpop.f32.mrb[211].mxu1  ;;  %v3996_v53 = vld [vmem:[%s10404_s14 + $0xf0] sm:$0xff] }
 0x6eb   : > { %v9632_v24 = vmul.f32 %v4919_v26, %v4216_v6  ;;  %v3997_v6 = vld [vmem:[%s10404_s14 + $0xf8] sm:$0xff]  ;;  %v7258_v38 = vpack.c.bf16 %v3996_v53, %v3988_v8  ;;  %v4800_v53 = vld [vmem:[%s10405_s15 + $0x10] sm:$0xff] }
 0x6ec   : > { %6405 = vmatmul.mubr.msk.f32.gmra.mrb[212].mxu0 %vm3425_vm6, %v9257_v39  ;;  %v7256_v50 = vpack.c.bf16 %v3997_v6, %v3989_v44 }
 0x6ed   : > { %4403 = vmatprep.mubr.f32.mxu0 %v7484_v0 }
 0x6ee   : > { %7257 = vmatprep.subr.bf16.mxu0 %v7256_v50 }
 0x6ef   : > { %7259 = vmatpush1.bf16.msra.mxu0 %v7258_v38  ;;  %v4808_v38 = vld [vmem:[%s10405_s15 + $0x50] sm:$0xff] }
 0x77b   : > { %v9653_v26 = vpop.f32.mrb[178].mxu0 }
 0x77c   : > { %10432 = vst [vmem:[#allocation3_spill] sm:$0xff] %v9653_v26  ;;  %v9655_v23 = vpop.f32.mrb[179].mxu0 }
 0x77d   : > { %10433 = vst [vmem:[#allocation4_spill] sm:$0xff] %v9655_v23  ;;  %6386 = vmatmul.mubr.msk.f32.gmra.mrb[212].mxu1 %vm3425_vm6, %v9655_v23  ;;  %6406 = vmatmul.mubr.msk.f32.gmra.mrb[214].mxu0 %vm3425_vm6, %v9655_v23 }
 0x77e   : > { %4224 = vmatprep.mubr.f32.mxu1 %v7484_v0  ;;  %4409 = vmatprep.mubr.f32.mxu0 %v7484_v0 }
 0x77f   : > { %v9663_v44 = vpop.f32.mrb[180].mxu0 }
 0x780   : > { %v9665_v6 = vpop.f32.mrb[181].mxu0 }
 0x781   : > { %10434 = vst [vmem:[#allocation5_spill] sm:$0xff] %v9665_v6  ;;  %6387 = vmatmul.mubr.msk.f32.gmra.mrb[214].mxu1 %vm3425_vm6, %v9653_v26  ;;  %6407 = vmatmul.mubr.msk.f32.gmra.mrb[216].mxu0 %vm3425_vm6, %v9653_v26 }
 0x782   : > { %4230 = vmatprep.mubr.f32.mxu1 %v7484_v0  ;;  %4415 = vmatprep.mubr.f32.mxu0 %v7484_v0 }
 0x783   : > { %v4309_v8 = vpop.f32.mrb[182].mxu0 }
 0x784   : > { %v4311_v50 = vpop.f32.mrb[183].mxu0  ;;  %v4960_v13 = vmul.f32 %v4800_v53, %v4309_v8 }
 0x785   : > { %6388 = vmatmul.mubr.msk.f32.gmra.mrb[216].mxu1 %vm3425_vm6, %v9665_v6  ;;  %6408 = vmatmul.mubr.msk.f32.gmra.mrb[218].mxu0 %vm3425_vm6, %v9665_v6  ;;  %v4961_v35 = vmul.f32 %v4801_v30, %v4311_v50 }
 0x786   : > { %4236 = vmatprep.mubr.f32.mxu1 %v7484_v0  ;;  %4421 = vmatprep.mubr.f32.mxu0 %v7484_v0 }
 0x787   : > { %v4315_v29 = vpop.f32.mrb[184].mxu0 }
 0x788   : > { %v4968_v46 = vmul.f32 %v4808_v38, %v4315_v29  ;;  %v4317_v48 = vpop.f32.mrb[185].mxu0  ;;  %v4816_v29 = vld [vmem:[%s10405_s15 + $0x90] sm:$0xff] }
 0x789   : > { %v4969_v7 = vmul.f32 %v4809_v31, %v4317_v48  ;;  %6389 = vmatmul.mubr.msk.f32.gmra.mrb[218].mxu1 %vm3425_vm6, %v9663_v44  ;;  %6409 = vmatmul.mubr.msk.f32.gmra.mrb[220].mxu0 %vm3425_vm6, %v9663_v44  ;;  %v4824_v48 = vld [vmem:[%s10405_s15 + $0xd0] sm:$0xff] }
 0x78a   : > { %v7302_v41 = vpack.c.bf16 %v4968_v46, %v4960_v13  ;;  %4492 = vmatprep.mubr.f32.mxu1 %v7484_v0  ;;  %4677 = vmatprep.mubr.f32.mxu0 %v7484_v0  ;;  %v4825_v13 = vld [vmem:[%s10405_s15 + $0xd8] sm:$0xff] }
 0x78b   : > { %v7300_v6 = vpack.c.bf16 %v4969_v7, %v4961_v35  ;;  %v4321_v26 = vpop.f32.mrb[186].mxu0  ;;  %v4817_v7 = vld [vmem:[%s10405_s15 + $0x98] sm:$0xff]  ;;  %v10435_v35 = vpack.c.bf16 %v9424_v36, %v9422_v27 }
 0x78c   : > { %v4323_v23 = vpop.f32.mrb[187].mxu0  ;;  %v4976_v31 = vmul.f32 %v4816_v29, %v4321_v26 }
 0x78d   : > { %6410 = vmatmul.mubr.msk.f32.vlgmr.msra.gmra.mrb[220].mxu1 %vm3425_vm6, %v9223_v52  ;;  %6430 = vmatmul.mubr.msk.f32.vlgmr.msra.gmra.mrb[222].mxu0 %vm3425_vm6, %v9223_v52  ;;  %v10436_v52 = vpack.c.bf16 %v9452_v57, %v9450_v43  ;;  %v4977_v27 = vmul.f32 %v4817_v7, %v4323_v23  ;;  %v10438_v57 = vpack.c.bf16 %v9482_v34, %v9480_v32  ;;  %v4841_v34 = vld [vmem:[%s10405_s15 + $0x158] sm:$0xff] }
 0x78e   : > { %7263 = vmatpush1.bf16.msra.mxu1 %v10435_v35  ;;  %7301 = vmatprep.subr.bf16.mxu0 %v7300_v6  ;;  %v10439_v32 = vpack.c.bf16 %v9478_v1, %v9476_v3  ;;  %v10442_v7 = vpack.c.bf16 %v9542_v15, %v9540_v59  ;;  %v10443_v59 = vpack.c.bf16 %v9538_v45, %v9536_v54  ;;  %v4857_v15 = vld [vmem:[%s10405_s15 + $0x1d8] sm:$0xff] }
 0x78f   : > { %7265 = vmatprep.subr.bf16.mxu1 %v10436_v52  ;;  %7303 = vmatpush1.bf16.msra.mxu0 %v7302_v41  ;;  %v4327_v46 = vpop.f32.mrb[188].mxu0  ;;  %v10437_v41 = vpack.c.bf16 %v9448_v16, %v9446_v9  ;;  %v4840_v9 = vld [vmem:[%s10405_s15 + $0x150] sm:$0xff]  ;;  %v4833_v16 = vld [vmem:[%s10405_s15 + $0x118] sm:$0xff] }
 0x790   : > { %v4984_v30 = vmul.f32 %v4824_v48, %v4327_v46  ;;  %v4329_v8 = vpop.f32.mrb[189].mxu0  ;;  %4498 = vmatprep.mubr.f32.mxu1 %v7484_v0  ;;  %4683 = vmatprep.mubr.f32.mxu0 %v7484_v0 }
 0x791   : > { %v4985_v36 = vmul.f32 %v4825_v13, %v4329_v8  ;;  %6411 = vmatmul.mubr.msk.f32.gmra.mrb[222].mxu1 %vm3425_vm6, %v9221_v20  ;;  %6431 = vmatmul.mubr.msk.f32.gmra.mrb[224].mxu0 %vm3425_vm6, %v9221_v20  ;;  %v4832_v20 = vld [vmem:[%s10405_s15 + $0x110] sm:$0xff] }
 0x792   : > { %v7306_v6 = vpack.c.bf16 %v4984_v30, %v4976_v31  ;;  %7267 = vmatpush1.bf16.msra.mxu1 %v10437_v41  ;;  %4504 = vmatprep.mubr.f32.mxu1 %v7484_v0 }
 0x793   : > { %v7304_v43 = vpack.c.bf16 %v4985_v36, %v4977_v27  ;;  %7269 = vmatprep.subr.bf16.mxu1 %v10438_v57  ;;  %v4333_v26 = vpop.f32.mrb[190].mxu0  ;;  %4689 = vmatprep.mubr.f32.mxu0 %v7484_v0  ;;  %v10446_v27 = vpack.c.bf16 %v9602_v14, %v9600_v5  ;;  %v10447_v5 = vpack.c.bf16 %v9598_v22, %v9596_v4  ;;  %v4873_v14 = vld [vmem:[%s10405_s15 + $0x258] sm:$0xff] }
 0x794   : > { %v4335_v23 = vpop.f32.mrb[191].mxu0  ;;  %v4992_v53 = vmul.f32 %v4832_v20, %v4333_v26 }
 0x795   : > { %6412 = vmatmul.mubr.msk.f32.gmra.mrb[224].mxu1 %vm3425_vm6, %v9227_v17  ;;  %6432 = vmatmul.mubr.msk.f32.gmra.mrb[226].mxu0 %vm3425_vm6, %v9227_v17  ;;  %v10440_v17 = vpack.c.bf16 %v9512_v55, %v9510_v56  ;;  %v4993_v3 = vmul.f32 %v4833_v16, %v4335_v23  ;;  %v10441_v56 = vpack.c.bf16 %v9508_v18, %v9506_v33  ;;  %v4856_v33 = vld [vmem:[%s10405_s15 + $0x1d0] sm:$0xff]  ;;  %v4849_v18 = vld [vmem:[%s10405_s15 + $0x198] sm:$0xff] }
 0x796   : > { %7271 = vmatpush1.bf16.msra.mxu1 %v10439_v32  ;;  %7305 = vmatprep.subr.bf16.mxu0 %v7304_v43  ;;  %v4880_v16 = vld [vmem:[%s10405_s15 + $0x290] sm:$0xff] }
 0x797   : > { %7273 = vmatprep.subr.bf16.mxu1 %v10440_v17  ;;  %7307 = vmatpush1.bf16.msra.mxu0 %v7306_v6  ;;  %v4339_v50 = vpop.f32.mrb[192].mxu0 }
 0x798   : > { %v5000_v38 = vmul.f32 %v4840_v9, %v4339_v50  ;;  %v4341_v29 = vpop.f32.mrb[193].mxu0  ;;  %4510 = vmatprep.mubr.f32.mxu1 %v7484_v0  ;;  %4695 = vmatprep.mubr.f32.mxu0 %v7484_v0 }
 0x799   : > { %v5001_v1 = vmul.f32 %v4841_v34, %v4341_v29  ;;  %6413 = vmatmul.mubr.msk.f32.gmra.mrb[226].mxu1 %vm3425_vm6, %v9225_v2  ;;  %6433 = vmatmul.mubr.msk.f32.gmra.mrb[228].mxu0 %vm3425_vm6, %v9225_v2  ;;  %v4848_v2 = vld [vmem:[%s10405_s15 + $0x190] sm:$0xff] }
 0x79a   : > { %v7310_v48 = vpack.c.bf16 %v5000_v38, %v4992_v53  ;;  %7275 = vmatpush1.bf16.msra.mxu1 %v10441_v56  ;;  %4516 = vmatprep.mubr.f32.mxu1 %v7484_v0  ;;  %v4897_v56 = vld [vmem:[%s10405_s15 + $0x318] sm:$0xff] }
 0x79b   : > { %v7308_v55 = vpack.c.bf16 %v5001_v1, %v4993_v3  ;;  %7277 = vmatprep.subr.bf16.mxu1 %v10442_v7  ;;  %v4345_v35 = vpop.f32.mrb[194].mxu0  ;;  %4701 = vmatprep.mubr.f32.mxu0 %v7484_v0 }
 0x79c   : > { %v4347_v13 = vpop.f32.mrb[195].mxu0  ;;  %v5008_v46 = vmul.f32 %v4848_v2, %v4345_v35 }
 0x79d   : > { %6414 = vmatmul.mubr.msk.f32.gmra.mrb[228].mxu1 %vm3425_vm6, %v9231_v12  ;;  %6434 = vmatmul.mubr.msk.f32.gmra.mrb[230].mxu0 %vm3425_vm6, %v9231_v12  ;;  %v10444_v12 = vpack.c.bf16 %v9572_v47, %v9570_v51  ;;  %v5009_v54 = vmul.f32 %v4849_v18, %v4347_v13  ;;  %v10445_v51 = vpack.c.bf16 %v9568_v37, %v9566_v25  ;;  %v4872_v25 = vld [vmem:[%s10405_s15 + $0x250] sm:$0xff]  ;;  %v4865_v37 = vld [vmem:[%s10405_s15 + $0x218] sm:$0xff] }
 0x79e   : > { %7279 = vmatpush1.bf16.msra.mxu1 %v10443_v59  ;;  %7309 = vmatprep.subr.bf16.mxu0 %v7308_v55  ;;  %v4905_v55 = vld [vmem:[%s10405_s15 + $0x358] sm:$0xff] }
 0x79f   : > { %7281 = vmatprep.subr.bf16.mxu1 %v10444_v12  ;;  %7311 = vmatpush1.bf16.msra.mxu0 %v7310_v48  ;;  %v4351_v52 = vpop.f32.mrb[196].mxu0  ;;  %v4896_v48 = vld [vmem:[%s10405_s15 + $0x310] sm:$0xff] }
 0x7a0   : > { %v5016_v31 = vmul.f32 %v4856_v33, %v4351_v52  ;;  %v4353_v30 = vpop.f32.mrb[197].mxu0  ;;  %4522 = vmatprep.mubr.f32.mxu1 %v7484_v0  ;;  %4707 = vmatprep.mubr.f32.mxu0 %v7484_v0  ;;  %v4912_v52 = vld [vmem:[%s10405_s15 + $0x390] sm:$0xff] }
 0x7a1   : > { %v5017_v45 = vmul.f32 %v4857_v15, %v4353_v30  ;;  %6415 = vmatmul.mubr.msk.f32.gmra.mrb[230].mxu1 %vm3425_vm6, %v9229_v62  ;;  %6435 = vmatmul.mubr.msk.f32.gmra.mrb[232].mxu0 %vm3425_vm6, %v9229_v62  ;;  %v4864_v62 = vld [vmem:[%s10405_s15 + $0x210] sm:$0xff] }
 0x7a2   : > { %v7314_v8 = vpack.c.bf16 %v5016_v31, %v5008_v46  ;;  %7283 = vmatpush1.bf16.msra.mxu1 %v10445_v51  ;;  %4528 = vmatprep.mubr.f32.mxu1 %v7484_v0  ;;  %v4913_v46 = vld [vmem:[%s10405_s15 + $0x398] sm:$0xff] }
 0x7a3   : > { %v7312_v47 = vpack.c.bf16 %v5017_v45, %v5009_v54  ;;  %7285 = vmatprep.subr.bf16.mxu1 %v10446_v27  ;;  %v4357_v36 = vpop.f32.mrb[198].mxu0  ;;  %4713 = vmatprep.mubr.f32.mxu0 %v7484_v0  ;;  %v4921_v31 = vld [vmem:[%s10405_s15 + $0x3d8] sm:$0xff] }
 0x7a4   : > { %v4359_v6 = vpop.f32.mrb[199].mxu0  ;;  %v5024_v43 = vmul.f32 %v4864_v62, %v4357_v36  ;;  %v9947_v36 = vld [vmem:[%s10406_s16 + $0x8] sm:$0x1f] }
 0x7a5   : > { %6416 = vmatmul.mubr.msk.f32.gmra.mrb[232].mxu1 %vm3425_vm6, %v9235_v19  ;;  %6436 = vmatmul.mubr.msk.f32.gmra.mrb[234].mxu0 %vm3425_vm6, %v9235_v19  ;;  %v10448_v19 = vpack.c.bf16 %v9632_v24, %v9630_v60  ;;  %v5025_v4 = vmul.f32 %v4865_v37, %v4359_v6  ;;  %v10449_v24 = vpack.c.bf16 %v9628_v61, %v9626_v49  ;;  %v4881_v49 = vld [vmem:[%s10405_s15 + $0x298] sm:$0xff] }
 0x7a6   : > { %7287 = vmatpush1.bf16.msra.mxu1 %v10447_v5  ;;  %7313 = vmatprep.subr.bf16.mxu0 %v7312_v47  ;;  %v4889_v61 = vld [vmem:[%s10405_s15 + $0x2d8] sm:$0xff] }
 0x7a7   : > { %7289 = vmatprep.subr.bf16.mxu1 %v10448_v19  ;;  %7315 = vmatpush1.bf16.msra.mxu0 %v7314_v8  ;;  %v4363_v41 = vpop.f32.mrb[200].mxu0  ;;  %v4934_v19 = vld [vmem:[%s10405_s15 + $0x440] sm:$0xff] }
 0x7a8   : > { %v5032_v57 = vmul.f32 %v4872_v25, %v4363_v41  ;;  %v4365_v26 = vpop.f32.mrb[201].mxu0  ;;  %4534 = vmatprep.mubr.f32.mxu1 %v7484_v0  ;;  %4719 = vmatprep.mubr.f32.mxu0 %v7484_v0  ;;  %v4926_v25 = vld [vmem:[%s10405_s15 + $0x400] sm:$0xff]  ;;  %v4936_v41 = vld [vmem:[%s10405_s15 + $0x450] sm:$0xff] }
 0x7a9   : > { %v5033_v22 = vmul.f32 %v4873_v14, %v4365_v26  ;;  %6417 = vmatmul.mubr.msk.f32.gmra.mrb[234].mxu1 %vm3425_vm6, %v9233_v63  ;;  %6437 = vmatmul.mubr.msk.f32.gmra.mrb[236].mxu0 %vm3425_vm6, %v9233_v63  ;;  %v4888_v63 = vld [vmem:[%s10405_s15 + $0x2d0] sm:$0xff]  ;;  %v4927_v14 = vld [vmem:[%s10405_s15 + $0x408] sm:$0xff]  ;;  %v4937_v26 = vld [vmem:[%s10405_s15 + $0x458] sm:$0xff] }
 0x7aa   : > { %v7318_v23 = vpack.c.bf16 %v5032_v57, %v5024_v43  ;;  %7291 = vmatpush1.bf16.msra.mxu1 %v10449_v24  ;;  %4540 = vmatprep.mubr.f32.mxu1 %v7484_v0  ;;  %v4929_v43 = vld [vmem:[%s10405_s15 + $0x418] sm:$0xff]  ;;  %v4935_v57 = vld [vmem:[%s10405_s15 + $0x448] sm:$0xff] }
 0x7ab   : > { %v7316_v60 = vpack.c.bf16 %v5033_v22, %v5025_v4  ;;  %v4369_v20 = vpop.f32.mrb[202].mxu0  ;;  %4725 = vmatprep.mubr.f32.mxu0 %v7484_v0 }
 0x7ac   : > { %v4371_v9 = vpop.f32.mrb[203].mxu0 }
 0x7ad   : > { %6418 = vmatmul.mubr.msk.f32.gmra.mrb[236].mxu1 %vm3425_vm6, %v9239_v10  ;;  %6438 = vmatmul.mubr.msk.f32.gmra.mrb[238].mxu0 %vm3425_vm6, %v9239_v10  ;;  %v5040_v10 = vmul.f32 %v4880_v16, %v4369_v20  ;;  %v5041_v50 = vmul.f32 %v4881_v49, %v4371_v9 }
 0x7ae   : > { %7317 = vmatprep.subr.bf16.mxu0 %v7316_v60  ;;  %4546 = vmatprep.mubr.f32.mxu1 %v7484_v0 }
 0x7af   : > { %7319 = vmatpush1.bf16.msra.mxu0 %v7318_v23  ;;  %v4375_v32 = vpop.f32.mrb[204].mxu0  ;;  %4731 = vmatprep.mubr.f32.mxu0 %v7484_v0 }
 0x7b0   : > { %v5048_v34 = vmul.f32 %v4888_v63, %v4375_v32  ;;  %v4377_v17 = vpop.f32.mrb[205].mxu0 }
 0x7b1   : > { %v5049_v53 = vmul.f32 %v4889_v61, %v4377_v17  ;;  %6419 = vmatmul.mubr.msk.f32.gmra.mrb[238].mxu1 %vm3425_vm6, %v9237_v58  ;;  %6439 = vmatmul.mubr.msk.f32.gmra.mrb[240].mxu0 %vm3425_vm6, %v9237_v58  ;;  %v4904_v58 = vld [vmem:[%s10405_s15 + $0x350] sm:$0xff] }
 0x7b2   : > { %v7322_v38 = vpack.c.bf16 %v5048_v34, %v5040_v10  ;;  %4552 = vmatprep.mubr.f32.mxu1 %v7484_v0  ;;  %4737 = vmatprep.mubr.f32.mxu0 %v7484_v0 }
 0x7b3   : > { %v7320_v29 = vpack.c.bf16 %v5049_v53, %v5041_v50  ;;  %v4381_v3 = vpop.f32.mrb[206].mxu0 }
 0x7b4   : > { %v4383_v1 = vpop.f32.mrb[207].mxu0 }
 0x7b5   : > { %6420 = vmatmul.mubr.msk.f32.gmra.mrb[240].mxu1 %vm3425_vm6, %v9243_v42  ;;  %6440 = vmatmul.mubr.msk.f32.gmra.mrb[242].mxu0 %vm3425_vm6, %v9243_v42  ;;  %v5056_v42 = vmul.f32 %v4896_v48, %v4381_v3  ;;  %v5057_v2 = vmul.f32 %v4897_v56, %v4383_v1  ;;  %v4944_v3 = vld [vmem:[%s10405_s15 + $0x490] sm:$0xff]  ;;  %v4950_v56 = vld [vmem:[%s10405_s15 + $0x4c0] sm:$0xff] }
 0x7b6   : > { %7321 = vmatprep.subr.bf16.mxu0 %v7320_v29  ;;  %4558 = vmatprep.mubr.f32.mxu1 %v7484_v0  ;;  %v4942_v29 = vld [vmem:[%s10405_s15 + $0x480] sm:$0xff] }
 0x7b7   : > { %7323 = vmatpush1.bf16.msra.mxu0 %v7322_v38  ;;  %v4387_v7 = vpop.f32.mrb[208].mxu0  ;;  %4743 = vmatprep.mubr.f32.mxu0 %v7484_v0 }
 0x7b8   : > { %v5064_v35 = vmul.f32 %v4904_v58, %v4387_v7  ;;  %v4389_v13 = vpop.f32.mrb[209].mxu0  ;;  %v4943_v58 = vld [vmem:[%s10405_s15 + $0x488] sm:$0xff]  ;;  %v4945_v7 = vld [vmem:[%s10405_s15 + $0x498] sm:$0xff] }
 0x7b9   : > { %v5065_v33 = vmul.f32 %v4905_v55, %v4389_v13  ;;  %6421 = vmatmul.mubr.msk.f32.gmra.mrb[242].mxu1 %vm3425_vm6, %v9241_v40  ;;  %6441 = vmatmul.mubr.msk.f32.gmra.mrb[244].mxu0 %vm3425_vm6, %v9241_v40  ;;  %v4920_v40 = vld [vmem:[%s10405_s15 + $0x3d0] sm:$0xff] }
 0x7ba   : > { %v7326_v18 = vpack.c.bf16 %v5064_v35, %v5056_v42  ;;  %4564 = vmatprep.mubr.f32.mxu1 %v7484_v0  ;;  %4749 = vmatprep.mubr.f32.mxu0 %v7484_v0  ;;  %v4952_v55 = vld [vmem:[%s10405_s15 + $0x4d0] sm:$0xff]  ;;  %v4951_v42 = vld [vmem:[%s10405_s15 + $0x4c8] sm:$0xff]  ;;  %v4953_v35 = vld [vmem:[%s10405_s15 + $0x4d8] sm:$0xff] }
 0x7bb   : > { %v7324_v59 = vpack.c.bf16 %v5065_v33, %v5057_v2  ;;  %v4393_v15 = vpop.f32.mrb[210].mxu0 }
 0x7bc   : > { %v4395_v12 = vpop.f32.mrb[211].mxu0 }
 0x7bd   : > { %6422 = vmatmul.mubr.msk.f32.gmra.mrb[244].mxu1 %vm3425_vm6, %v9247_v28  ;;  %6442 = vmatmul.mubr.msk.f32.gmra.mrb[246].mxu0 %vm3425_vm6, %v9247_v28  ;;  %v5072_v28 = vmul.f32 %v4912_v52, %v4393_v15  ;;  %v5073_v8 = vmul.f32 %v4913_v46, %v4395_v12 }
 0x7be   : > { %7325 = vmatprep.subr.bf16.mxu0 %v7324_v59  ;;  %4570 = vmatprep.mubr.f32.mxu1 %v7484_v0 }
 0x7bf   : > { %7327 = vmatpush1.bf16.msra.mxu0 %v7326_v18  ;;  %v4399_v30 = vpop.f32.mrb[212].mxu0  ;;  %4755 = vmatprep.mubr.f32.mxu0 %v7484_v0 }
 0x7c0   : > { %v5080_v54 = vmul.f32 %v4920_v40, %v4399_v30  ;;  %v4401_v45 = vpop.f32.mrb[213].mxu0 }
 0x7c1   : > { %v5081_v51 = vmul.f32 %v4921_v31, %v4401_v45  ;;  %6423 = vmatmul.mubr.msk.f32.gmra.mrb[246].mxu1 %vm3425_vm6, %v9245_v21  ;;  %6443 = vmatmul.mubr.msk.f32.gmra.mrb[248].mxu0 %vm3425_vm6, %v9245_v21  ;;  %v10450_v21 = vld [vmem:[#allocation4_spill] sm:$0xff] }
 0x7c2   : > { %v7330_v47 = vpack.c.bf16 %v5080_v54, %v5072_v28  ;;  %4576 = vmatprep.mubr.f32.mxu1 %v7484_v0  ;;  %4761 = vmatprep.mubr.f32.mxu0 %v7484_v0 }
 0x7c3   : > { %v7328_v27 = vpack.c.bf16 %v5081_v51, %v5073_v8 }
 0x7c5   : > { %6424 = vmatmul.mubr.msk.f32.gmra.mrb[248].mxu1 %vm3425_vm6, %v9259_v11  ;;  %6444 = vmatmul.mubr.msk.f32.gmra.mrb[250].mxu0 %vm3425_vm6, %v9259_v11  ;;  %v10451_v11 = vld [vmem:[#allocation3_spill] sm:$0xff] }
 0x7c6   : > { %7329 = vmatprep.subr.bf16.mxu0 %v7328_v27  ;;  %4582 = vmatprep.mubr.f32.mxu1 %v7484_v0  ;;  %v4802_v27 = vld [vmem:[%s10405_s15 + $0x20] sm:$0xff] }
 0x7c7   : > { %7331 = vmatpush1.bf16.msra.mxu0 %v7330_v47  ;;  %4767 = vmatprep.mubr.f32.mxu0 %v7484_v0 }
 0x7c9   : > { %6425 = vmatmul.mubr.msk.f32.gmra.mrb[250].mxu1 %vm3425_vm6, %v9257_v39  ;;  %6445 = vmatmul.mubr.msk.f32.gmra.mrb[252].mxu0 %vm3425_vm6, %v9257_v39  ;;  %v10452_v39 = vld [vmem:[#allocation5_spill] sm:$0xff] }
 0x7ca   : > { %4588 = vmatprep.mubr.f32.mxu1 %v7484_v0  ;;  %4773 = vmatprep.mubr.f32.mxu0 %v7484_v0 }
 0x7cd   : > { %6426 = vmatmul.mubr.msk.f32.gmra.mrb[252].mxu1 %vm3425_vm6, %v10450_v21  ;;  %6446 = vmatmul.mubr.msk.f32.gmra.mrb[254].mxu0 %vm3425_vm6, %v10450_v21  ;;  %v4804_v21 = vld [vmem:[%s10405_s15 + $0x30] sm:$0xff] }
 0x7ce   : > { %4594 = vmatprep.mubr.f32.mxu1 %v7484_v0  ;;  %4779 = vmatprep.mubr.f32.mxu0 %v7484_v0 }
 0x7d1   : > { %6427 = vmatmul.mubr.msk.f32.gmra.mrb[254].mxu1 %vm3425_vm6, %v10451_v11  ;;  %6447 = vmatmul.mubr.msk.f32.gmra.mrb[0].mxu0 %vm3425_vm6, %v10451_v11 }
 0x7d2   : > { %4600 = vmatprep.mubr.f32.mxu1 %v7484_v0  ;;  %4785 = vmatprep.mubr.f32.mxu0 %v7484_v0 }
 0x7d5   : > { %6428 = vmatmul.mubr.msk.f32.gmra.mrb[0].mxu1 %vm3425_vm6, %v10452_v39  ;;  %6448 = vmatmul.mubr.msk.f32.gmra.mrb[2].mxu0 %vm3425_vm6, %v10452_v39  ;;  %v4803_v39 = vld [vmem:[%s10405_s15 + $0x28] sm:$0xff] }
 0x7d6   : > { %4606 = vmatprep.mubr.f32.mxu1 %v7484_v0  ;;  %4791 = vmatprep.mubr.f32.mxu0 %v7484_v0 }
 0x7d9   : > { %6429 = vmatmul.mubr.msk.f32.gmra.mrb[2].mxu1 %vm3425_vm6, %v9663_v44  ;;  %6449 = vmatmul.mubr.msk.f32.gmra.mrb[4].mxu0 %vm3425_vm6, %v9663_v44  ;;  %v4928_v44 = vld [vmem:[%s10405_s15 + $0x410] sm:$0xff] }
 0x7da   : > { %6450 = vmatprep.mubr.msk.f32.mxu1 %vm3425_vm6, %v9947_v36  ;;  %6451 = vmatprep.mubr.msk.f32.mxu0 %vm3425_vm6, %v9947_v36 }
 0x850   : > { %v4220_v6 = vpop.f32.mrb[212].mxu1  ;;  %v4405_v62 = vpop.f32.mrb[214].mxu0 }
 0x851   : > { %v4222_v37 = vpop.f32.mrb[213].mxu1  ;;  %v4407_v5 = vpop.f32.mrb[215].mxu0  ;;  %v5086_v23 = vmul.f32 %v4926_v25, %v4220_v6  ;;  %v5088_v24 = vmul.f32 %v4928_v44, %v4405_v62  ;;  %v4805_v62 = vld [vmem:[%s10405_s15 + $0x38] sm:$0xff]  ;;  %v4810_v25 = vld [vmem:[%s10405_s15 + $0x60] sm:$0xff]  ;;  %v4812_v44 = vld [vmem:[%s10405_s15 + $0x70] sm:$0xff] }
 0x852   : > { %v5087_v63 = vmul.f32 %v4927_v14, %v4222_v37  ;;  %v5089_v49 = vmul.f32 %v4929_v43, %v4407_v5  ;;  %v4811_v37 = vld [vmem:[%s10405_s15 + $0x68] sm:$0xff]  ;;  %v4813_v5 = vld [vmem:[%s10405_s15 + $0x78] sm:$0xff]  ;;  %v10028_v14 = vld [vmem:[%s10406_s16] sm:$0x1f] }
 0x854   : > { %v4226_v4 = vpop.f32.mrb[214].mxu1  ;;  %v4411_v22 = vpop.f32.mrb[216].mxu0 }
 0x855   : > { %v5094_v60 = vmul.f32 %v4934_v19, %v4226_v4  ;;  %v5096_v20 = vmul.f32 %v4936_v41, %v4411_v22  ;;  %v4228_v9 = vpop.f32.mrb[215].mxu1  ;;  %v4413_v16 = vpop.f32.mrb[217].mxu0 }
 0x856   : > { %v5095_v61 = vmul.f32 %v4935_v57, %v4228_v9  ;;  %v5097_v32 = vmul.f32 %v4937_v26, %v4413_v16 }
 0x857   : > { %v7294_v10 = vpack.c.bf16 %v5094_v60, %v5086_v23  ;;  %v7334_v34 = vpack.c.bf16 %v5096_v20, %v5088_v24 }
 0x858   : > { %v7292_v17 = vpack.c.bf16 %v5095_v61, %v5087_v63  ;;  %v7332_v50 = vpack.c.bf16 %v5097_v32, %v5089_v49  ;;  %v4232_v53 = vpop.f32.mrb[216].mxu1  ;;  %v4417_v38 = vpop.f32.mrb[218].mxu0 }
 0x859   : > { %v4234_v1 = vpop.f32.mrb[217].mxu1  ;;  %v4419_v48 = vpop.f32.mrb[219].mxu0  ;;  %v5102_v33 = vmul.f32 %v4942_v29, %v4232_v53  ;;  %v5104_v18 = vmul.f32 %v4944_v3, %v4417_v38  ;;  %v4819_v38 = vld [vmem:[%s10405_s15 + $0xa8] sm:$0xff]  ;;  %v4828_v29 = vld [vmem:[%s10405_s15 + $0xf0] sm:$0xff]  ;;  %v4821_v3 = vld [vmem:[%s10405_s15 + $0xb8] sm:$0xff] }
 0x85a   : > { %7293 = vmatprep.subr.bf16.mxu1 %v7292_v17  ;;  %7333 = vmatprep.subr.bf16.mxu0 %v7332_v50  ;;  %v5103_v40 = vmul.f32 %v4943_v58, %v4234_v1  ;;  %v5105_v46 = vmul.f32 %v4945_v7, %v4419_v48  ;;  %v4820_v17 = vld [vmem:[%s10405_s15 + $0xb0] sm:$0xff]  ;;  %v4827_v1 = vld [vmem:[%s10405_s15 + $0xe8] sm:$0xff]  ;;  %v4829_v48 = vld [vmem:[%s10405_s15 + $0xf8] sm:$0xff] }
 0x85b   : > { %7295 = vmatpush1.bf16.msra.mxu1 %v7294_v10  ;;  %7335 = vmatpush1.bf16.msra.mxu0 %v7334_v34  ;;  %v4818_v34 = vld [vmem:[%s10405_s15 + $0xa0] sm:$0xff] }
 0x85c   : > { %v4238_v13 = vpop.f32.mrb[218].mxu1  ;;  %v4423_v2 = vpop.f32.mrb[220].mxu0 }
 0x85d   : > { %v5110_v59 = vmul.f32 %v4950_v56, %v4238_v13  ;;  %v5112_v15 = vmul.f32 %v4952_v55, %v4423_v2  ;;  %v4240_v12 = vpop.f32.mrb[219].mxu1  ;;  %v4425_v52 = vpop.f32.mrb[221].mxu0 }
 0x85e   : > { %v5111_v31 = vmul.f32 %v4951_v42, %v4240_v12  ;;  %v5113_v30 = vmul.f32 %v4953_v35, %v4425_v52 }
 0x85f   : > { %v7298_v28 = vpack.c.bf16 %v5110_v59, %v5102_v33  ;;  %v7338_v54 = vpack.c.bf16 %v5112_v15, %v5104_v18 }
 0x860   : > { %v7296_v45 = vpack.c.bf16 %v5111_v31, %v5103_v40  ;;  %v7336_v8 = vpack.c.bf16 %v5113_v30, %v5105_v46  ;;  %v4494_v51 = vpop.f32.mrb[220].mxu1  ;;  %v4679_v47 = vpop.f32.mrb[222].mxu0 }
 0x861   : > { %v4496_v11 = vpop.f32.mrb[221].mxu1  ;;  %v4681_v6 = vpop.f32.mrb[223].mxu0  ;;  %v4962_v19 = vmul.f32 %v4802_v27, %v4494_v51  ;;  %v4964_v57 = vmul.f32 %v4804_v21, %v4679_v47  ;;  %v4835_v51 = vld [vmem:[%s10405_s15 + $0x128] sm:$0xff]  ;;  %v4842_v47 = vld [vmem:[%s10405_s15 + $0x160] sm:$0xff]  ;;  %v4844_v27 = vld [vmem:[%s10405_s15 + $0x170] sm:$0xff] }
 0x862   : > { %7297 = vmatprep.subr.bf16.mxu1 %v7296_v45  ;;  %7337 = vmatprep.subr.bf16.mxu0 %v7336_v8  ;;  %v4963_v26 = vmul.f32 %v4803_v39, %v4496_v11  ;;  %v4965_v60 = vmul.f32 %v4805_v62, %v4681_v6  ;;  %v4837_v21 = vld [vmem:[%s10405_s15 + $0x138] sm:$0xff]  ;;  %v4843_v11 = vld [vmem:[%s10405_s15 + $0x168] sm:$0xff] }
 0x863   : > { %7299 = vmatpush1.bf16.msra.mxu1 %v7298_v28  ;;  %7339 = vmatpush1.bf16.msra.mxu0 %v7338_v54  ;;  %v4834_v28 = vld [vmem:[%s10405_s15 + $0x120] sm:$0xff]  ;;  %v4836_v54 = vld [vmem:[%s10405_s15 + $0x130] sm:$0xff]  ;;  %v4845_v39 = vld [vmem:[%s10405_s15 + $0x178] sm:$0xff] }
 0x864   : > { %v4500_v41 = vpop.f32.mrb[222].mxu1  ;;  %v4685_v43 = vpop.f32.mrb[224].mxu0 }
 0x865   : > { %v4970_v4 = vmul.f32 %v4810_v25, %v4500_v41  ;;  %v4972_v22 = vmul.f32 %v4812_v44, %v4685_v43  ;;  %v4502_v23 = vpop.f32.mrb[223].mxu1  ;;  %v4687_v24 = vpop.f32.mrb[225].mxu0 }
 0x866   : > { %v4971_v20 = vmul.f32 %v4811_v37, %v4502_v23  ;;  %v4973_v9 = vmul.f32 %v4813_v5, %v4687_v24  ;;  %5188 = vmatmul.mubr.f32.vlgmr.msra.gmra.mrb[4].mxu1 %v10028_v14  ;;  %5259 = vmatmul.mubr.f32.vlgmr.msra.gmra.mrb[6].mxu0 %v10028_v14 }
 0x867   : > { %v7342_v16 = vpack.c.bf16 %v4970_v4, %v4962_v19  ;;  %v7382_v63 = vpack.c.bf16 %v4972_v22, %v4964_v57  ;;  %6452 = vmatprep.mubr.msk.f32.mxu1 %vm3425_vm6, %v9947_v36  ;;  %6453 = vmatprep.mubr.msk.f32.mxu0 %vm3425_vm6, %v9947_v36  ;;  %v4826_v36 = vld [vmem:[%s10405_s15 + $0xe0] sm:$0xff] }
 0x868   : > { %v7340_v49 = vpack.c.bf16 %v4971_v20, %v4963_v26  ;;  %v7380_v61 = vpack.c.bf16 %v4973_v9, %v4965_v60  ;;  %v4506_v32 = vpop.f32.mrb[224].mxu1  ;;  %v4691_v10 = vpop.f32.mrb[226].mxu0 }
 0x869   : > { %v4508_v50 = vpop.f32.mrb[225].mxu1  ;;  %v4693_v53 = vpop.f32.mrb[227].mxu0  ;;  %v4978_v55 = vmul.f32 %v4818_v34, %v4506_v32  ;;  %v4980_v7 = vmul.f32 %v4820_v17, %v4691_v10  ;;  %v4851_v32 = vld [vmem:[%s10405_s15 + $0x1a8] sm:$0xff]  ;;  %v4858_v10 = vld [vmem:[%s10405_s15 + $0x1e0] sm:$0xff]  ;;  %v4860_v34 = vld [vmem:[%s10405_s15 + $0x1f0] sm:$0xff] }
 0x86a   : > { %7341 = vmatprep.subr.bf16.mxu1 %v7340_v49  ;;  %7381 = vmatprep.subr.bf16.mxu0 %v7380_v61  ;;  %v4979_v33 = vmul.f32 %v4819_v38, %v4508_v50  ;;  %v4981_v18 = vmul.f32 %v4821_v3, %v4693_v53  ;;  %v4853_v17 = vld [vmem:[%s10405_s15 + $0x1b8] sm:$0xff]  ;;  %v4859_v50 = vld [vmem:[%s10405_s15 + $0x1e8] sm:$0xff] }
 0x86b   : > { %7343 = vmatpush1.bf16.msra.mxu1 %v7342_v16  ;;  %7383 = vmatpush1.bf16.msra.mxu0 %v7382_v63  ;;  %v4850_v16 = vld [vmem:[%s10405_s15 + $0x1a0] sm:$0xff]  ;;  %v4852_v63 = vld [vmem:[%s10405_s15 + $0x1b0] sm:$0xff]  ;;  %v4861_v53 = vld [vmem:[%s10405_s15 + $0x1f8] sm:$0xff] }
 0x86c   : > { %v4512_v58 = vpop.f32.mrb[226].mxu1  ;;  %v4697_v56 = vpop.f32.mrb[228].mxu0 }
 0x86d   : > { %v4986_v42 = vmul.f32 %v4826_v36, %v4512_v58  ;;  %v4988_v35 = vmul.f32 %v4828_v29, %v4697_v56  ;;  %v4514_v13 = vpop.f32.mrb[227].mxu1  ;;  %v4699_v2 = vpop.f32.mrb[229].mxu0 }
 0x86e   : > { %v4987_v59 = vmul.f32 %v4827_v1, %v4514_v13  ;;  %v4989_v15 = vmul.f32 %v4829_v48, %v4699_v2 }
 0x86f   : > { %v7346_v12 = vpack.c.bf16 %v4986_v42, %v4978_v55  ;;  %v7386_v52 = vpack.c.bf16 %v4988_v35, %v4980_v7 }
 0x870   : > { %v7344_v40 = vpack.c.bf16 %v4987_v59, %v4979_v33  ;;  %v7384_v46 = vpack.c.bf16 %v4989_v15, %v4981_v18  ;;  %v4518_v31 = vpop.f32.mrb[228].mxu1  ;;  %v4703_v30 = vpop.f32.mrb[230].mxu0 }
 0x871   : > { %v4520_v45 = vpop.f32.mrb[229].mxu1  ;;  %v4705_v8 = vpop.f32.mrb[231].mxu0  ;;  %v4994_v25 = vmul.f32 %v4834_v28, %v4518_v31  ;;  %v4996_v44 = vmul.f32 %v4836_v54, %v4703_v30  ;;  %v4867_v31 = vld [vmem:[%s10405_s15 + $0x228] sm:$0xff]  ;;  %v4874_v30 = vld [vmem:[%s10405_s15 + $0x260] sm:$0xff]  ;;  %v4876_v28 = vld [vmem:[%s10405_s15 + $0x270] sm:$0xff] }
 0x872   : > { %7345 = vmatprep.subr.bf16.mxu1 %v7344_v40  ;;  %7385 = vmatprep.subr.bf16.mxu0 %v7384_v46  ;;  %v4995_v43 = vmul.f32 %v4835_v51, %v4520_v45  ;;  %v4997_v57 = vmul.f32 %v4837_v21, %v4705_v8  ;;  %v4869_v54 = vld [vmem:[%s10405_s15 + $0x238] sm:$0xff]  ;;  %v4875_v45 = vld [vmem:[%s10405_s15 + $0x268] sm:$0xff] }
 0x873   : > { %7347 = vmatpush1.bf16.msra.mxu1 %v7346_v12  ;;  %7387 = vmatpush1.bf16.msra.mxu0 %v7386_v52  ;;  %v4866_v12 = vld [vmem:[%s10405_s15 + $0x220] sm:$0xff]  ;;  %v4868_v52 = vld [vmem:[%s10405_s15 + $0x230] sm:$0xff]  ;;  %v4877_v8 = vld [vmem:[%s10405_s15 + $0x278] sm:$0xff] }
 0x874   : > { %v4524_v6 = vpop.f32.mrb[230].mxu1  ;;  %v4709_v62 = vpop.f32.mrb[232].mxu0 }
 0x875   : > { %v5002_v37 = vmul.f32 %v4842_v47, %v4524_v6  ;;  %v5004_v5 = vmul.f32 %v4844_v27, %v4709_v62  ;;  %v4526_v19 = vpop.f32.mrb[231].mxu1  ;;  %v4711_v41 = vpop.f32.mrb[233].mxu0 }
 0x876   : > { %v5003_v26 = vmul.f32 %v4843_v11, %v4526_v19  ;;  %v5005_v4 = vmul.f32 %v4845_v39, %v4711_v41 }
 0x877   : > { %v7350_v22 = vpack.c.bf16 %v5002_v37, %v4994_v25  ;;  %v7390_v23 = vpack.c.bf16 %v5004_v5, %v4996_v44 }
 0x878   : > { %v7348_v24 = vpack.c.bf16 %v5003_v26, %v4995_v43  ;;  %v7388_v60 = vpack.c.bf16 %v5005_v4, %v4997_v57  ;;  %v4530_v20 = vpop.f32.mrb[232].mxu1  ;;  %v4715_v9 = vpop.f32.mrb[234].mxu0 }
 0x879   : > { %v4532_v49 = vpop.f32.mrb[233].mxu1  ;;  %v4717_v61 = vpop.f32.mrb[235].mxu0  ;;  %v5010_v29 = vmul.f32 %v4850_v16, %v4530_v20  ;;  %v5012_v3 = vmul.f32 %v4852_v63, %v4715_v9  ;;  %v4883_v20 = vld [vmem:[%s10405_s15 + $0x2a8] sm:$0xff]  ;;  %v4890_v9 = vld [vmem:[%s10405_s15 + $0x2e0] sm:$0xff]  ;;  %v4892_v16 = vld [vmem:[%s10405_s15 + $0x2f0] sm:$0xff] }
 0x87a   : > { %7349 = vmatprep.subr.bf16.mxu1 %v7348_v24  ;;  %7389 = vmatprep.subr.bf16.mxu0 %v7388_v60  ;;  %v5011_v55 = vmul.f32 %v4851_v32, %v4532_v49  ;;  %v5013_v7 = vmul.f32 %v4853_v17, %v4717_v61  ;;  %v4885_v63 = vld [vmem:[%s10405_s15 + $0x2b8] sm:$0xff]  ;;  %v4891_v49 = vld [vmem:[%s10405_s15 + $0x2e8] sm:$0xff] }
 0x87b   : > { %7351 = vmatpush1.bf16.msra.mxu1 %v7350_v22  ;;  %7391 = vmatpush1.bf16.msra.mxu0 %v7390_v23  ;;  %v4882_v22 = vld [vmem:[%s10405_s15 + $0x2a0] sm:$0xff]  ;;  %v4884_v23 = vld [vmem:[%s10405_s15 + $0x2b0] sm:$0xff]  ;;  %v4893_v61 = vld [vmem:[%s10405_s15 + $0x2f8] sm:$0xff] }
 0x87c   : > { %v4536_v38 = vpop.f32.mrb[234].mxu1  ;;  %v4721_v36 = vpop.f32.mrb[236].mxu0 }
 0x87d   : > { %v5018_v1 = vmul.f32 %v4858_v10, %v4536_v38  ;;  %v5020_v48 = vmul.f32 %v4860_v34, %v4721_v36  ;;  %v4538_v58 = vpop.f32.mrb[235].mxu1  ;;  %v4723_v56 = vpop.f32.mrb[237].mxu0 }
 0x87e   : > { %v5019_v42 = vmul.f32 %v4859_v50, %v4538_v58  ;;  %v5021_v35 = vmul.f32 %v4861_v53, %v4723_v56 }
 0x87f   : > { %v7354_v13 = vpack.c.bf16 %v5018_v1, %v5010_v29  ;;  %v7394_v2 = vpack.c.bf16 %v5020_v48, %v5012_v3 }
 0x880   : > { %v7352_v33 = vpack.c.bf16 %v5019_v42, %v5011_v55  ;;  %v7392_v18 = vpack.c.bf16 %v5021_v35, %v5013_v7  ;;  %v4542_v59 = vpop.f32.mrb[236].mxu1  ;;  %v4727_v15 = vpop.f32.mrb[238].mxu0 }
 0x881   : > { %v4544_v40 = vpop.f32.mrb[237].mxu1  ;;  %v4729_v46 = vpop.f32.mrb[239].mxu0  ;;  %v5026_v27 = vmul.f32 %v4866_v12, %v4542_v59  ;;  %v5028_v21 = vmul.f32 %v4868_v52, %v4727_v15  ;;  %v4899_v59 = vld [vmem:[%s10405_s15 + $0x328] sm:$0xff]  ;;  %v4906_v15 = vld [vmem:[%s10405_s15 + $0x360] sm:$0xff]  ;;  %v4908_v12 = vld [vmem:[%s10405_s15 + $0x370] sm:$0xff] }
 0x882   : > { %7353 = vmatprep.subr.bf16.mxu1 %v7352_v33  ;;  %7393 = vmatprep.subr.bf16.mxu0 %v7392_v18  ;;  %v5027_v25 = vmul.f32 %v4867_v31, %v4544_v40  ;;  %v5029_v44 = vmul.f32 %v4869_v54, %v4729_v46  ;;  %v4901_v52 = vld [vmem:[%s10405_s15 + $0x338] sm:$0xff]  ;;  %v4907_v40 = vld [vmem:[%s10405_s15 + $0x368] sm:$0xff] }
 0x883   : > { %7355 = vmatpush1.bf16.msra.mxu1 %v7354_v13  ;;  %7395 = vmatpush1.bf16.msra.mxu0 %v7394_v2  ;;  %v4898_v13 = vld [vmem:[%s10405_s15 + $0x320] sm:$0xff]  ;;  %v4900_v2 = vld [vmem:[%s10405_s15 + $0x330] sm:$0xff]  ;;  %v4909_v46 = vld [vmem:[%s10405_s15 + $0x378] sm:$0xff] }
 0x884   : > { %v4548_v51 = vpop.f32.mrb[238].mxu1  ;;  %v4733_v47 = vpop.f32.mrb[240].mxu0 }
 0x885   : > { %v5034_v11 = vmul.f32 %v4874_v30, %v4548_v51  ;;  %v5036_v39 = vmul.f32 %v4876_v28, %v4733_v47  ;;  %v4550_v6 = vpop.f32.mrb[239].mxu1  ;;  %v4735_v62 = vpop.f32.mrb[241].mxu0 }
 0x886   : > { %v5035_v37 = vmul.f32 %v4875_v45, %v4550_v6  ;;  %v5037_v5 = vmul.f32 %v4877_v8, %v4735_v62 }
 0x887   : > { %v7358_v19 = vpack.c.bf16 %v5034_v11, %v5026_v27  ;;  %v7398_v41 = vpack.c.bf16 %v5036_v39, %v5028_v21 }
 0x888   : > { %v7356_v43 = vpack.c.bf16 %v5035_v37, %v5027_v25  ;;  %v7396_v57 = vpack.c.bf16 %v5037_v5, %v5029_v44  ;;  %v4554_v26 = vpop.f32.mrb[240].mxu1  ;;  %v4739_v4 = vpop.f32.mrb[242].mxu0 }
 0x889   : > { %v4556_v24 = vpop.f32.mrb[241].mxu1  ;;  %v4741_v60 = vpop.f32.mrb[243].mxu0  ;;  %v5042_v34 = vmul.f32 %v4882_v22, %v4554_v26  ;;  %v5044_v17 = vmul.f32 %v4884_v23, %v4739_v4  ;;  %v4915_v26 = vld [vmem:[%s10405_s15 + $0x3a8] sm:$0xff]  ;;  %v4922_v4 = vld [vmem:[%s10405_s15 + $0x3e0] sm:$0xff]  ;;  %v4924_v22 = vld [vmem:[%s10405_s15 + $0x3f0] sm:$0xff] }
 0x88a   : > { %7357 = vmatprep.subr.bf16.mxu1 %v7356_v43  ;;  %7397 = vmatprep.subr.bf16.mxu0 %v7396_v57  ;;  %v5043_v29 = vmul.f32 %v4883_v20, %v4556_v24  ;;  %v5045_v3 = vmul.f32 %v4885_v63, %v4741_v60  ;;  %v4917_v23 = vld [vmem:[%s10405_s15 + $0x3b8] sm:$0xff]  ;;  %v4923_v24 = vld [vmem:[%s10405_s15 + $0x3e8] sm:$0xff] }
 0x88b   : > { %7359 = vmatpush1.bf16.msra.mxu1 %v7358_v19  ;;  %7399 = vmatpush1.bf16.msra.mxu0 %v7398_v41  ;;  %v4914_v19 = vld [vmem:[%s10405_s15 + $0x3a0] sm:$0xff]  ;;  %v4916_v41 = vld [vmem:[%s10405_s15 + $0x3b0] sm:$0xff]  ;;  %v4925_v60 = vld [vmem:[%s10405_s15 + $0x3f8] sm:$0xff] }
 0x88c   : > { %v4560_v32 = vpop.f32.mrb[242].mxu1  ;;  %v4745_v10 = vpop.f32.mrb[244].mxu0 }
 0x88d   : > { %v5050_v50 = vmul.f32 %v4890_v9, %v4560_v32  ;;  %v5052_v53 = vmul.f32 %v4892_v16, %v4745_v10  ;;  %v4562_v38 = vpop.f32.mrb[243].mxu1  ;;  %v4747_v36 = vpop.f32.mrb[245].mxu0 }
 0x88e   : > { %v5051_v1 = vmul.f32 %v4891_v49, %v4562_v38  ;;  %v5053_v48 = vmul.f32 %v4893_v61, %v4747_v36 }
 0x88f   : > { %v7362_v58 = vpack.c.bf16 %v5050_v50, %v5042_v34  ;;  %v7402_v56 = vpack.c.bf16 %v5052_v53, %v5044_v17 }
 0x890   : > { %v7360_v55 = vpack.c.bf16 %v5051_v1, %v5043_v29  ;;  %v7400_v7 = vpack.c.bf16 %v5053_v48, %v5045_v3  ;;  %v4566_v42 = vpop.f32.mrb[244].mxu1  ;;  %v4751_v35 = vpop.f32.mrb[246].mxu0 }
 0x891   : > { %v4568_v33 = vpop.f32.mrb[245].mxu1  ;;  %v4753_v18 = vpop.f32.mrb[247].mxu0  ;;  %v5058_v28 = vmul.f32 %v4898_v13, %v4566_v42  ;;  %v5060_v54 = vmul.f32 %v4900_v2, %v4751_v35  ;;  %v4931_v42 = vld [vmem:[%s10405_s15 + $0x428] sm:$0xff]  ;;  %v4938_v35 = vld [vmem:[%s10405_s15 + $0x460] sm:$0xff]  ;;  %v4940_v13 = vld [vmem:[%s10405_s15 + $0x470] sm:$0xff] }
 0x892   : > { %7361 = vmatprep.subr.bf16.mxu1 %v7360_v55  ;;  %7401 = vmatprep.subr.bf16.mxu0 %v7400_v7  ;;  %v5059_v27 = vmul.f32 %v4899_v59, %v4568_v33  ;;  %v5061_v21 = vmul.f32 %v4901_v52, %v4753_v18  ;;  %v4933_v2 = vld [vmem:[%s10405_s15 + $0x438] sm:$0xff]  ;;  %v4939_v33 = vld [vmem:[%s10405_s15 + $0x468] sm:$0xff] }
 0x893   : > { %7363 = vmatpush1.bf16.msra.mxu1 %v7362_v58  ;;  %7403 = vmatpush1.bf16.msra.mxu0 %v7402_v56  ;;  %v4930_v58 = vld [vmem:[%s10405_s15 + $0x420] sm:$0xff]  ;;  %v4932_v56 = vld [vmem:[%s10405_s15 + $0x430] sm:$0xff]  ;;  %v4941_v18 = vld [vmem:[%s10405_s15 + $0x478] sm:$0xff] }
 0x894   : > { %v4572_v31 = vpop.f32.mrb[246].mxu1  ;;  %v4757_v30 = vpop.f32.mrb[248].mxu0 }
 0x895   : > { %v5066_v45 = vmul.f32 %v4906_v15, %v4572_v31  ;;  %v5068_v8 = vmul.f32 %v4908_v12, %v4757_v30  ;;  %v4574_v51 = vpop.f32.mrb[247].mxu1  ;;  %v4759_v47 = vpop.f32.mrb[249].mxu0 }
 0x896   : > { %v5067_v11 = vmul.f32 %v4907_v40, %v4574_v51  ;;  %v5069_v39 = vmul.f32 %v4909_v46, %v4759_v47 }
 0x897   : > { %v7366_v6 = vpack.c.bf16 %v5066_v45, %v5058_v28  ;;  %v7406_v62 = vpack.c.bf16 %v5068_v8, %v5060_v54 }
 0x898   : > { %v7364_v25 = vpack.c.bf16 %v5067_v11, %v5059_v27  ;;  %v7404_v44 = vpack.c.bf16 %v5069_v39, %v5061_v21  ;;  %v4578_v37 = vpop.f32.mrb[248].mxu1  ;;  %v4763_v5 = vpop.f32.mrb[250].mxu0 }
 0x899   : > { %v4580_v43 = vpop.f32.mrb[249].mxu1  ;;  %v4765_v57 = vpop.f32.mrb[251].mxu0  ;;  %v5074_v16 = vmul.f32 %v4914_v19, %v4578_v37  ;;  %v5076_v63 = vmul.f32 %v4916_v41, %v4763_v5  ;;  %v4947_v37 = vld [vmem:[%s10405_s15 + $0x4a8] sm:$0xff]  ;;  %v4954_v5 = vld [vmem:[%s10405_s15 + $0x4e0] sm:$0xff]  ;;  %v4956_v19 = vld [vmem:[%s10405_s15 + $0x4f0] sm:$0xff] }
 0x89a   : > { %7365 = vmatprep.subr.bf16.mxu1 %v7364_v25  ;;  %7405 = vmatprep.subr.bf16.mxu0 %v7404_v44  ;;  %v5075_v34 = vmul.f32 %v4915_v26, %v4580_v43  ;;  %v5077_v17 = vmul.f32 %v4917_v23, %v4765_v57  ;;  %v4949_v41 = vld [vmem:[%s10405_s15 + $0x4b8] sm:$0xff]  ;;  %v4955_v43 = vld [vmem:[%s10405_s15 + $0x4e8] sm:$0xff] }
 0x89b   : > { %7367 = vmatpush1.bf16.msra.mxu1 %v7366_v6  ;;  %7407 = vmatpush1.bf16.msra.mxu0 %v7406_v62  ;;  %v4946_v6 = vld [vmem:[%s10405_s15 + $0x4a0] sm:$0xff]  ;;  %v4948_v62 = vld [vmem:[%s10405_s15 + $0x4b0] sm:$0xff]  ;;  %v4957_v57 = vld [vmem:[%s10405_s15 + $0x4f8] sm:$0xff] }
 0x89c   : > { %v4584_v20 = vpop.f32.mrb[250].mxu1  ;;  %v4769_v9 = vpop.f32.mrb[252].mxu0 }
 0x89d   : > { %v5082_v49 = vmul.f32 %v4922_v4, %v4584_v20  ;;  %v5084_v61 = vmul.f32 %v4924_v22, %v4769_v9  ;;  %v4586_v32 = vpop.f32.mrb[251].mxu1  ;;  %v4771_v10 = vpop.f32.mrb[253].mxu0 }
 0x89e   : > { %v5083_v50 = vmul.f32 %v4923_v24, %v4586_v32  ;;  %v5085_v53 = vmul.f32 %v4925_v60, %v4771_v10 }
 0x89f   : > { %v7370_v38 = vpack.c.bf16 %v5082_v49, %v5074_v16  ;;  %v7410_v36 = vpack.c.bf16 %v5084_v61, %v5076_v63 }
 0x8a0   : > { %v7368_v29 = vpack.c.bf16 %v5083_v50, %v5075_v34  ;;  %v7408_v3 = vpack.c.bf16 %v5085_v53, %v5077_v17  ;;  %v4590_v1 = vpop.f32.mrb[252].mxu1  ;;  %v4775_v48 = vpop.f32.mrb[254].mxu0  ;;  %v10453_v50 = vld [vmem:[#allocation2_spill] sm:$0xff] }
 0x8a1   : > { %v4592_v55 = vpop.f32.mrb[253].mxu1  ;;  %v4777_v7 = vpop.f32.mrb[255].mxu0  ;;  %v5090_v12 = vmul.f32 %v4930_v58, %v4590_v1  ;;  %v5092_v52 = vmul.f32 %v4932_v56, %v4775_v48  ;;  %v10257_v53 = vsub.s32 4, %v10453_v50 }
 0x8a2   : > { %7369 = vmatprep.subr.bf16.mxu1 %v7368_v29  ;;  %7409 = vmatprep.subr.bf16.mxu0 %v7408_v3  ;;  %v5091_v28 = vmul.f32 %v4931_v42, %v4592_v55  ;;  %v5093_v54 = vmul.f32 %v4933_v2, %v4777_v7  ;;  %v7473_v29 = vld [vmem:[%s7611_s3 + $0x8] sm:$0x77] }
 0x8a3   : > { %7371 = vmatpush1.bf16.msra.mxu1 %v7370_v38  ;;  %7411 = vmatpush1.bf16.msra.mxu0 %v7410_v36  ;;  %v7472_v38 = vld [vmem:[%s7611_s3] sm:$0x77]  ;;  %v5488_v3 = vcombine.high %v7473_v29, %v7473_v29 }
 0x8a4   : > { %v4596_v59 = vpop.f32.mrb[254].mxu1  ;;  %v4781_v15 = vpop.f32.mrb[0].mxu0  ;;  %v5487_v36 = vcombine.high %v7472_v38, %v7472_v38 }
 0x8a5   : > { %v5098_v40 = vmul.f32 %v4938_v35, %v4596_v59  ;;  %v5100_v46 = vmul.f32 %v4940_v13, %v4781_v15  ;;  %v4598_v31 = vpop.f32.mrb[255].mxu1  ;;  %v4783_v30 = vpop.f32.mrb[1].mxu0 }
 0x8a6   : > { %v5099_v45 = vmul.f32 %v4939_v33, %v4598_v31  ;;  %v5101_v8 = vmul.f32 %v4941_v18, %v4783_v30 }
 0x8a7   : > { %v7374_v51 = vpack.c.bf16 %v5098_v40, %v5090_v12  ;;  %v7414_v47 = vpack.c.bf16 %v5100_v46, %v5092_v52 }
 0x8a8   : > { %v7372_v27 = vpack.c.bf16 %v5099_v45, %v5091_v28  ;;  %v7412_v21 = vpack.c.bf16 %v5101_v8, %v5093_v54  ;;  %v4602_v11 = vpop.f32.mrb[0].mxu1  ;;  %v4787_v39 = vpop.f32.mrb[2].mxu0 }
 0x8a9   : > { %v4604_v25 = vpop.f32.mrb[1].mxu1  ;;  %v4789_v44 = vpop.f32.mrb[3].mxu0  ;;  %v5106_v22 = vmul.f32 %v4946_v6, %v4602_v11  ;;  %v5108_v23 = vmul.f32 %v4948_v62, %v4787_v39  ;;  %v10282_v62 = vld [vmem:[%s10396_s6] sm:$0xff] }
 0x8aa   : > { %7373 = vmatprep.subr.bf16.mxu1 %v7372_v27  ;;  %7413 = vmatprep.subr.bf16.mxu0 %v7412_v21  ;;  %v5107_v16 = vmul.f32 %v4947_v37, %v4604_v25  ;;  %v5109_v63 = vmul.f32 %v4949_v41, %v4789_v44  ;;  %v10298_v37 = vld [vmem:[%s10396_s6 + $0x8] sm:$0xff]  ;;  %v7474_v41 = vld [vmem:[%s7611_s3 + $0x10] sm:$0x77] }
 0x8ab   : > { %7375 = vmatpush1.bf16.msra.mxu1 %v7374_v51  ;;  %7415 = vmatpush1.bf16.msra.mxu0 %v7414_v47 }
 0x8ac   : > { %v4608_v26 = vpop.f32.mrb[2].mxu1  ;;  %v4793_v4 = vpop.f32.mrb[4].mxu0 }
 0x8ad   : > { %v5114_v24 = vmul.f32 %v4954_v5, %v4608_v26  ;;  %v5116_v60 = vmul.f32 %v4956_v19, %v4793_v4  ;;  %v4610_v20 = vpop.f32.mrb[3].mxu1  ;;  %v4795_v9 = vpop.f32.mrb[5].mxu0  ;;  %v10309_v5 = vld [vmem:[%s10396_s6 + $0x10] sm:$0xff]  ;;  %v10320_v19 = vld [vmem:[%s10396_s6 + $0x18] sm:$0xff] }
 0x8ae   : > { %v5115_v49 = vmul.f32 %v4955_v43, %v4610_v20  ;;  %v5117_v61 = vmul.f32 %v4957_v57, %v4795_v9  ;;  %v5489_v43 = vcombine.high %v7474_v41, %v7474_v41  ;;  %v7475_v57 = vld [vmem:[%s7611_s3 + $0x18] sm:$0x77] }
 0x8af   : > { %v7378_v32 = vpack.c.bf16 %v5114_v24, %v5106_v22  ;;  %v7418_v10 = vpack.c.bf16 %v5116_v60, %v5108_v23  ;;  %v5490_v26 = vcombine.high %v7475_v57, %v7475_v57 }
 0x8b0   : > { %v7376_v34 = vpack.c.bf16 %v5115_v49, %v5107_v16  ;;  %v7416_v17 = vpack.c.bf16 %v5117_v61, %v5109_v63 }
 0x8b2   : > { %7377 = vmatprep.subr.bf16.mxu1 %v7376_v34  ;;  %7417 = vmatprep.subr.bf16.mxu0 %v7416_v17 }
 0x8b3   : > { %7379 = vmatpush1.bf16.msra.mxu1 %v7378_v32  ;;  %7419 = vmatpush1.bf16.msra.mxu0 %v7418_v10 }
 0x8b6   : > { %5330 = vmatmul.mubr.f32.vlgmr.msra.gmra.mrb[6].mxu1 %v10028_v14  ;;  %5401 = vmatmul.mubr.f32.vlgmr.msra.gmra.mrb[8].mxu0 %v10028_v14 }
 0x8b7   : > { %5636 = vmatprep.mubr.f32.mxu1 %v7484_v0  ;;  %5725 = vmatprep.mubr.f32.mxu0 %v7484_v0 }
 0x939   : > { %v5189_v1 = vpop.f32.mrb[4].mxu1  ;;  %v5260_v48 = vpop.f32.mrb[6].mxu0 }
 0x93a   : > { %v5410_v58 = vrot.slane %v5189_v1, %v10257_v53  ;;  %v5447_v56 = vsub.f32 1.0, %v5189_v1  ;;  %v5191_v55 = vpop.f32.mrb[5].mxu1  ;;  %v5418_v7 = vrot.slane %v5260_v48, %v10257_v53  ;;  %v5449_v14 = vsub.f32 1.0, %v5260_v48  ;;  %v5262_v42 = vpop.f32.mrb[7].mxu0 }
 0x93b   : > { %v5414_v35 = vrot.slane %v5191_v55, %v10257_v53  ;;  %v5448_v13 = vsub.f32 1.0, %v5191_v55  ;;  %v5422_v2 = vrot.slane %v5262_v42, %v10257_v53  ;;  %v5450_v33 = vsub.f32 1.0, %v5262_v42 }
 0x93c   : > { %v5439_v18 = vmul.f32 %v5410_v58, %v5189_v1  ;;  %v5458_v59 = vrot.slane %v5447_v56, %v10257_v53  ;;  %v5441_v15 = vmul.f32 %v5418_v7, %v5260_v48  ;;  %v5466_v12 = vrot.slane %v5449_v14, %v10257_v53 }
 0x93d   : > { %v5440_v52 = vmul.f32 %v5414_v35, %v5191_v55  ;;  %v5462_v40 = vrot.slane %v5448_v13, %v10257_v53  ;;  %v5442_v46 = vmul.f32 %v5422_v2, %v5262_v42  ;;  %v5470_v31 = vrot.slane %v5450_v33, %v10257_v53 }
 0x93e   : > { %v5495_v30 = vmul.f32 %v7472_v38, %v5458_v59  ;;  %v5497_v28 = vmul.f32 %v7473_v29, %v5466_v12  ;;  %v10454_v59 = vmov 0.0|0.0  }
 0x93f   : > { %v5496_v54 = vmul.f32 %v5487_v36, %v5462_v40  ;;  %v5498_v45 = vmul.f32 %v5488_v3, %v5470_v31 }
 0x940   : > { %v5503_v8 = vadd.f32 %v5495_v30, %v5439_v18  ;;  %v5505_v51 = vadd.f32 %v5497_v28, %v5441_v15 }
 0x941   : > { %v5504_v47 = vadd.f32 %v5496_v54, %v5440_v52  ;;  %v5506_v27 = vadd.f32 %v5498_v45, %v5442_v46 }
 0x942   : > { %v5512_v21 = vsel %vm5511_vm7, %v5503_v8, %v5189_v1  ;;  %v5514_v11 = vsel %vm5511_vm7, %v5505_v51, %v5260_v48 }
 0x943   : > { %v5513_v39 = vsel %vm5511_vm7, %v5504_v47, %v5191_v55  ;;  %v5515_v6 = vsel %vm5511_vm7, %v5506_v27, %v5262_v42 }
 0x944   : > { %v5528_v25 = vcombine.low %v5512_v21, %v5513_v39  ;;  %6454 = vmatprep.subr.msk.mxu1 %vm674_vm0, %v5513_v39  ;;  %v5529_v44 = vcombine.low %v5514_v11, %v5515_v6  ;;  %6460 = vmatprep.subr.msk.mxu0 %vm674_vm0, %v5515_v6 }
 0x945   : > { %6455 = vmatpush1.msk.msra.mxu1 %vm674_vm0, %v5512_v21  ;;  %6461 = vmatpush1.msk.msra.mxu0 %vm674_vm0, %v5514_v11 }
 0x946   : > { %5536 = vst [vmem:[%s10275_s4] sm:$0xff] %v5528_v25  ;;  %5537 = vst [vmem:[%s10275_s4 + $0x8] sm:$0xff] %v5529_v44  ;;  %6456 = vmatmul.mubr.msk.f32.vlgmr.msra.gmra.mrb[8].mxu1 %vm1567_vm3, %v10282_v62  ;;  %6462 = vmatmul.mubr.msk.f32.vlgmr.msra.gmra.mrb[10].mxu0 %vm1567_vm3, %v10282_v62 }
 0x947   : > { %5642 = vmatprep.mubr.f32.mxu1 %v7484_v0  ;;  %5731 = vmatprep.mubr.f32.mxu0 %v7484_v0 }
 0x94a   : > { %6457 = vmatmul.mubr.msk.f32.gmra.mrb[10].mxu1 %vm1567_vm3, %v10298_v37  ;;  %6463 = vmatmul.mubr.msk.f32.gmra.mrb[12].mxu0 %vm1567_vm3, %v10298_v37 }
 0x94b   : > { %5648 = vmatprep.mubr.f32.mxu1 %v7484_v0  ;;  %5737 = vmatprep.mubr.f32.mxu0 %v7484_v0 }
 0x94e   : > { %6458 = vmatmul.mubr.msk.f32.gmra.mrb[12].mxu1 %vm1567_vm3, %v10309_v5  ;;  %6464 = vmatmul.mubr.msk.f32.gmra.mrb[14].mxu0 %vm1567_vm3, %v10309_v5 }
 0x94f   : > { %5654 = vmatprep.mubr.f32.mxu1 %v7484_v0  ;;  %5743 = vmatprep.mubr.f32.mxu0 %v7484_v0 }
 0x952   : > { %6459 = vmatmul.mubr.msk.f32.gmra.mrb[14].mxu1 %vm1567_vm3, %v10320_v19  ;;  %6465 = vmatmul.mubr.msk.f32.gmra.mrb[16].mxu0 %vm1567_vm3, %v10320_v19 }
 0x953   : > { %5814 = vmatprep.mubr.f32.mxu1 %v7484_v0  ;;  %5903 = vmatprep.mubr.f32.mxu0 %v7484_v0 }
 0x989   : > { %v5331_v4 = vpop.f32.mrb[6].mxu1  ;;  %v5402_v22 = vpop.f32.mrb[8].mxu0 }
 0x98a   : > { %v5426_v23 = vrot.slane %v5331_v4, %v10257_v53  ;;  %v5451_v24 = vsub.f32 1.0, %v5331_v4  ;;  %v5333_v60 = vpop.f32.mrb[7].mxu1  ;;  %v5434_v20 = vrot.slane %v5402_v22, %v10257_v53  ;;  %v5453_v9 = vsub.f32 1.0, %v5402_v22  ;;  %v5404_v16 = vpop.f32.mrb[9].mxu0 }
 0x98b   : > { %v5430_v63 = vrot.slane %v5333_v60, %v10257_v53  ;;  %v5452_v49 = vsub.f32 1.0, %v5333_v60  ;;  %v5438_v61 = vrot.slane %v5404_v16, %v10257_v53  ;;  %v5454_v32 = vsub.f32 1.0, %v5404_v16 }
 0x98c   : > { %v5474_v10 = vrot.slane %v5451_v24, %v10257_v53  ;;  %v5445_v34 = vmul.f32 %v5434_v20, %v5402_v22  ;;  %v5482_v17 = vrot.slane %v5453_v9, %v10257_v53  ;;  %v5443_v29 = vmul.f32 %v5426_v23, %v5331_v4 }
 0x98d   : > { %v5478_v50 = vrot.slane %v5452_v49, %v10257_v53  ;;  %v5446_v38 = vmul.f32 %v5438_v61, %v5404_v16  ;;  %v5486_v36 = vrot.slane %v5454_v32, %v10257_v53  ;;  %v5444_v48 = vmul.f32 %v5430_v63, %v5333_v60 }
 0x98e   : > { %v5499_v3 = vmul.f32 %v7474_v41, %v5474_v10  ;;  %v5501_v1 = vmul.f32 %v7475_v57, %v5482_v17 }
 0x98f   : > { %v5500_v58 = vmul.f32 %v5489_v43, %v5478_v50  ;;  %v5502_v56 = vmul.f32 %v5490_v26, %v5486_v36 }
 0x990   : > { %v5507_v55 = vadd.f32 %v5499_v3, %v5443_v29  ;;  %v5509_v7 = vadd.f32 %v5501_v1, %v5445_v34 }
 0x991   : > { %v5508_v14 = vadd.f32 %v5500_v58, %v5444_v48  ;;  %v5510_v42 = vadd.f32 %v5502_v56, %v5446_v38 }
 0x992   : > { %v5516_v35 = vsel %vm5511_vm7, %v5507_v55, %v5331_v4  ;;  %v5518_v13 = vsel %vm5511_vm7, %v5509_v7, %v5402_v22 }
 0x993   : > { %v5517_v2 = vsel %vm5511_vm7, %v5508_v14, %v5333_v60  ;;  %v5519_v53 = vsel %vm5511_vm7, %v5510_v42, %v5404_v16 }
 0x994   : > { %v5530_v33 = vcombine.low %v5516_v35, %v5517_v2  ;;  %6466 = vmatprep.subr.msk.mxu1 %vm674_vm0, %v5517_v2  ;;  %v5531_v18 = vcombine.low %v5518_v13, %v5519_v53  ;;  %6472 = vmatprep.subr.msk.mxu0 %vm674_vm0, %v5519_v53 }
 0x995   : > { %6467 = vmatpush1.msk.msra.mxu1 %vm674_vm0, %v5516_v35  ;;  %6473 = vmatpush1.msk.msra.mxu0 %vm674_vm0, %v5518_v13 }
 0x996   : > { %5538 = vst [vmem:[%s10275_s4 + $0x10] sm:$0xff] %v5530_v33  ;;  %6468 = vmatmul.mubr.msk.f32.vlgmr.msra.gmra.mrb[16].mxu1 %vm1567_vm3, %v10282_v62  ;;  %5539 = vst [vmem:[%s10275_s4 + $0x18] sm:$0xff] %v5531_v18  ;;  %6474 = vmatmul.mubr.msk.f32.vlgmr.msra.gmra.mrb[18].mxu0 %vm1567_vm3, %v10282_v62  ;;  %s638_s4 = scalar_lea.vmem %s10408_s18, %s6231_s28 }
 0x997   : > { %5820 = vmatprep.mubr.f32.mxu1 %v7484_v0  ;;  %5909 = vmatprep.mubr.f32.mxu0 %v7484_v0 }
 0x998   : > { %7420 = vmatprep.subr.bf16.mxu1 %v10454_v59 }
 0x99a   : > { %6469 = vmatmul.mubr.msk.f32.gmra.mrb[18].mxu1 %vm1567_vm3, %v10298_v37  ;;  %6475 = vmatmul.mubr.msk.f32.gmra.mrb[20].mxu0 %vm1567_vm3, %v10298_v37 }
 0x99b   : > { %5826 = vmatprep.mubr.f32.mxu1 %v7484_v0  ;;  %5915 = vmatprep.mubr.f32.mxu0 %v7484_v0 }
 0x99e   : > { %6470 = vmatmul.mubr.msk.f32.gmra.mrb[20].mxu1 %vm1567_vm3, %v10309_v5  ;;  %6476 = vmatmul.mubr.msk.f32.gmra.mrb[22].mxu0 %vm1567_vm3, %v10309_v5 }
 0x99f   : > { %5832 = vmatprep.mubr.f32.mxu1 %v7484_v0  ;;  %5921 = vmatprep.mubr.f32.mxu0 %v7484_v0 }
 0x9a2   : > { %6471 = vmatmul.mubr.msk.f32.gmra.mrb[22].mxu1 %vm1567_vm3, %v10320_v19  ;;  %6477 = vmatmul.mubr.msk.f32.gmra.mrb[24].mxu0 %vm1567_vm3, %v10320_v19 }
 0x9a3   : > { %7029 = vmatprep.mubr.msk.f32.mxu1 %vm7486_vm4, %v7484_v0 }
 0xa19   : > { %v5638_v15 = vpop.f32.mrb[8].mxu1  ;;  %v5727_v12 = vpop.f32.mrb[10].mxu0 }
 0xa1a   : > { %v5928_v52 = vmax.f32 %v5638_v15, 0.0  ;;  %v5640_v40 = vpop.f32.mrb[9].mxu1  ;;  %v5729_v46 = vpop.f32.mrb[11].mxu0  ;;  %v5930_v30 = vmax.f32 %v5727_v12, 0.0 }
 0xa1b   : > { %v5929_v31 = vmax.f32 %v5640_v40, 0.0  ;;  %v5931_v45 = vmax.f32 %v5729_v46, 0.0 }
 0xa1d   : > { %v5960_v28 = vadd.f32 %v5929_v31, %v5928_v52  ;;  %v5644_v54 = vpop.f32.mrb[10].mxu1  ;;  %v5733_v8 = vpop.f32.mrb[12].mxu0 }
 0xa1e   : > { %v5936_v51 = vmax.f32 %v5644_v54, 0.0  ;;  %v5646_v47 = vpop.f32.mrb[11].mxu1  ;;  %v5735_v27 = vpop.f32.mrb[13].mxu0  ;;  %v5938_v39 = vmax.f32 %v5733_v8, 0.0 }
 0xa1f   : > { %v5937_v21 = vmax.f32 %v5646_v47, 0.0  ;;  %v5961_v11 = vadd.f32 %v5960_v28, %v5930_v30  ;;  %v5939_v25 = vmax.f32 %v5735_v27, 0.0 }
 0xa21   : > { %v5969_v6 = vadd.f32 %v5937_v21, %v5936_v51  ;;  %v5650_v62 = vpop.f32.mrb[12].mxu1  ;;  %v5962_v0 = vadd.f32 %v5961_v11, %v5931_v45  ;;  %v5739_v44 = vpop.f32.mrb[14].mxu0 }
 0xa22   : > { %v5944_v37 = vmax.f32 %v5650_v62, 0.0  ;;  %v5652_v5 = vpop.f32.mrb[13].mxu1  ;;  %v5741_v19 = vpop.f32.mrb[15].mxu0  ;;  %v5946_v57 = vmax.f32 %v5739_v44, 0.0 }
 0xa23   : > { %v5945_v41 = vmax.f32 %v5652_v5, 0.0  ;;  %v5970_v43 = vadd.f32 %v5969_v6, %v5938_v39  ;;  %v5947_v23 = vmax.f32 %v5741_v19, 0.0 }
 0xa25   : > { %v5978_v26 = vadd.f32 %v5945_v41, %v5944_v37  ;;  %v5656_v4 = vpop.f32.mrb[14].mxu1  ;;  %v5971_v22 = vadd.f32 %v5970_v43, %v5939_v25  ;;  %v5745_v24 = vpop.f32.mrb[16].mxu0 }
 0xa26   : > { %v5952_v60 = vmax.f32 %v5656_v4, 0.0  ;;  %v5658_v20 = vpop.f32.mrb[15].mxu1  ;;  %v5747_v9 = vpop.f32.mrb[17].mxu0  ;;  %v5954_v49 = vmax.f32 %v5745_v24, 0.0 }
 0xa27   : > { %v5953_v16 = vmax.f32 %v5658_v20, 0.0  ;;  %v5979_v63 = vadd.f32 %v5978_v26, %v5946_v57  ;;  %v5955_v10 = vmax.f32 %v5747_v9, 0.0 }
 0xa29   : > { %v5987_v61 = vadd.f32 %v5953_v16, %v5952_v60  ;;  %v5980_v32 = vadd.f32 %v5979_v63, %v5947_v23 }
 0xa2b   : > { %v5988_v34 = vadd.f32 %v5987_v61, %v5954_v49  ;;  %v6000_v61 = vld [vmem:[%s10397_s7] sm:$0x3] }
 0xa2d   : > { %v5989_v17 = vadd.f32 %v5988_v34, %v5955_v10 }
 0xa69   : > { %v5816_v50 = vpop.f32.mrb[16].mxu1  ;;  %v5905_v38 = vpop.f32.mrb[18].mxu0 }
 0xa6a   : > { %v5932_v36 = vmax.f32 %v5816_v50, 0.0  ;;  %v5818_v29 = vpop.f32.mrb[17].mxu1  ;;  %v5907_v3 = vpop.f32.mrb[19].mxu0  ;;  %v5934_v58 = vmax.f32 %v5905_v38, 0.0 }
 0xa6b   : > { %v5933_v1 = vmax.f32 %v5818_v29, 0.0  ;;  %v5935_v33 = vmax.f32 %v5907_v3, 0.0 }
 0xa6c   : > { %v5963_v48 = vadd.f32 %v5962_v0, %v5932_v36 }
 0xa6d   : > { %v5822_v56 = vpop.f32.mrb[18].mxu1  ;;  %v5911_v55 = vpop.f32.mrb[20].mxu0 }
 0xa6e   : > { %v5964_v7 = vadd.f32 %v5963_v48, %v5933_v1  ;;  %v5940_v14 = vmax.f32 %v5822_v56, 0.0  ;;  %v5824_v42 = vpop.f32.mrb[19].mxu1  ;;  %v5913_v35 = vpop.f32.mrb[21].mxu0  ;;  %v5942_v18 = vmax.f32 %v5911_v55, 0.0 }
 0xa6f   : > { %v5941_v13 = vmax.f32 %v5824_v42, 0.0  ;;  %v5943_v8 = vmax.f32 %v5913_v35, 0.0 }
 0xa70   : > { %v5972_v2 = vadd.f32 %v5971_v22, %v5940_v14  ;;  %v5965_v53 = vadd.f32 %v5964_v7, %v5934_v58 }
 0xa71   : > { %v5828_v15 = vpop.f32.mrb[20].mxu1  ;;  %v5917_v12 = vpop.f32.mrb[22].mxu0 }
 0xa72   : > { %v5973_v52 = vadd.f32 %v5972_v2, %v5941_v13  ;;  %v5948_v40 = vmax.f32 %v5828_v15, 0.0  ;;  %v5830_v46 = vpop.f32.mrb[21].mxu1  ;;  %v5919_v31 = vpop.f32.mrb[23].mxu0  ;;  %v5966_v30 = vadd.f32 %v5965_v53, %v5935_v33  ;;  %v5950_v51 = vmax.f32 %v5917_v12, 0.0 }
 0xa73   : > { %v5949_v28 = vmax.f32 %v5830_v46, 0.0  ;;  %v5951_v37 = vmax.f32 %v5919_v31, 0.0 }
 0xa74   : > { %v5981_v54 = vadd.f32 %v5980_v32, %v5948_v40  ;;  %v5974_v45 = vadd.f32 %v5973_v52, %v5942_v18  ;;  %5967 = vadd.xlane.f32.xlu1 %v5966_v30 }
 0xa75   : > { %v5834_v47 = vpop.f32.mrb[22].mxu1  ;;  %v5923_v27 = vpop.f32.mrb[24].mxu0 }
 0xa76   : > { %v5982_v21 = vadd.f32 %v5981_v54, %v5949_v28  ;;  %v5956_v11 = vmax.f32 %v5834_v47, 0.0  ;;  %v5836_v39 = vpop.f32.mrb[23].mxu1  ;;  %v5925_v6 = vpop.f32.mrb[25].mxu0  ;;  %v5975_v62 = vadd.f32 %v5974_v45, %v5943_v8  ;;  %v5958_v5 = vmax.f32 %v5923_v27, 0.0 }
 0xa77   : > { %v5957_v0 = vmax.f32 %v5836_v39, 0.0  ;;  %v5959_v57 = vmax.f32 %v5925_v6, 0.0 }
 0xa78   : > { %v5990_v25 = vadd.f32 %v5989_v17, %v5956_v11  ;;  %v5983_v44 = vadd.f32 %v5982_v21, %v5950_v51  ;;  %5976 = vadd.xlane.f32.xlu0 %v5975_v62 }
 0xa7a   : > { %v5991_v19 = vadd.f32 %v5990_v25, %v5957_v0  ;;  %v5984_v41 = vadd.f32 %v5983_v44, %v5951_v37 }
 0xa7c   : > { %v5992_v43 = vadd.f32 %v5991_v19, %v5958_v5  ;;  %5985 = vadd.xlane.f32.xlu0 %v5984_v41 }
 0xa7e   : > { %v5993_v26 = vadd.f32 %v5992_v43, %v5959_v57 }
 0xa80   : > { %5994 = vadd.xlane.f32.xlu1 %v5993_v26 }
 0xb01   : > { %v5968_v4 = vpop.xlane.xlu1 %5967 }
 0xb02   : > { %v5996_v23 = vmul.f32 0.0009765625, %v5968_v4 }
 0xb05   : > { %v5977_v22 = vpop.xlane.xlu0 %5976 }
 0xb06   : > { %v5997_v24 = vmul.f32 0.0009765625, %v5977_v22 }
 0xb08   : > { %v7421_v60 = vpack.c.bf16 %v5997_v24, %v5996_v23 }
 0xb09   : > { %v5986_v20 = vpop.xlane.xlu0 %5985 }
 0xb0a   : > { %7422 = vmatpush3.bf16.msra.mxu1 %v7421_v60  ;;  %v5998_v16 = vmul.f32 0.0009765625, %v5986_v20 }
 0xb0b   : > { %7423 = vmatprep.subr.bf16.mxu1 %v10454_v59 }
 0xb0d   : > { %v5995_v9 = vpop.xlane.xlu1 %5994 }
 0xb0e   : > { %v5999_v63 = vmul.f32 0.0009765625, %v5995_v9 }
 0xb10   : > { %v7424_v49 = vpack.c.bf16 %v5999_v63, %v5998_v16 }
 0xb12   : > { %7425 = vmatpush3.bf16.msra.mxu1 %v7424_v49 }
 0xb15   : > { %7030 = vmatmul.mubr.msk.f32.vlgmr.msra.gmra.mrb[24].mxu1 %vm3425_vm6, %v6000_v61 }
 0xbe8   : > { %v6070_v32 = vpop.f32.mrb[24].mxu1 }
 0xbe9   : > { %v6075_v10 = vsel %vm6074_vm8, %v6070_v32, -inf  ;;  %6094 = vst.msk [vmem:[%s638_s4] sm:$0x3] %vm6074_vm8, %v6070_v32  ;;  %v7031_v59 = vpop.f32.mrb[25].mxu1 }
 0xbea   : > { %v6076_v34 = vrot.slane %v6075_v10, 4 }
 0xbec   : > { %v6077_v17 = vmax.f32 %v6075_v10, %v6076_v34 }
 0xbee   : > { %v6078_v50 = vrot.slane %v6077_v17, 2 }
 0xbf0   : > { %v6079_v38 = vmax.f32 %v6077_v17, %v6078_v50 }
 0xbf2   : > { %v6080_v36 = vrot.slane %v6079_v38, 1 }
 0xbf4   : > { %v6081_v29 = vmax.f32 %v6079_v38, %v6080_v36 }
 0xbf6   : > { %v6082_v3 = vsub.f32 %v6070_v32, %v6081_v29 }
 0xbf8   : > { %v6083_v1 = vmul.f32 1.442695, %v6082_v3 }
 0xbfa   : > { %7458 = vpow2.f32 %v6083_v1 }
 0xc04   : > { %v7459_v48 = vpop.eup %7458 }
 0xc05   : > { %v6085_v58 = vsel %vm6074_vm8, %v7459_v48, 0.0 }
 0xc06   : > { %v6086_v56 = vrot.slane %v6085_v58, 4 }
 0xc08   : > { %v6087_v55 = vadd.f32 %v6086_v56, %v6085_v58 }
 0xc0a   : > { %v6088_v7 = vrot.slane %v6087_v55, 2 }
 0xc0c   : > { %v6089_v14 = vadd.f32 %v6088_v7, %v6087_v55 }
 0xc0e   : > { %v6090_v42 = vrot.slane %v6089_v14, 1 }
 0xc10   : > { %v6091_v35 = vadd.f32 %v6090_v42, %v6089_v14 }
 0xc12   : > { %7460 = vrcp.f32 %v6091_v35 }
 0xc1c   : > { %v7461_v13 = vpop.eup %7460 }
 0xc1d   : > { %v6093_v2 = vmul.f32 %v7461_v13, %v7459_v48 }
 0xc1f   : > { %6096 = vst.msk [vmem:[%s641_s20] sm:$0x1] %vm6095_vm9, %v6093_v2 }
 0xc20 PF: > { %s30_s0 = sadd.s32 1, %s7482_s0  }
 0xc21   : > { %p27_p4 = scmp.ge.s32.totalorder %s30_s0, 4  }
 0xc23   :  { %29 = sbr.rel (!%p27_p4) target bundleno = 6 (0x6), region = 145 }

</bundles_post_ra>
